<compile_context>
chip_gen: v6e
topology: v6e:2x2x1
jax: 0.10.0
libtpu: 0.0.40
codegen_flags: <defaults>
</compile_context>

<pallas_src>
import jax
import jax.numpy as jnp
from jax.experimental import pallas as pl
from jax.experimental.pallas import tpu as pltpu


def mynet_fused_kernel(z_ref, w1_ref, b1_ref, w2_ref, b2_ref, o_ref):
    # z_ref : (4*TB, 729)  -- rows ordered (pool-parity q, image b_local); 27*27 window
    # w1_ref: (729, 864)   -- Toeplitz conv weights, columns = (c, ph, pw)
    # b1_ref: (1, 864)     -- conv bias broadcast over (ph, pw)
    # w2_ref: (864, 128)   -- Linear weight (W2.T) zero-padded from 10 to 128 lanes
    # b2_ref: (1, 128)     -- Linear bias, zero-padded
    # o_ref : (TB, 128)    -- lane-dense output block; wrapper slices [:, :10]
    tb = o_ref.shape[0]
    # Conv + bias + ReLU: one big lane-dense MXU matmul (M = 4*TB rows).
    r = jnp.dot(z_ref[...], w1_ref[...], preferred_element_type=jnp.float32)  # (4*TB, 864)
    r = jnp.maximum(r + b1_ref[...], 0.0)
    # 2x2 max-pool == elementwise max over the 4 parity row-blocks (sublane-tile-aligned
    # static slices, tb % 8 == 0; no minor-dim reshapes).
    pooled = jnp.maximum(jnp.maximum(r[0 * tb:1 * tb], r[1 * tb:2 * tb]),
                         jnp.maximum(r[2 * tb:3 * tb], r[3 * tb:4 * tb]))      # (TB, 864)
    # Fused Linear layer on the already lane-dense pooled features.
    out = jnp.dot(pooled, w2_ref[...], preferred_element_type=jnp.float32) + b2_ref[...]
    o_ref[...] = out.astype(o_ref.dtype)


def prepare_params(Wc, bc, W2, b2):
    """One-time conversion of PyTorch-layout weights into kernel-ready layouts."""
    w = Wc.astype(jnp.float32)[:, 0]                       # (6, 5, 5)
    r = jnp.arange(27)
    p = jnp.arange(12)
    koff = r[:, None] - 2 * p[None, :]                     # (27, 12): r - 2*ph (== s - 2*pw)
    valid = (koff >= 0) & (koff < 5)
    kidx = jnp.clip(koff, 0, 4)
    # W1[r, s, c, ph, pw] = w[c, r - 2*ph, s - 2*pw], masked to the 5x5 support.
    g = w[:, kidx, :]                                      # (6, 27, 12, 5)       [c, r, ph, kw]
    g = g[:, :, :, kidx]                                   # (6, 27, 12, 27, 12)  [c, r, ph, s, pw]
    mask = valid[None, :, :, None, None] & valid[None, None, None, :, :]
    g = jnp.where(mask, g, 0.0)
    W1 = g.transpose(1, 3, 0, 2, 4).reshape(27 * 27, 6 * 12 * 12)   # (729, 864)
    b1row = jnp.repeat(bc.astype(jnp.float32), 144).reshape(1, 864)
    # Linear weight transposed (flatten order (c,h,w) matches our column order) and
    # zero-padded to a lane-dense N=128.  Padded columns stay exactly zero.
    W2Tp = jnp.zeros((864, 128), jnp.float32).at[:, :10].set(W2.astype(jnp.float32).T)
    b2row = jnp.zeros((1, 128), jnp.float32).at[0, :10].set(b2.astype(jnp.float32))
    return W1, b1row, W2Tp, b2row


def _round_up(n, m):
    return ((n + m - 1) // m) * m


def _pick_tb(B):
    # M = 4*tb rows feed the first matmul.  Target big M (>=128 v5e, >=256 v6e/v7x)
    # when the batch allows it, but keep >=2 grid steps so v7x's two TensorCores
    # both get work via dimension_semantics=("parallel",).
    return max(8, min(128, _round_up(-(-B // 2), 8)))


def mynet_forward(x, W1, b1row, W2Tp, b2row, *, tb=None):
    """MyNet forward given kernel-ready params from prepare_params(). x: (B,1,28,28)."""
    B = x.shape[0]
    if tb is None:
        tb = _pick_tb(B)
    assert tb % 8 == 0
    bp = _round_up(B, tb)
    nb = bp // tb

    x2 = x[:, 0].astype(jnp.float32)                       # (B, 28, 28)
    if bp != B:
        x2 = jnp.pad(x2, ((0, bp - B), (0, 0), (0, 0)))
    # Four pool-parity-shifted 27x27 windows per image, pre-ordered per batch block
    # as rows (q, b_local) so each grid step gets a flat (4*tb, 729) slab.
    z = jnp.stack([x2[:, qi:qi + 27, qj:qj + 27].reshape(bp, 27 * 27)
                   for qi in (0, 1) for qj in (0, 1)], axis=0)        # (4, bp, 729)
    z = z.reshape(4, nb, tb, 729).transpose(1, 0, 2, 3).reshape(nb * 4 * tb, 729)

    flops = 2 * (4 * bp) * 729 * 864 + 2 * bp * 864 * 128
    bytes_accessed = 4 * (z.size + W1.size + b1row.size + W2Tp.size + b2row.size + bp * 128)

    out = pl.pallas_call(
        mynet_fused_kernel,
        out_shape=jax.ShapeDtypeStruct((bp, 128), jnp.float32),
        grid=(nb,),
        in_specs=[
            pl.BlockSpec((4 * tb, 729), lambda ib: (ib, 0)),
            # Resident weights: constant index_map -> fetched once, stay in VMEM.
            pl.BlockSpec((729, 864), lambda ib: (0, 0)),
            pl.BlockSpec((1, 864), lambda ib: (0, 0)),
            pl.BlockSpec((864, 128), lambda ib: (0, 0)),
            pl.BlockSpec((1, 128), lambda ib: (0, 0)),
        ],
        out_specs=pl.BlockSpec((tb, 128), lambda ib: (ib, 0)),
        compiler_params=pltpu.CompilerParams(
            dimension_semantics=("parallel",),
            vmem_limit_bytes=32 * 1024 * 1024),
        cost_estimate=pl.CostEstimate(flops=flops, transcendentals=0,
                                      bytes_accessed=bytes_accessed),
    )(z, W1, b1row, W2Tp, b2row)
    return out[:B, :10]


def ref_forward(x, Wc, bc, W2, b2):
    # Pure-JAX reference matching the PyTorch forward exactly.
    y = jax.lax.conv_general_dilated(
        x, Wc, window_strides=(1, 1), padding='VALID',
        dimension_numbers=('NCHW', 'OIHW', 'NCHW'))            # (B, 6, 24, 24)
    y = y + bc.reshape(1, 6, 1, 1)
    y = jnp.maximum(y, 0.0)
    y = jax.lax.reduce_window(y, -jnp.inf, jax.lax.max,
                              (1, 1, 2, 2), (1, 1, 2, 2), 'VALID')  # (B, 6, 12, 12)
    y = y.reshape(x.shape[0], 864)
    return y @ W2.T + b2


if __name__ == "__main__":
    key = jax.random.PRNGKey(0)
    k1, k2, k3, k4, k5 = jax.random.split(key, 5)
    B = 32
    # Forward implies a 28x28 single-channel input (24x24 conv -> 12x12 pool -> 864).
    x = jax.random.normal(k1, (B, 1, 28, 28), jnp.float32)
    Wc = jax.random.normal(k2, (6, 1, 5, 5), jnp.float32) * 0.2
    bc = jax.random.normal(k3, (6,), jnp.float32) * 0.1
    W2 = jax.random.normal(k4, (10, 864), jnp.float32) * 0.05
    b2 = jax.random.normal(k5, (10,), jnp.float32) * 0.1

    # Weight preprocessing hoisted out of the per-forward hot path.
    params = prepare_params(Wc, bc, W2, b2)

    fwd = jax.jit(mynet_forward)
    out = jax.block_until_ready(fwd(x, *params))

    ref = ref_forward(x, Wc, bc, W2, b2)
    assert out.shape == (B, 10)
    assert jnp.allclose(out, ref, rtol=1e-4, atol=1e-4), float(jnp.max(jnp.abs(out - ref)))
    print("KERNEL_OK")
</pallas_src>

<mosaic_0001>
module attributes {stable_mosaic.version = 11 : i64} {
  func.func @mynet_fused_kernel(%arg0: i32, %arg1: memref<64x729xf32, #tpu.memory_space<vmem>>, %arg2: memref<729x864xf32, #tpu.memory_space<vmem>>, %arg3: memref<1x864xf32, #tpu.memory_space<vmem>>, %arg4: memref<864x128xf32, #tpu.memory_space<vmem>>, %arg5: memref<1x128xf32, #tpu.memory_space<vmem>>, %arg6: memref<16x128xf32, #tpu.memory_space<vmem>>) attributes {dimension_semantics = [#tpu.dimension_semantics<parallel>], iteration_bounds = array<i64: 2>, scalar_prefetch = 0 : i64, scratch_operands = 0 : i64, tpu.core_type = #tpu.core_type<tc>, window_params = [{transform_indices = @transform_0, window_bounds = array<i64: 64, 729>}, {pipeline_mode = #tpu.pipeline_mode<synchronous>, transform_indices = @transform_1, window_bounds = array<i64: 729, 864>}, {pipeline_mode = #tpu.pipeline_mode<synchronous>, transform_indices = @transform_2, window_bounds = array<i64: 1, 864>}, {pipeline_mode = #tpu.pipeline_mode<synchronous>, transform_indices = @transform_3, window_bounds = array<i64: 864, 128>}, {pipeline_mode = #tpu.pipeline_mode<synchronous>, transform_indices = @transform_4, window_bounds = array<i64: 1, 128>}, {transform_indices = @transform_5, window_bounds = array<i64: 16, 128>}]} {
    %c0 = arith.constant 0 : index
    %c0_0 = arith.constant 0 : index
    %0 = vector.load %arg1[%c0, %c0_0] : memref<64x729xf32, #tpu.memory_space<vmem>>, vector<64x729xf32>
    %c0_1 = arith.constant 0 : index
    %c0_2 = arith.constant 0 : index
    %1 = vector.load %arg2[%c0_1, %c0_2] : memref<729x864xf32, #tpu.memory_space<vmem>>, vector<729x864xf32>
    %cst = arith.constant dense<0.000000e+00> : vector<64x864xf32>
    %2 = tpu.matmul %0, %1, %cst {dimension_numbers = #tpu.dot_dimension_numbers<[1], [0], [0], [1], [0, 0, 1, 1], [], []>} : vector<64x729xf32>, vector<729x864xf32>, vector<64x864xf32> -> vector<64x864xf32>
    %c0_3 = arith.constant 0 : index
    %c0_4 = arith.constant 0 : index
    %3 = vector.load %arg3[%c0_3, %c0_4] : memref<1x864xf32, #tpu.memory_space<vmem>>, vector<1x864xf32>
    %4 = vector.broadcast %3 : vector<1x864xf32> to vector<64x864xf32>
    %5 = arith.addf %2, %4 : vector<64x864xf32>
    %cst_5 = arith.constant 0.000000e+00 : f32
    %6 = vector.broadcast %cst_5 : f32 to vector<64x864xf32>
    %7 = arith.maximumf %5, %6 : vector<64x864xf32>
    %8 = vector.extract_strided_slice %7 {offsets = [0, 0], sizes = [16, 864], strides = [1, 1]} : vector<64x864xf32> to vector<16x864xf32>
    %9 = vector.extract_strided_slice %7 {offsets = [16, 0], sizes = [16, 864], strides = [1, 1]} : vector<64x864xf32> to vector<16x864xf32>
    %10 = arith.maximumf %8, %9 : vector<16x864xf32>
    %11 = vector.extract_strided_slice %7 {offsets = [32, 0], sizes = [16, 864], strides = [1, 1]} : vector<64x864xf32> to vector<16x864xf32>
    %12 = vector.extract_strided_slice %7 {offsets = [48, 0], sizes = [16, 864], strides = [1, 1]} : vector<64x864xf32> to vector<16x864xf32>
    %13 = arith.maximumf %11, %12 : vector<16x864xf32>
    %14 = arith.maximumf %10, %13 : vector<16x864xf32>
    %c0_6 = arith.constant 0 : index
    %c0_7 = arith.constant 0 : index
    %15 = vector.load %arg4[%c0_6, %c0_7] : memref<864x128xf32, #tpu.memory_space<vmem>>, vector<864x128xf32>
    %cst_8 = arith.constant dense<0.000000e+00> : vector<16x128xf32>
    %16 = tpu.matmul %14, %15, %cst_8 {dimension_numbers = #tpu.dot_dimension_numbers<[1], [0], [0], [1], [0, 0, 1, 1], [], []>} : vector<16x864xf32>, vector<864x128xf32>, vector<16x128xf32> -> vector<16x128xf32>
    %c0_9 = arith.constant 0 : index
    %c0_10 = arith.constant 0 : index
    %17 = vector.load %arg5[%c0_9, %c0_10] : memref<1x128xf32, #tpu.memory_space<vmem>>, vector<1x128xf32>
    %18 = vector.broadcast %17 : vector<1x128xf32> to vector<16x128xf32>
    %19 = arith.addf %16, %18 : vector<16x128xf32>
    %c0_11 = arith.constant 0 : index
    %c0_12 = arith.constant 0 : index
    %20 = vector.load %arg6[%c0_11, %c0_12] : memref<16x128xf32, #tpu.memory_space<vmem>>, vector<16x128xf32>
    tpu.vector_store %arg6[%c0_11, %c0_12], %19 {strides = array<i32>} : memref<16x128xf32, #tpu.memory_space<vmem>>, vector<16x128xf32>,
    return
  }
  func.func @transform_0(%arg0: i32) -> (i32, i32) {
    %c0_i32 = arith.constant 0 : i32
    %c0_i32_0 = arith.constant 0 : i32
    return %arg0, %c0_i32 : i32, i32
  }
  func.func @transform_1(%arg0: i32) -> (i32, i32) {
    %c0_i32 = arith.constant 0 : i32
    %c0_i32_0 = arith.constant 0 : i32
    %c0_i32_1 = arith.constant 0 : i32
    return %c0_i32, %c0_i32_0 : i32, i32
  }
  func.func @transform_2(%arg0: i32) -> (i32, i32) {
    %c0_i32 = arith.constant 0 : i32
    %c0_i32_0 = arith.constant 0 : i32
    %c0_i32_1 = arith.constant 0 : i32
    return %c0_i32, %c0_i32_0 : i32, i32
  }
  func.func @transform_3(%arg0: i32) -> (i32, i32) {
    %c0_i32 = arith.constant 0 : i32
    %c0_i32_0 = arith.constant 0 : i32
    %c0_i32_1 = arith.constant 0 : i32
    return %c0_i32, %c0_i32_0 : i32, i32
  }
  func.func @transform_4(%arg0: i32) -> (i32, i32) {
    %c0_i32 = arith.constant 0 : i32
    %c0_i32_0 = arith.constant 0 : i32
    %c0_i32_1 = arith.constant 0 : i32
    return %c0_i32, %c0_i32_0 : i32, i32
  }
  func.func @transform_5(%arg0: i32) -> (i32, i32) {
    %c0_i32 = arith.constant 0 : i32
    %c0_i32_0 = arith.constant 0 : i32
    return %arg0, %c0_i32 : i32, i32
  }
}

</mosaic_0001>

<bundles_post_ra>
// kernel: mynet_forward.1
= control target key start
LH: loop header
LB: loop body
LE: loop exit
PB: predicated region body
PF: predicated region fallthrough
CT: control target
= control target key end

     0   :  { %s3338_s18 = smov 0   ;;  %s6633_s0 = inlined_call_operand.vmem [shape: f32[128,729], index: 0, kind: input, shape index: {}]   ;;  %s6634_s1 = inlined_call_operand.vmem [shape: f32[729,864], index: 1, kind: input, shape index: {}]   ;;  %s6635_s2 = inlined_call_operand.vmem [shape: f32[1,864], index: 2, kind: input, shape index: {}]   ;;  %s6636_s3 = inlined_call_operand.vmem [shape: f32[864,128], index: 3, kind: input, shape index: {}]   ;;  %s6637_s4 = inlined_call_operand.vmem [shape: f32[1,128], index: 4, kind: input, shape index: {}]   ;;  %s6638_s5 = inlined_call_operand.vmem [shape: f32[32,128], index: 5, kind: output, shape index: {}]  }
   0x1 LB: > { %s2917_s19 = sadd.s32 4294967295, %s3305_s18   ;;  %p2921_p0 = scmp.ge.s32.totalorder %s3305_s18, 1  ;;  %s3305_s18 = sphi %s3338_s18, %s15_s18  }
   0x2   : > { %p189_p1 = scmp.lt.s32.totalorder %s3305_s18, 3 }
   0x4   : > { %p190_p2 = pnand %p2921_p0, %p189_p1 }
   0x6   : > { %193 = sbr.rel (%p190_p2) target bundleno = 886 (0x376), region = 40 }
   0xb   : > { %v385_v0 = vld [vmem:[%s6634_s1 + $0x350] sm:$0xff]  ;;  %v384_v1 = vld [vmem:[%s6634_s1 + $0x348] sm:$0xff]  ;;  %v378_v2 = vld [vmem:[%s6634_s1 + $0x318] sm:$0xff]  ;;  %s3615_s12 = sshll.u32 %s2917_s19, 3  ;;  %vm985_vm0 = vcmask 1040384   ;;  %vm960_vm1 = vcmask 728064  }
   0xc   : > { %1007 = vmatprep.subr.mxu0 %v385_v0  ;;  %v609_v3 = vld [vmem:[%s6634_s1 + $0xa50] sm:$0xff]  ;;  %v608_v5 = vld [vmem:[%s6634_s1 + $0xa48] sm:$0xff]  ;;  %v371_v6 = vld [vmem:[%s6634_s1 + $0x2e0] sm:$0xff]  ;;  %p219_p3 = scmp.lt.s32.totalorder %s3615_s12, 15  ;;  %vm2552_vm2 = vcmask 785408   ;;  %s2924_s20 = sshll.u32 %s2917_s19, 1 }
   0xd   : > { %v377_v4 = vld [vmem:[%s6634_s1 + $0x310] sm:$0xff]  ;;  %1008 = vmatpush1.msra.mxu0 %v384_v1  ;;  %1120 = vmatprep.subr.mxu1 %v609_v3  ;;  %v602_v7 = vld [vmem:[%s6634_s1 + $0xa18] sm:$0xff]  ;;  %v595_v10 = vld [vmem:[%s6634_s1 + $0x9e0] sm:$0xff]  ;;  %p226_p4 = scmp.lt.s32.totalorder %s2924_s20, 3 }
   0xe   : > { %1009 = vmatprep.subr.mxu0 %v378_v2  ;;  %1121 = vmatpush1.msra.mxu1 %v608_v5  ;;  %v370_v8 = vld [vmem:[%s6634_s1 + $0x2d8] sm:$0xff]  ;;  %v601_v9 = vld [vmem:[%s6634_s1 + $0xa10] sm:$0xff]  ;;  %v364_v11 = vld [vmem:[%s6634_s1 + $0x2a8] sm:$0xff]  ;;  %s6759_s12 = smov (!%p219_p3, %s3615_s12), 15 }
   0xf   : > { %1010 = vmatpush1.msra.mxu0 %v377_v4  ;;  %1122 = vmatprep.subr.mxu1 %v602_v7  ;;  %v594_v12 = vld [vmem:[%s6634_s1 + $0x9d8] sm:$0xff]  ;;  %v363_v13 = vld [vmem:[%s6634_s1 + $0x2a0] sm:$0xff]  ;;  %v588_v14 = vld [vmem:[%s6634_s1 + $0x9a8] sm:$0xff]  ;;  %s3237_s13 = smul.u32 48, %s6759_s12  ;;  %s6761_s20 = smov (!%p226_p4, %s2924_s20), 3 }
  0x10   : > { %1011 = vmatprep.subr.mxu0 %v371_v6  ;;  %1123 = vmatpush1.msra.mxu1 %v601_v9  ;;  %v357_v15 = vld [vmem:[%s6634_s1 + $0x270] sm:$0xff]  ;;  %v587_v16 = vld [vmem:[%s6634_s1 + $0x9a0] sm:$0xff]  ;;  %v356_v17 = vld [vmem:[%s6634_s1 + $0x268] sm:$0xff]  ;;  %s2925_s19 = sshll.u32 %s6761_s20, 3 }
  0x11   : > { %1012 = vmatpush1.msra.mxu0 %v370_v8  ;;  %1124 = vmatprep.subr.mxu1 %v595_v10  ;;  %v581_v18 = vld [vmem:[%s6634_s1 + $0x970] sm:$0xff]  ;;  %v350_v19 = vld [vmem:[%s6634_s1 + $0x238] sm:$0xff]  ;;  %v580_v20 = vld [vmem:[%s6634_s1 + $0x968] sm:$0xff]  ;;  %s3717_s8 = scalar_lea.vmem %s6633_s0, %s3237_s13  ;;  %s229_s24 = scalar_lea.vmem %s6638_s5, %s2925_s19 }
  0x12   : > { %1013 = vmatprep.subr.mxu0 %v364_v11  ;;  %1125 = vmatpush1.msra.mxu1 %v594_v12  ;;  %v349_v21 = vld [vmem:[%s6634_s1 + $0x230] sm:$0xff]  ;;  %v574_v22 = vld [vmem:[%s6634_s1 + $0x938] sm:$0xff]  ;;  %v343_v23 = vld [vmem:[%s6634_s1 + $0x200] sm:$0xff] }
  0x13   : > { %1014 = vmatpush1.msra.mxu0 %v363_v13  ;;  %1126 = vmatprep.subr.mxu1 %v588_v14  ;;  %v573_v24 = vld [vmem:[%s6634_s1 + $0x930] sm:$0xff]  ;;  %v342_v25 = vld [vmem:[%s6634_s1 + $0x1f8] sm:$0xff]  ;;  %v567_v26 = vld [vmem:[%s6634_s1 + $0x900] sm:$0xff] }
  0x14   : > { %1015 = vmatprep.subr.mxu0 %v357_v15  ;;  %1127 = vmatpush1.msra.mxu1 %v587_v16  ;;  %v336_v27 = vld [vmem:[%s6634_s1 + $0x1c8] sm:$0xff]  ;;  %v566_v28 = vld [vmem:[%s6634_s1 + $0x8f8] sm:$0xff]  ;;  %v335_v29 = vld [vmem:[%s6634_s1 + $0x1c0] sm:$0xff] }
  0x15   : > { %1016 = vmatpush1.msra.mxu0 %v356_v17  ;;  %1128 = vmatprep.subr.mxu1 %v581_v18  ;;  %v560_v30 = vld [vmem:[%s6634_s1 + $0x8c8] sm:$0xff]  ;;  %v329_v31 = vld [vmem:[%s6634_s1 + $0x190] sm:$0xff]  ;;  %v559_v32 = vld [vmem:[%s6634_s1 + $0x8c0] sm:$0xff] }
  0x16   : > { %1017 = vmatprep.subr.mxu0 %v350_v19  ;;  %1129 = vmatpush1.msra.mxu1 %v580_v20  ;;  %v328_v33 = vld [vmem:[%s6634_s1 + $0x188] sm:$0xff]  ;;  %v553_v34 = vld [vmem:[%s6634_s1 + $0x890] sm:$0xff]  ;;  %v322_v35 = vld [vmem:[%s6634_s1 + $0x158] sm:$0xff] }
  0x17   : > { %1018 = vmatpush1.msra.mxu0 %v349_v21  ;;  %1130 = vmatprep.subr.mxu1 %v574_v22  ;;  %v552_v36 = vld [vmem:[%s6634_s1 + $0x888] sm:$0xff]  ;;  %v321_v37 = vld [vmem:[%s6634_s1 + $0x150] sm:$0xff]  ;;  %v546_v38 = vld [vmem:[%s6634_s1 + $0x858] sm:$0xff] }
  0x18   : > { %1019 = vmatprep.subr.mxu0 %v343_v23  ;;  %1131 = vmatpush1.msra.mxu1 %v573_v24  ;;  %v315_v39 = vld [vmem:[%s6634_s1 + $0x120] sm:$0xff]  ;;  %v545_v40 = vld [vmem:[%s6634_s1 + $0x850] sm:$0xff]  ;;  %v314_v41 = vld [vmem:[%s6634_s1 + $0x118] sm:$0xff] }
  0x19   : > { %1020 = vmatpush1.msra.mxu0 %v342_v25  ;;  %1132 = vmatprep.subr.mxu1 %v567_v26  ;;  %v539_v42 = vld [vmem:[%s6634_s1 + $0x820] sm:$0xff]  ;;  %v308_v43 = vld [vmem:[%s6634_s1 + $0xe8] sm:$0xff]  ;;  %v538_v44 = vld [vmem:[%s6634_s1 + $0x818] sm:$0xff] }
  0x1a   : > { %1021 = vmatprep.subr.mxu0 %v336_v27  ;;  %1133 = vmatpush1.msra.mxu1 %v566_v28  ;;  %v307_v45 = vld [vmem:[%s6634_s1 + $0xe0] sm:$0xff]  ;;  %v532_v46 = vld [vmem:[%s6634_s1 + $0x7e8] sm:$0xff]  ;;  %v301_v47 = vld [vmem:[%s6634_s1 + $0xb0] sm:$0xff] }
  0x1b   : > { %1022 = vmatpush1.msra.mxu0 %v335_v29  ;;  %1134 = vmatprep.subr.mxu1 %v560_v30  ;;  %v531_v48 = vld [vmem:[%s6634_s1 + $0x7e0] sm:$0xff]  ;;  %v300_v49 = vld [vmem:[%s6634_s1 + $0xa8] sm:$0xff]  ;;  %v525_v50 = vld [vmem:[%s6634_s1 + $0x7b0] sm:$0xff] }
  0x1c   : > { %1023 = vmatprep.subr.mxu0 %v329_v31  ;;  %1135 = vmatpush1.msra.mxu1 %v559_v32  ;;  %v294_v51 = vld [vmem:[%s6634_s1 + $0x78] sm:$0xff]  ;;  %v524_v52 = vld [vmem:[%s6634_s1 + $0x7a8] sm:$0xff]  ;;  %v293_v53 = vld [vmem:[%s6634_s1 + $0x70] sm:$0xff] }
  0x1d   : > { %1024 = vmatpush1.msra.mxu0 %v328_v33  ;;  %1136 = vmatprep.subr.mxu1 %v553_v34  ;;  %v518_v54 = vld [vmem:[%s6634_s1 + $0x778] sm:$0xff]  ;;  %v287_v55 = vld [vmem:[%s6634_s1 + $0x40] sm:$0xff]  ;;  %v517_v56 = vld [vmem:[%s6634_s1 + $0x770] sm:$0xff] }
  0x1e   : > { %1025 = vmatprep.subr.mxu0 %v322_v35  ;;  %1137 = vmatpush1.msra.mxu1 %v552_v36  ;;  %v286_v57 = vld [vmem:[%s6634_s1 + $0x38] sm:$0xff]  ;;  %v511_v58 = vld [vmem:[%s6634_s1 + $0x740] sm:$0xff]  ;;  %v280_v59 = vld [vmem:[%s6634_s1 + $0x8] sm:$0xff] }
  0x1f   : > { %1026 = vmatpush1.msra.mxu0 %v321_v37  ;;  %1138 = vmatprep.subr.mxu1 %v546_v38  ;;  %v510_v60 = vld [vmem:[%s6634_s1 + $0x738] sm:$0xff]  ;;  %v279_v61 = vld [vmem:[%s6634_s1] sm:$0xff]  ;;  %v504_v62 = vld [vmem:[%s6634_s1 + $0x708] sm:$0xff] }
  0x20   : > { %1027 = vmatprep.subr.mxu0 %v315_v39  ;;  %1139 = vmatpush1.msra.mxu1 %v545_v40  ;;  %v497_v63 = vld [vmem:[%s6634_s1 + $0x6d0] sm:$0xff]  ;;  %v503_v0 = vld [vmem:[%s6634_s1 + $0x700] sm:$0xff]  ;;  %v496_v1 = vld [vmem:[%s6634_s1 + $0x6c8] sm:$0xff] }
  0x21   : > { %1028 = vmatpush1.msra.mxu0 %v314_v41  ;;  %1140 = vmatprep.subr.mxu1 %v539_v42  ;;  %v721_v2 = vld [vmem:[%s6634_s1 + $0xdd0] sm:$0xff]  ;;  %v490_v3 = vld [vmem:[%s6634_s1 + $0x698] sm:$0xff]  ;;  %v720_v4 = vld [vmem:[%s6634_s1 + $0xdc8] sm:$0xff] }
  0x22   : > { %1029 = vmatprep.subr.mxu0 %v308_v43  ;;  %1141 = vmatpush1.msra.mxu1 %v538_v44  ;;  %v489_v5 = vld [vmem:[%s6634_s1 + $0x690] sm:$0xff]  ;;  %v714_v6 = vld [vmem:[%s6634_s1 + $0xd98] sm:$0xff]  ;;  %v483_v7 = vld [vmem:[%s6634_s1 + $0x660] sm:$0xff] }
  0x23   : > { %1030 = vmatpush1.msra.mxu0 %v307_v45  ;;  %1142 = vmatprep.subr.mxu1 %v532_v46  ;;  %v713_v8 = vld [vmem:[%s6634_s1 + $0xd90] sm:$0xff]  ;;  %v482_v9 = vld [vmem:[%s6634_s1 + $0x658] sm:$0xff]  ;;  %v707_v10 = vld [vmem:[%s6634_s1 + $0xd60] sm:$0xff] }
  0x24   : > { %1031 = vmatprep.subr.mxu0 %v301_v47  ;;  %1143 = vmatpush1.msra.mxu1 %v531_v48  ;;  %v476_v11 = vld [vmem:[%s6634_s1 + $0x628] sm:$0xff]  ;;  %v706_v12 = vld [vmem:[%s6634_s1 + $0xd58] sm:$0xff]  ;;  %v475_v13 = vld [vmem:[%s6634_s1 + $0x620] sm:$0xff] }
  0x25   : > { %1032 = vmatpush1.msra.mxu0 %v300_v49  ;;  %1144 = vmatprep.subr.mxu1 %v525_v50  ;;  %v700_v14 = vld [vmem:[%s6634_s1 + $0xd28] sm:$0xff]  ;;  %v469_v15 = vld [vmem:[%s6634_s1 + $0x5f0] sm:$0xff]  ;;  %v699_v16 = vld [vmem:[%s6634_s1 + $0xd20] sm:$0xff] }
  0x26   : > { %1033 = vmatprep.subr.mxu0 %v294_v51  ;;  %1145 = vmatpush1.msra.mxu1 %v524_v52  ;;  %v468_v17 = vld [vmem:[%s6634_s1 + $0x5e8] sm:$0xff]  ;;  %v693_v18 = vld [vmem:[%s6634_s1 + $0xcf0] sm:$0xff]  ;;  %v462_v19 = vld [vmem:[%s6634_s1 + $0x5b8] sm:$0xff] }
  0x27   : > { %1034 = vmatpush1.msra.mxu0 %v293_v53  ;;  %1146 = vmatprep.subr.mxu1 %v518_v54  ;;  %v692_v20 = vld [vmem:[%s6634_s1 + $0xce8] sm:$0xff]  ;;  %v461_v21 = vld [vmem:[%s6634_s1 + $0x5b0] sm:$0xff]  ;;  %v686_v22 = vld [vmem:[%s6634_s1 + $0xcb8] sm:$0xff] }
  0x28   : > { %1035 = vmatprep.subr.mxu0 %v287_v55  ;;  %1147 = vmatpush1.msra.mxu1 %v517_v56  ;;  %v455_v23 = vld [vmem:[%s6634_s1 + $0x580] sm:$0xff]  ;;  %v685_v24 = vld [vmem:[%s6634_s1 + $0xcb0] sm:$0xff]  ;;  %v454_v25 = vld [vmem:[%s6634_s1 + $0x578] sm:$0xff] }
  0x29   : > { %1036 = vmatpush1.msra.mxu0 %v286_v57  ;;  %1148 = vmatprep.subr.mxu1 %v511_v58  ;;  %v679_v26 = vld [vmem:[%s6634_s1 + $0xc80] sm:$0xff]  ;;  %v448_v27 = vld [vmem:[%s6634_s1 + $0x548] sm:$0xff]  ;;  %v678_v28 = vld [vmem:[%s6634_s1 + $0xc78] sm:$0xff] }
  0x2a   : > { %1037 = vmatprep.subr.mxu0 %v280_v59  ;;  %1149 = vmatpush1.msra.mxu1 %v510_v60  ;;  %v447_v29 = vld [vmem:[%s6634_s1 + $0x540] sm:$0xff]  ;;  %v672_v30 = vld [vmem:[%s6634_s1 + $0xc48] sm:$0xff]  ;;  %v441_v31 = vld [vmem:[%s6634_s1 + $0x510] sm:$0xff] }
  0x2b   : > { %1038 = vmatpush1.msra.mxu0 %v279_v61  ;;  %1150 = vmatprep.subr.mxu1 %v504_v62  ;;  %v671_v32 = vld [vmem:[%s6634_s1 + $0xc40] sm:$0xff]  ;;  %v440_v33 = vld [vmem:[%s6634_s1 + $0x508] sm:$0xff]  ;;  %v665_v34 = vld [vmem:[%s6634_s1 + $0xc10] sm:$0xff] }
  0x2c   : > { %1039 = vmatprep.subr.mxu0 %v497_v63  ;;  %1151 = vmatpush1.msra.mxu1 %v503_v0  ;;  %v434_v35 = vld [vmem:[%s6634_s1 + $0x4d8] sm:$0xff]  ;;  %v664_v36 = vld [vmem:[%s6634_s1 + $0xc08] sm:$0xff]  ;;  %v433_v37 = vld [vmem:[%s6634_s1 + $0x4d0] sm:$0xff] }
  0x2d   : > { %1040 = vmatpush2.msra.mxu0 %v496_v1  ;;  %1152 = vmatprep.subr.mxu1 %v721_v2  ;;  %v658_v38 = vld [vmem:[%s6634_s1 + $0xbd8] sm:$0xff]  ;;  %v427_v39 = vld [vmem:[%s6634_s1 + $0x4a0] sm:$0xff]  ;;  %v657_v40 = vld [vmem:[%s6634_s1 + $0xbd0] sm:$0xff] }
  0x2e   : > { %1041 = vmatprep.subr.mxu0 %v490_v3  ;;  %1153 = vmatpush2.msra.mxu1 %v720_v4  ;;  %v426_v41 = vld [vmem:[%s6634_s1 + $0x498] sm:$0xff]  ;;  %v651_v42 = vld [vmem:[%s6634_s1 + $0xba0] sm:$0xff]  ;;  %v420_v43 = vld [vmem:[%s6634_s1 + $0x468] sm:$0xff] }
  0x2f   : > { %1042 = vmatpush2.msra.mxu0 %v489_v5  ;;  %1154 = vmatprep.subr.mxu1 %v714_v6  ;;  %v650_v44 = vld [vmem:[%s6634_s1 + $0xb98] sm:$0xff]  ;;  %v419_v45 = vld [vmem:[%s6634_s1 + $0x460] sm:$0xff]  ;;  %v644_v46 = vld [vmem:[%s6634_s1 + $0xb68] sm:$0xff] }
  0x30   : > { %1043 = vmatprep.subr.mxu0 %v483_v7  ;;  %1155 = vmatpush2.msra.mxu1 %v713_v8  ;;  %v413_v47 = vld [vmem:[%s6634_s1 + $0x430] sm:$0xff]  ;;  %v643_v48 = vld [vmem:[%s6634_s1 + $0xb60] sm:$0xff]  ;;  %v412_v49 = vld [vmem:[%s6634_s1 + $0x428] sm:$0xff] }
  0x31   : > { %1044 = vmatpush2.msra.mxu0 %v482_v9  ;;  %1156 = vmatprep.subr.mxu1 %v707_v10  ;;  %v637_v50 = vld [vmem:[%s6634_s1 + $0xb30] sm:$0xff]  ;;  %v406_v51 = vld [vmem:[%s6634_s1 + $0x3f8] sm:$0xff]  ;;  %v636_v52 = vld [vmem:[%s6634_s1 + $0xb28] sm:$0xff] }
  0x32   : > { %1045 = vmatprep.subr.mxu0 %v476_v11  ;;  %1157 = vmatpush2.msra.mxu1 %v706_v12  ;;  %v405_v53 = vld [vmem:[%s6634_s1 + $0x3f0] sm:$0xff]  ;;  %v630_v54 = vld [vmem:[%s6634_s1 + $0xaf8] sm:$0xff]  ;;  %v399_v55 = vld [vmem:[%s6634_s1 + $0x3c0] sm:$0xff] }
  0x33   : > { %1046 = vmatpush2.msra.mxu0 %v475_v13  ;;  %1158 = vmatprep.subr.mxu1 %v700_v14  ;;  %v629_v56 = vld [vmem:[%s6634_s1 + $0xaf0] sm:$0xff]  ;;  %v398_v57 = vld [vmem:[%s6634_s1 + $0x3b8] sm:$0xff]  ;;  %v623_v58 = vld [vmem:[%s6634_s1 + $0xac0] sm:$0xff] }
  0x34   : > { %1047 = vmatprep.subr.mxu0 %v469_v15  ;;  %1159 = vmatpush2.msra.mxu1 %v699_v16  ;;  %v392_v59 = vld [vmem:[%s6634_s1 + $0x388] sm:$0xff]  ;;  %v391_v61 = vld [vmem:[%s6634_s1 + $0x380] sm:$0xff]  ;;  %v622_v62 = vld [vmem:[%s6634_s1 + $0xab8] sm:$0xff] }
  0x35   : > { %1048 = vmatpush2.msra.mxu0 %v468_v17  ;;  %1160 = vmatprep.subr.mxu1 %v693_v18  ;;  %v3735_v60 = vld [vmem:[%s3717_s8 + $0x8] sm:$0xff]  ;;  %v3744_v63 = vld [vmem:[%s3717_s8] sm:$0xff]  ;;  %v833_v1 = vld [vmem:[%s6634_s1 + $0x1150] sm:$0xff] }
  0x36   : > { %1049 = vmatprep.subr.mxu0 %v462_v19  ;;  %1161 = vmatpush2.msra.mxu1 %v692_v20  ;;  %v616_v0 = vld [vmem:[%s6634_s1 + $0xa88] sm:$0xff]  ;;  %v615_v2 = vld [vmem:[%s6634_s1 + $0xa80] sm:$0xff]  ;;  %v234_v3 = vld [vmem:[%s3717_s8 + $0x18] sm:$0xff] }
  0x37   : > { %1050 = vmatpush2.msra.mxu0 %v461_v21  ;;  %1162 = vmatprep.subr.mxu1 %v686_v22  ;;  %v832_v4 = vld [vmem:[%s6634_s1 + $0x1148] sm:$0xff]  ;;  %v233_v5 = vld [vmem:[%s3717_s8 + $0x10] sm:$0xff]  ;;  %v826_v6 = vld [vmem:[%s6634_s1 + $0x1118] sm:$0xff] }
  0x38   : > { %1051 = vmatprep.subr.mxu0 %v455_v23  ;;  %1163 = vmatpush2.msra.mxu1 %v685_v24  ;;  %v387_v7 = vld [vmem:[%s6634_s1 + $0x360] sm:$0xff]  ;;  %v825_v8 = vld [vmem:[%s6634_s1 + $0x1110] sm:$0xff]  ;;  %v386_v9 = vld [vmem:[%s6634_s1 + $0x358] sm:$0xff] }
  0x39   : > { %1052 = vmatpush2.msra.mxu0 %v454_v25  ;;  %1164 = vmatprep.subr.mxu1 %v679_v26  ;;  %v819_v10 = vld [vmem:[%s6634_s1 + $0x10e0] sm:$0xff]  ;;  %v380_v11 = vld [vmem:[%s6634_s1 + $0x328] sm:$0xff]  ;;  %v818_v12 = vld [vmem:[%s6634_s1 + $0x10d8] sm:$0xff] }
  0x3a   : > { %1053 = vmatprep.subr.mxu0 %v448_v27  ;;  %1165 = vmatpush2.msra.mxu1 %v678_v28  ;;  %v379_v13 = vld [vmem:[%s6634_s1 + $0x320] sm:$0xff]  ;;  %v812_v14 = vld [vmem:[%s6634_s1 + $0x10a8] sm:$0xff]  ;;  %v373_v15 = vld [vmem:[%s6634_s1 + $0x2f0] sm:$0xff] }
  0x3b   : > { %1054 = vmatpush2.msra.mxu0 %v447_v29  ;;  %1166 = vmatprep.subr.mxu1 %v672_v30  ;;  %v811_v16 = vld [vmem:[%s6634_s1 + $0x10a0] sm:$0xff]  ;;  %v372_v17 = vld [vmem:[%s6634_s1 + $0x2e8] sm:$0xff]  ;;  %v805_v18 = vld [vmem:[%s6634_s1 + $0x1070] sm:$0xff] }
  0x3c   : > { %1055 = vmatprep.subr.mxu0 %v441_v31  ;;  %1167 = vmatpush2.msra.mxu1 %v671_v32  ;;  %v366_v19 = vld [vmem:[%s6634_s1 + $0x2b8] sm:$0xff]  ;;  %v804_v20 = vld [vmem:[%s6634_s1 + $0x1068] sm:$0xff]  ;;  %v365_v21 = vld [vmem:[%s6634_s1 + $0x2b0] sm:$0xff] }
  0x3d   : > { %1056 = vmatpush2.msra.mxu0 %v440_v33  ;;  %1168 = vmatprep.subr.mxu1 %v665_v34  ;;  %v798_v22 = vld [vmem:[%s6634_s1 + $0x1038] sm:$0xff]  ;;  %v359_v23 = vld [vmem:[%s6634_s1 + $0x280] sm:$0xff]  ;;  %v797_v24 = vld [vmem:[%s6634_s1 + $0x1030] sm:$0xff] }
  0x3e   : > { %1057 = vmatprep.subr.mxu0 %v434_v35  ;;  %1169 = vmatpush2.msra.mxu1 %v664_v36  ;;  %v358_v25 = vld [vmem:[%s6634_s1 + $0x278] sm:$0xff]  ;;  %v791_v26 = vld [vmem:[%s6634_s1 + $0x1000] sm:$0xff]  ;;  %v352_v27 = vld [vmem:[%s6634_s1 + $0x248] sm:$0xff] }
  0x3f   : > { %1058 = vmatpush2.msra.mxu0 %v433_v37  ;;  %1170 = vmatprep.subr.mxu1 %v658_v38  ;;  %v790_v28 = vld [vmem:[%s6634_s1 + $0xff8] sm:$0xff]  ;;  %v351_v29 = vld [vmem:[%s6634_s1 + $0x240] sm:$0xff]  ;;  %v784_v30 = vld [vmem:[%s6634_s1 + $0xfc8] sm:$0xff] }
  0x40   : > { %1059 = vmatprep.subr.mxu0 %v427_v39  ;;  %1171 = vmatpush2.msra.mxu1 %v657_v40  ;;  %v345_v31 = vld [vmem:[%s6634_s1 + $0x210] sm:$0xff]  ;;  %v783_v32 = vld [vmem:[%s6634_s1 + $0xfc0] sm:$0xff]  ;;  %v344_v33 = vld [vmem:[%s6634_s1 + $0x208] sm:$0xff] }
  0x41   : > { %1060 = vmatpush2.msra.mxu0 %v426_v41  ;;  %1172 = vmatprep.subr.mxu1 %v651_v42  ;;  %v777_v34 = vld [vmem:[%s6634_s1 + $0xf90] sm:$0xff]  ;;  %v338_v35 = vld [vmem:[%s6634_s1 + $0x1d8] sm:$0xff]  ;;  %v776_v36 = vld [vmem:[%s6634_s1 + $0xf88] sm:$0xff] }
  0x42   : > { %1061 = vmatprep.subr.mxu0 %v420_v43  ;;  %1173 = vmatpush2.msra.mxu1 %v650_v44  ;;  %v337_v37 = vld [vmem:[%s6634_s1 + $0x1d0] sm:$0xff]  ;;  %v770_v38 = vld [vmem:[%s6634_s1 + $0xf58] sm:$0xff]  ;;  %v331_v39 = vld [vmem:[%s6634_s1 + $0x1a0] sm:$0xff] }
  0x43   : > { %1062 = vmatpush2.msra.mxu0 %v419_v45  ;;  %1174 = vmatprep.subr.mxu1 %v644_v46  ;;  %v769_v40 = vld [vmem:[%s6634_s1 + $0xf50] sm:$0xff]  ;;  %v330_v41 = vld [vmem:[%s6634_s1 + $0x198] sm:$0xff]  ;;  %v763_v42 = vld [vmem:[%s6634_s1 + $0xf20] sm:$0xff] }
  0x44   : > { %1063 = vmatprep.subr.mxu0 %v413_v47  ;;  %1175 = vmatpush2.msra.mxu1 %v643_v48  ;;  %v324_v43 = vld [vmem:[%s6634_s1 + $0x168] sm:$0xff]  ;;  %v762_v44 = vld [vmem:[%s6634_s1 + $0xf18] sm:$0xff]  ;;  %v323_v45 = vld [vmem:[%s6634_s1 + $0x160] sm:$0xff] }
  0x45   : > { %1064 = vmatpush2.msra.mxu0 %v412_v49  ;;  %1176 = vmatprep.subr.mxu1 %v637_v50  ;;  %v756_v46 = vld [vmem:[%s6634_s1 + $0xee8] sm:$0xff]  ;;  %v317_v47 = vld [vmem:[%s6634_s1 + $0x130] sm:$0xff]  ;;  %v755_v48 = vld [vmem:[%s6634_s1 + $0xee0] sm:$0xff] }
  0x46   : > { %1065 = vmatprep.subr.mxu0 %v406_v51  ;;  %1177 = vmatpush2.msra.mxu1 %v636_v52  ;;  %v316_v49 = vld [vmem:[%s6634_s1 + $0x128] sm:$0xff]  ;;  %v749_v50 = vld [vmem:[%s6634_s1 + $0xeb0] sm:$0xff]  ;;  %v310_v51 = vld [vmem:[%s6634_s1 + $0xf8] sm:$0xff] }
  0x47   : > { %1066 = vmatpush2.msra.mxu0 %v405_v53  ;;  %1178 = vmatprep.subr.mxu1 %v630_v54  ;;  %v748_v52 = vld [vmem:[%s6634_s1 + $0xea8] sm:$0xff]  ;;  %v309_v53 = vld [vmem:[%s6634_s1 + $0xf0] sm:$0xff]  ;;  %v3907_v54 = vld [vmem:[%s3717_s8 + $0x38] sm:$0xff] }
  0x48   : > { %1067 = vmatprep.subr.mxu0 %v399_v55  ;;  %1179 = vmatpush2.msra.mxu1 %v629_v56  ;;  %v742_v55 = vld [vmem:[%s6634_s1 + $0xe78] sm:$0xff]  ;;  %v303_v56 = vld [vmem:[%s6634_s1 + $0xc0] sm:$0xff] }
  0x49   : > { %1068 = vmatpush2.msra.mxu0 %v398_v57  ;;  %1180 = vmatprep.subr.mxu1 %v623_v58  ;;  %v3916_v57 = vld [vmem:[%s3717_s8 + $0x30] sm:$0xff]  ;;  %v302_v58 = vld [vmem:[%s6634_s1 + $0xb8] sm:$0xff] }
  0x4a   : > { %1069 = vmatprep.subr.mxu0 %v392_v59  ;;  %1071 = vmatprep.mubr.f32.mxu0 %v3735_v60  ;;  %v741_v59 = vld [vmem:[%s6634_s1 + $0xe70] sm:$0xff] }
  0x4b   : > { %1070 = vmatpush2.msra.mxu0 %v391_v61  ;;  %1181 = vmatpush2.msra.mxu1 %v622_v62  ;;  %v3926_v61 = vld [vmem:[%s3717_s8 + $0x48] sm:$0xff]  ;;  %v735_v62 = vld [vmem:[%s6634_s1 + $0xe40] sm:$0xff] }
  0x4c   : > { %1072 = vmatmul.mubr.f32.vlgmr.msra.gmra.mxu0 %v3744_v63  ;;  %1182 = vmatprep.subr.mxu1 %v616_v0  ;;  %v296_v0 = vld [vmem:[%s6634_s1 + $0x88] sm:$0xff] }
  0x4d   : > { %1233 = vmatprep.subr.mxu0 %v833_v1  ;;  %1183 = vmatpush2.msra.mxu1 %v615_v2  ;;  %v3936_v1 = vld [vmem:[%s3717_s8 + $0x40] sm:$0xff]  ;;  %v734_v2 = vld [vmem:[%s6634_s1 + $0xe38] sm:$0xff] }
  0x4e   : > { %1184 = vmatprep.mubr.f32.mxu1 %v234_v3  ;;  %1234 = vmatpush1.msra.mxu0 %v832_v4  ;;  %v295_v3 = vld [vmem:[%s6634_s1 + $0x80] sm:$0xff]  ;;  %v3946_v4 = vld [vmem:[%s3717_s8 + $0x68] sm:$0xff] }
  0x4f   : > { %1185 = vmatmul.mubr.f32.vlgmr.msra.gmra.mxu1 %v233_v5  ;;  %1235 = vmatprep.subr.mxu0 %v826_v6  ;;  %v728_v5 = vld [vmem:[%s6634_s1 + $0xe08] sm:$0xff]  ;;  %v289_v6 = vld [vmem:[%s6634_s1 + $0x50] sm:$0xff] }
  0x50   : > { %1346 = vmatprep.subr.mxu1 %v387_v7  ;;  %1236 = vmatpush1.msra.mxu0 %v825_v8  ;;  %v3956_v7 = vld [vmem:[%s3717_s8 + $0x60] sm:$0xff]  ;;  %v288_v8 = vld [vmem:[%s6634_s1 + $0x48] sm:$0xff] }
  0x51   : > { %1347 = vmatpush1.msra.mxu1 %v386_v9  ;;  %1237 = vmatprep.subr.mxu0 %v819_v10  ;;  %v727_v9 = vld [vmem:[%s6634_s1 + $0xe00] sm:$0xff]  ;;  %v3966_v10 = vld [vmem:[%s3717_s8 + $0x78] sm:$0xff] }
  0x52   : > { %1348 = vmatprep.subr.mxu1 %v380_v11  ;;  %1238 = vmatpush1.msra.mxu0 %v818_v12  ;;  %v917_v11 = vld [vmem:[%s6634_s1 + $0x13f0] sm:$0x1]  ;;  %v282_v12 = vld [vmem:[%s6634_s1 + $0x18] sm:$0xff] }
  0x53   : > { %1349 = vmatpush1.msra.mxu1 %v379_v13  ;;  %1239 = vmatprep.subr.mxu0 %v812_v14  ;;  %v3976_v13 = vld [vmem:[%s3717_s8 + $0x70] sm:$0xff]  ;;  %v916_v14 = vld [vmem:[%s6634_s1 + $0x13e8] sm:$0x1] }
  0x54   : > { %1350 = vmatprep.subr.mxu1 %v373_v15  ;;  %1240 = vmatpush1.msra.mxu0 %v811_v16  ;;  %v281_v15 = vld [vmem:[%s6634_s1 + $0x10] sm:$0xff]  ;;  %v3986_v16 = vld [vmem:[%s3717_s8 + $0x98] sm:$0xff] }
  0x55   : > { %1351 = vmatpush1.msra.mxu1 %v372_v17  ;;  %1241 = vmatprep.subr.mxu0 %v805_v18  ;;  %v910_v17 = vld [vmem:[%s6634_s1 + $0x13b8] sm:$0xff]  ;;  %v499_v18 = vld [vmem:[%s6634_s1 + $0x6e0] sm:$0xff] }
  0x56   : > { %1352 = vmatprep.subr.mxu1 %v366_v19  ;;  %1242 = vmatpush1.msra.mxu0 %v804_v20  ;;  %v3998_v19 = vld [vmem:[%s3717_s8 + $0x90] sm:$0xff]  ;;  %v498_v20 = vld [vmem:[%s6634_s1 + $0x6d8] sm:$0xff] }
  0x57   : > { %1353 = vmatpush1.msra.mxu1 %v365_v21  ;;  %1243 = vmatprep.subr.mxu0 %v798_v22  ;;  %v909_v21 = vld [vmem:[%s6634_s1 + $0x13b0] sm:$0xff]  ;;  %v4008_v22 = vld [vmem:[%s3717_s8 + $0xa8] sm:$0xff] }
  0x58   : > { %1354 = vmatprep.subr.mxu1 %v359_v23  ;;  %1244 = vmatpush1.msra.mxu0 %v797_v24  ;;  %v903_v23 = vld [vmem:[%s6634_s1 + $0x1380] sm:$0xff]  ;;  %v492_v24 = vld [vmem:[%s6634_s1 + $0x6a8] sm:$0xff] }
  0x59   : > { %1355 = vmatpush1.msra.mxu1 %v358_v25  ;;  %1245 = vmatprep.subr.mxu0 %v791_v26  ;;  %v4018_v25 = vld [vmem:[%s3717_s8 + $0xa0] sm:$0xff]  ;;  %v902_v26 = vld [vmem:[%s6634_s1 + $0x1378] sm:$0xff] }
  0x5a   : > { %1356 = vmatprep.subr.mxu1 %v352_v27  ;;  %1246 = vmatpush1.msra.mxu0 %v790_v28  ;;  %v491_v27 = vld [vmem:[%s6634_s1 + $0x6a0] sm:$0xff]  ;;  %v4028_v28 = vld [vmem:[%s3717_s8 + $0xc8] sm:$0xff] }
  0x5b   : > { %1357 = vmatpush1.msra.mxu1 %v351_v29  ;;  %1247 = vmatprep.subr.mxu0 %v784_v30  ;;  %v896_v29 = vld [vmem:[%s6634_s1 + $0x1348] sm:$0xff]  ;;  %v485_v30 = vld [vmem:[%s6634_s1 + $0x670] sm:$0xff] }
  0x5c   : > { %1358 = vmatprep.subr.mxu1 %v345_v31  ;;  %1248 = vmatpush1.msra.mxu0 %v783_v32  ;;  %v4038_v31 = vld [vmem:[%s3717_s8 + $0xc0] sm:$0xff]  ;;  %v484_v32 = vld [vmem:[%s6634_s1 + $0x668] sm:$0xff] }
  0x5d   : > { %1359 = vmatpush1.msra.mxu1 %v344_v33  ;;  %1249 = vmatprep.subr.mxu0 %v777_v34  ;;  %v895_v33 = vld [vmem:[%s6634_s1 + $0x1340] sm:$0xff]  ;;  %v4048_v34 = vld [vmem:[%s3717_s8 + $0xd8] sm:$0xff] }
  0x5e   : > { %1360 = vmatprep.subr.mxu1 %v338_v35  ;;  %1250 = vmatpush1.msra.mxu0 %v776_v36  ;;  %v889_v35 = vld [vmem:[%s6634_s1 + $0x1310] sm:$0xff]  ;;  %v478_v36 = vld [vmem:[%s6634_s1 + $0x638] sm:$0xff] }
  0x5f   : > { %1361 = vmatpush1.msra.mxu1 %v337_v37  ;;  %1251 = vmatprep.subr.mxu0 %v770_v38  ;;  %v4058_v37 = vld [vmem:[%s3717_s8 + $0xd0] sm:$0xff]  ;;  %v888_v38 = vld [vmem:[%s6634_s1 + $0x1308] sm:$0xff] }
  0x60   : > { %1362 = vmatprep.subr.mxu1 %v331_v39  ;;  %1252 = vmatpush1.msra.mxu0 %v769_v40  ;;  %v477_v39 = vld [vmem:[%s6634_s1 + $0x630] sm:$0xff]  ;;  %v4068_v40 = vld [vmem:[%s3717_s8 + $0xf8] sm:$0xff] }
  0x61   : > { %1363 = vmatpush1.msra.mxu1 %v330_v41  ;;  %1253 = vmatprep.subr.mxu0 %v763_v42  ;;  %v882_v41 = vld [vmem:[%s6634_s1 + $0x12d8] sm:$0xff]  ;;  %v471_v42 = vld [vmem:[%s6634_s1 + $0x600] sm:$0xff] }
  0x62   : > { %1364 = vmatprep.subr.mxu1 %v324_v43  ;;  %1254 = vmatpush1.msra.mxu0 %v762_v44  ;;  %v4078_v43 = vld [vmem:[%s3717_s8 + $0xf0] sm:$0xff]  ;;  %v470_v44 = vld [vmem:[%s6634_s1 + $0x5f8] sm:$0xff] }
  0x63   : > { %1365 = vmatpush1.msra.mxu1 %v323_v45  ;;  %1255 = vmatprep.subr.mxu0 %v756_v46  ;;  %v881_v45 = vld [vmem:[%s6634_s1 + $0x12d0] sm:$0xff]  ;;  %v4088_v46 = vld [vmem:[%s3717_s8 + $0x108] sm:$0xff] }
  0x64   : > { %1366 = vmatprep.subr.mxu1 %v317_v47  ;;  %1256 = vmatpush1.msra.mxu0 %v755_v48  ;;  %v875_v47 = vld [vmem:[%s6634_s1 + $0x12a0] sm:$0xff]  ;;  %v464_v48 = vld [vmem:[%s6634_s1 + $0x5c8] sm:$0xff] }
  0x65   : > { %1367 = vmatpush1.msra.mxu1 %v316_v49  ;;  %1257 = vmatprep.subr.mxu0 %v749_v50  ;;  %v4098_v49 = vld [vmem:[%s3717_s8 + $0x100] sm:$0xff]  ;;  %v874_v50 = vld [vmem:[%s6634_s1 + $0x1298] sm:$0xff] }
  0x66   : > { %1368 = vmatprep.subr.mxu1 %v310_v51  ;;  %1258 = vmatpush1.msra.mxu0 %v748_v52  ;;  %v463_v51 = vld [vmem:[%s6634_s1 + $0x5c0] sm:$0xff]  ;;  %v4108_v52 = vld [vmem:[%s3717_s8 + $0x128] sm:$0xff] }
  0x67   : > { %1369 = vmatpush1.msra.mxu1 %v309_v53  ;;  %1077 = vmatprep.mubr.f32.mxu0 %v3907_v54  ;;  %v868_v53 = vld [vmem:[%s6634_s1 + $0x1268] sm:$0xff] }
  0x68   : > { %1259 = vmatprep.subr.mxu0 %v742_v55  ;;  %1370 = vmatprep.subr.mxu1 %v303_v56  ;;  %v457_v55 = vld [vmem:[%s6634_s1 + $0x590] sm:$0xff]  ;;  %v4118_v56 = vld [vmem:[%s3717_s8 + $0x120] sm:$0xff] }
  0x69   : > { %1078 = vmatmul.mubr.f32.gmra.mxu0 %v3916_v57  ;;  %1371 = vmatpush1.msra.mxu1 %v302_v58  ;;  %v456_v58 = vld [vmem:[%s6634_s1 + $0x588] sm:$0xff] }
  0x6a   : > { %1260 = vmatpush1.msra.mxu0 %v741_v59  ;;  %1190 = vmatprep.mubr.f32.mxu1 %v3926_v61  ;;  %v867_v59 = vld [vmem:[%s6634_s1 + $0x1260] sm:$0xff] }
  0x6b   : > { %1261 = vmatprep.subr.mxu0 %v735_v62  ;;  %1372 = vmatprep.subr.mxu1 %v296_v0  ;;  %v4128_v62 = vld [vmem:[%s3717_s8 + $0x138] sm:$0xff]  ;;  %v861_v0 = vld [vmem:[%s6634_s1 + $0x1230] sm:$0xff] }
  0x6c   : > { %1191 = vmatmul.mubr.f32.gmra.mxu1 %v3936_v1  ;;  %1262 = vmatpush1.msra.mxu0 %v734_v2  ;;  %v450_v2 = vld [vmem:[%s6634_s1 + $0x558] sm:$0xff] }
  0x6d   : > { %1373 = vmatpush1.msra.mxu1 %v295_v3  ;;  %1083 = vmatprep.mubr.f32.mxu0 %v3946_v4  ;;  %v4138_v3 = vld [vmem:[%s3717_s8 + $0x130] sm:$0xff] }
  0x6e   : > { %1263 = vmatprep.subr.mxu0 %v728_v5  ;;  %1374 = vmatprep.subr.mxu1 %v289_v6  ;;  %v860_v5 = vld [vmem:[%s6634_s1 + $0x1228] sm:$0xff]  ;;  %v449_v6 = vld [vmem:[%s6634_s1 + $0x550] sm:$0xff] }
  0x6f   : > { %1084 = vmatmul.mubr.f32.gmra.mxu0 %v3956_v7  ;;  %1375 = vmatpush1.msra.mxu1 %v288_v8  ;;  %v4148_v8 = vld [vmem:[%s3717_s8 + $0x158] sm:$0xff] }
  0x70   : > { %1264 = vmatpush1.msra.mxu0 %v727_v9  ;;  %1196 = vmatprep.mubr.f32.mxu1 %v3966_v10  ;;  %v854_v9 = vld [vmem:[%s6634_s1 + $0x11f8] sm:$0xff] }
  0x71   : > { %2926 = vmatprep.subr.msk.mxu0 %vm985_vm0, %v917_v11  ;;  %1376 = vmatprep.subr.mxu1 %v282_v12  ;;  %v443_v11 = vld [vmem:[%s6634_s1 + $0x520] sm:$0xff]  ;;  %v4158_v12 = vld [vmem:[%s3717_s8 + $0x150] sm:$0xff] }
  0x72   : > { %1197 = vmatmul.mubr.f32.gmra.mxu1 %v3976_v13  ;;  %2927 = vmatpush2.msk.msra.mxu0 %vm985_vm0, %v916_v14  ;;  %v442_v14 = vld [vmem:[%s6634_s1 + $0x518] sm:$0xff] }
  0x73   : > { %1377 = vmatpush1.msra.mxu1 %v281_v15  ;;  %1089 = vmatprep.mubr.f32.mxu0 %v3986_v16  ;;  %v853_v15 = vld [vmem:[%s6634_s1 + $0x11f0] sm:$0xff] }
  0x74   : > { %1275 = vmatprep.subr.mxu0 %v910_v17  ;;  %1378 = vmatprep.subr.mxu1 %v499_v18  ;;  %v4168_v17 = vld [vmem:[%s3717_s8 + $0x168] sm:$0xff]  ;;  %v847_v18 = vld [vmem:[%s6634_s1 + $0x11c0] sm:$0xff] }
  0x75   : > { %1090 = vmatmul.mubr.f32.gmra.mxu0 %v3998_v19  ;;  %1379 = vmatpush2.msra.mxu1 %v498_v20  ;;  %v436_v20 = vld [vmem:[%s6634_s1 + $0x4e8] sm:$0xff] }
  0x76   : > { %1276 = vmatpush2.msra.mxu0 %v909_v21  ;;  %1202 = vmatprep.mubr.f32.mxu1 %v4008_v22  ;;  %v4178_v21 = vld [vmem:[%s3717_s8 + $0x160] sm:$0xff] }
  0x77   : > { %1277 = vmatprep.subr.mxu0 %v903_v23  ;;  %1380 = vmatprep.subr.mxu1 %v492_v24  ;;  %v846_v23 = vld [vmem:[%s6634_s1 + $0x11b8] sm:$0xff]  ;;  %v435_v24 = vld [vmem:[%s6634_s1 + $0x4e0] sm:$0xff] }
  0x78   : > { %1203 = vmatmul.mubr.f32.gmra.mxu1 %v4018_v25  ;;  %1278 = vmatpush2.msra.mxu0 %v902_v26  ;;  %v840_v26 = vld [vmem:[%s6634_s1 + $0x1188] sm:$0xff] }
  0x79   : > { %1381 = vmatpush2.msra.mxu1 %v491_v27  ;;  %1095 = vmatprep.mubr.f32.mxu0 %v4028_v28  ;;  %v429_v27 = vld [vmem:[%s6634_s1 + $0x4b0] sm:$0xff] }
  0x7a   : > { %1279 = vmatprep.subr.mxu0 %v896_v29  ;;  %1382 = vmatprep.subr.mxu1 %v485_v30  ;;  %v839_v29 = vld [vmem:[%s6634_s1 + $0x1180] sm:$0xff]  ;;  %v4198_v30 = vld [vmem:[%s3717_s8 + $0x28] sm:$0xff] }
  0x7b   : > { %1096 = vmatmul.mubr.f32.gmra.mxu0 %v4038_v31  ;;  %1383 = vmatpush2.msra.mxu1 %v484_v32  ;;  %v428_v32 = vld [vmem:[%s6634_s1 + $0x4a8] sm:$0xff] }
  0x7c   : > { %1280 = vmatpush2.msra.mxu0 %v895_v33  ;;  %1208 = vmatprep.mubr.f32.mxu1 %v4048_v34  ;;  %v4204_v33 = vld [vmem:[%s3717_s8 + $0x20] sm:$0xff] }
  0x7d   : > { %1281 = vmatprep.subr.mxu0 %v889_v35  ;;  %1384 = vmatprep.subr.mxu1 %v478_v36  ;;  %v422_v35 = vld [vmem:[%s6634_s1 + $0x478] sm:$0xff]  ;;  %v611_v36 = vld [vmem:[%s6634_s1 + $0xa60] sm:$0xff] }
  0x7e   : > { %1209 = vmatmul.mubr.f32.gmra.mxu1 %v4058_v37  ;;  %1282 = vmatpush2.msra.mxu0 %v888_v38  ;;  %v421_v38 = vld [vmem:[%s6634_s1 + $0x470] sm:$0xff] }
  0x7f   : > { %1385 = vmatpush2.msra.mxu1 %v477_v39  ;;  %1101 = vmatprep.mubr.f32.mxu0 %v4068_v40  ;;  %v610_v39 = vld [vmem:[%s6634_s1 + $0xa58] sm:$0xff] }
  0x80   : > { %1283 = vmatprep.subr.mxu0 %v882_v41  ;;  %1386 = vmatprep.subr.mxu1 %v471_v42  ;;  %v415_v41 = vld [vmem:[%s6634_s1 + $0x440] sm:$0xff]  ;;  %v604_v42 = vld [vmem:[%s6634_s1 + $0xa28] sm:$0xff] }
  0x81   : > { %1102 = vmatmul.mubr.f32.gmra.mxu0 %v4078_v43  ;;  %1387 = vmatpush2.msra.mxu1 %v470_v44  ;;  %v4228_v44 = vld [vmem:[%s3717_s8 + $0x58] sm:$0xff] }
  0x82   : > { %1284 = vmatpush2.msra.mxu0 %v881_v45  ;;  %1214 = vmatprep.mubr.f32.mxu1 %v4088_v46  ;;  %v414_v45 = vld [vmem:[%s6634_s1 + $0x438] sm:$0xff] }
  0x83   : > { %1285 = vmatprep.subr.mxu0 %v875_v47  ;;  %1388 = vmatprep.subr.mxu1 %v464_v48  ;;  %v603_v47 = vld [vmem:[%s6634_s1 + $0xa20] sm:$0xff]  ;;  %v4237_v48 = vld [vmem:[%s3717_s8 + $0x50] sm:$0xff] }
  0x84   : > { %1215 = vmatmul.mubr.f32.gmra.mxu1 %v4098_v49  ;;  %1286 = vmatpush2.msra.mxu0 %v874_v50  ;;  %v408_v50 = vld [vmem:[%s6634_s1 + $0x408] sm:$0xff] }
  0x85   : > { %1389 = vmatpush2.msra.mxu1 %v463_v51  ;;  %1107 = vmatprep.mubr.f32.mxu0 %v4108_v52  ;;  %v597_v51 = vld [vmem:[%s6634_s1 + $0x9f0] sm:$0xff] }
  0x86   : > { %1287 = vmatprep.subr.mxu0 %v868_v53  ;;  %1390 = vmatprep.subr.mxu1 %v457_v55  ;;  %v407_v53 = vld [vmem:[%s6634_s1 + $0x400] sm:$0xff]  ;;  %v596_v55 = vld [vmem:[%s6634_s1 + $0x9e8] sm:$0xff] }
  0x87   : > { %1108 = vmatmul.mubr.f32.gmra.mxu0 %v4118_v56  ;;  %1391 = vmatpush2.msra.mxu1 %v456_v58  ;;  %v401_v58 = vld [vmem:[%s6634_s1 + $0x3d0] sm:$0xff] }
  0x88   : > { %1288 = vmatpush2.msra.mxu0 %v867_v59  ;;  %1220 = vmatprep.mubr.f32.mxu1 %v4128_v62  ;;  %v590_v59 = vld [vmem:[%s6634_s1 + $0x9b8] sm:$0xff] }
  0x89   : > { %1289 = vmatprep.subr.mxu0 %v861_v0  ;;  %1392 = vmatprep.subr.mxu1 %v450_v2  ;;  %v4261_v0 = vld [vmem:[%s3717_s8 + $0x88] sm:$0xff] }
  0x8a   : > { %1221 = vmatmul.mubr.f32.gmra.mxu1 %v4138_v3  ;;  %1290 = vmatpush2.msra.mxu0 %v860_v5  ;;  %v400_v2 = vld [vmem:[%s6634_s1 + $0x3c8] sm:$0xff]  ;;  %v589_v5 = vld [vmem:[%s6634_s1 + $0x9b0] sm:$0xff] }
  0x8b   : > { %1393 = vmatpush2.msra.mxu1 %v449_v6  ;;  %1113 = vmatprep.mubr.f32.mxu0 %v4148_v8  ;;  %v4270_v6 = vld [vmem:[%s3717_s8 + $0x80] sm:$0xff] }
  0x8c   : > { %1291 = vmatprep.subr.mxu0 %v854_v9  ;;  %1394 = vmatprep.subr.mxu1 %v443_v11  ;;  %v394_v9 = vld [vmem:[%s6634_s1 + $0x398] sm:$0xff]  ;;  %v583_v11 = vld [vmem:[%s6634_s1 + $0x980] sm:$0xff] }
  0x8d   : > { %1114 = vmatmul.mubr.f32.gmra.mxu0 %v4158_v12  ;;  %1395 = vmatpush2.msra.mxu1 %v442_v14  ;;  %v393_v14 = vld [vmem:[%s6634_s1 + $0x390] sm:$0xff] }
  0x8e   : > { %1292 = vmatpush2.msra.mxu0 %v853_v15  ;;  %1226 = vmatprep.mubr.f32.mxu1 %v4168_v17  ;;  %v582_v15 = vld [vmem:[%s6634_s1 + $0x978] sm:$0xff] }
  0x8f   : > { %1293 = vmatprep.subr.mxu0 %v847_v18  ;;  %1396 = vmatprep.subr.mxu1 %v436_v20  ;;  %v576_v18 = vld [vmem:[%s6634_s1 + $0x948] sm:$0xff]  ;;  %v835_v20 = vld [vmem:[%s6634_s1 + $0x1160] sm:$0xff] }
  0x90   : > { %1227 = vmatmul.mubr.f32.gmra.mxu1 %v4178_v21  ;;  %1294 = vmatpush2.msra.mxu0 %v846_v23  ;;  %v4294_v23 = vld [vmem:[%s3717_s8 + $0xb8] sm:$0xff] }
  0x91   : > { %1397 = vmatpush2.msra.mxu1 %v435_v24  ;;  %1295 = vmatprep.subr.mxu0 %v840_v26  ;;  %v575_v24 = vld [vmem:[%s6634_s1 + $0x940] sm:$0xff]  ;;  %v834_v26 = vld [vmem:[%s6634_s1 + $0x1158] sm:$0xff] }
  0x92   : > { %1398 = vmatprep.subr.mxu1 %v429_v27  ;;  %1296 = vmatpush2.msra.mxu0 %v839_v29  ;;  %v4304_v27 = vld [vmem:[%s3717_s8 + $0xb0] sm:$0xff] }
  0x93   : > { %2928 = vmatprep.mubr.msk.f32.mxu0 %vm960_vm1, %v4198_v30  ;;  %1399 = vmatpush2.msra.mxu1 %v428_v32  ;;  %v569_v29 = vld [vmem:[%s6634_s1 + $0x910] sm:$0xff]  ;;  %v568_v32 = vld [vmem:[%s6634_s1 + $0x908] sm:$0xff] }
  0x94   : > { %1298 = vmatmul.mubr.f32.vlgmr.msra.gmra.mxu0 %v4204_v33  ;;  %1400 = vmatprep.subr.mxu1 %v422_v35  ;;  %v827_v35 = vld [vmem:[%s6634_s1 + $0x1120] sm:$0xff] }
  0x95   : > { %1459 = vmatprep.subr.mxu0 %v611_v36  ;;  %1401 = vmatpush2.msra.mxu1 %v421_v38  ;;  %v562_v36 = vld [vmem:[%s6634_s1 + $0x8d8] sm:$0xff]  ;;  %v4329_v38 = vld [vmem:[%s3717_s8 + $0xe8] sm:$0xff] }
  0x96   : > { %1460 = vmatpush1.msra.mxu0 %v610_v39  ;;  %1402 = vmatprep.subr.mxu1 %v415_v41  ;;  %v561_v39 = vld [vmem:[%s6634_s1 + $0x8d0] sm:$0xff]  ;;  %v820_v41 = vld [vmem:[%s6634_s1 + $0x10e8] sm:$0xff] }
  0x97   : > { %1461 = vmatprep.subr.mxu0 %v604_v42  ;;  %2929 = vmatprep.mubr.msk.f32.mxu0 %vm960_vm1, %v4228_v44  ;;  %v4338_v42 = vld [vmem:[%s3717_s8 + $0xe0] sm:$0xff] }
  0x98   : > { %1403 = vmatpush2.msra.mxu1 %v414_v45  ;;  %1462 = vmatpush1.msra.mxu0 %v603_v47  ;;  %v555_v45 = vld [vmem:[%s6634_s1 + $0x8a0] sm:$0xff]  ;;  %v814_v47 = vld [vmem:[%s6634_s1 + $0x10b8] sm:$0xff] }
  0x99   : > { %1304 = vmatmul.mubr.f32.gmra.mxu0 %v4237_v48  ;;  %1404 = vmatprep.subr.mxu1 %v408_v50  ;;  %v554_v50 = vld [vmem:[%s6634_s1 + $0x898] sm:$0xff] }
  0x9a   : > { %1463 = vmatprep.subr.mxu0 %v597_v51  ;;  %1405 = vmatpush2.msra.mxu1 %v407_v53  ;;  %v813_v51 = vld [vmem:[%s6634_s1 + $0x10b0] sm:$0xff]  ;;  %v548_v53 = vld [vmem:[%s6634_s1 + $0x868] sm:$0xff] }
  0x9b   : > { %1464 = vmatpush1.msra.mxu0 %v596_v55  ;;  %1406 = vmatprep.subr.mxu1 %v401_v58  ;;  %v807_v55 = vld [vmem:[%s6634_s1 + $0x1080] sm:$0xff]  ;;  %v4362_v58 = vld [vmem:[%s3717_s8 + $0x118] sm:$0xff] }
  0x9c   : > { %1465 = vmatprep.subr.mxu0 %v590_v59  ;;  %2930 = vmatprep.mubr.msk.f32.mxu0 %vm960_vm1, %v4261_v0  ;;  %v547_v59 = vld [vmem:[%s6634_s1 + $0x860] sm:$0xff] }
  0x9d   : > { %1407 = vmatpush2.msra.mxu1 %v400_v2  ;;  %1466 = vmatpush1.msra.mxu0 %v589_v5  ;;  %v806_v2 = vld [vmem:[%s6634_s1 + $0x1078] sm:$0xff]  ;;  %v4371_v5 = vld [vmem:[%s3717_s8 + $0x110] sm:$0xff] }
  0x9e   : > { %1310 = vmatmul.mubr.f32.gmra.mxu0 %v4270_v6  ;;  %1408 = vmatprep.subr.mxu1 %v394_v9  ;;  %v541_v9 = vld [vmem:[%s6634_s1 + $0x830] sm:$0xff] }
  0x9f   : > { %1467 = vmatprep.subr.mxu0 %v583_v11  ;;  %1409 = vmatpush2.msra.mxu1 %v393_v14  ;;  %v800_v11 = vld [vmem:[%s6634_s1 + $0x1048] sm:$0xff] }
  0xa0   : > { %1468 = vmatpush1.msra.mxu0 %v582_v15  ;;  %1410 = vmatprep.mubr.f32.mxu1 %v3735_v60  ;;  %v828_v60 = vld [vmem:[%s6634_s1 + $0x1128] sm:$0xff]  ;;  %v799_v15 = vld [vmem:[%s6634_s1 + $0x1040] sm:$0xff] }
  0xa1   : > { %1469 = vmatprep.subr.mxu0 %v576_v18  ;;  %1572 = vmatprep.subr.mxu1 %v835_v20  ;;  %v540_v14 = vld [vmem:[%s6634_s1 + $0x828] sm:$0xff]  ;;  %v534_v18 = vld [vmem:[%s6634_s1 + $0x7f8] sm:$0xff]  ;;  %v793_v20 = vld [vmem:[%s6634_s1 + $0x1010] sm:$0xff] }
  0xa2   : > { %2931 = vmatprep.mubr.msk.f32.mxu0 %vm960_vm1, %v4294_v23  ;;  %1411 = vmatmul.mubr.f32.vlgmr.msra.gmra.mxu1 %v3744_v63  ;;  %v821_v63 = vld [vmem:[%s6634_s1 + $0x10f0] sm:$0xff] }
  0xa3   : > { %1470 = vmatpush1.msra.mxu0 %v575_v24  ;;  %1573 = vmatpush1.msra.mxu1 %v834_v26  ;;  %v4395_v24 = vld [vmem:[%s3717_s8 + $0x148] sm:$0xff]  ;;  %v533_v26 = vld [vmem:[%s6634_s1 + $0x7f0] sm:$0xff] }
  0xa4   : > { %1316 = vmatmul.mubr.f32.gmra.mxu0 %v4304_v27  ;;  %1471 = vmatprep.subr.mxu0 %v569_v29  ;;  %v792_v29 = vld [vmem:[%s6634_s1 + $0x1008] sm:$0xff] }
  0xa5   : > { %1574 = vmatprep.subr.mxu1 %v828_v60  ;;  %1472 = vmatpush1.msra.mxu0 %v568_v32  ;;  %v4404_v60 = vld [vmem:[%s3717_s8 + $0x140] sm:$0xff] }
  0xa6   : > { %1575 = vmatpush1.msra.mxu1 %v827_v35  ;;  %1473 = vmatprep.subr.mxu0 %v562_v36  ;;  %v527_v32 = vld [vmem:[%s6634_s1 + $0x7c0] sm:$0xff]  ;;  %v786_v35 = vld [vmem:[%s6634_s1 + $0xfd8] sm:$0xff] }
  0xa7   : > { %1576 = vmatprep.subr.mxu1 %v821_v63  ;;  %2932 = vmatprep.mubr.msk.f32.mxu0 %vm960_vm1, %v4329_v38  ;;  %v526_v36 = vld [vmem:[%s6634_s1 + $0x7b8] sm:$0xff]  ;;  %v785_v63 = vld [vmem:[%s6634_s1 + $0xfd0] sm:$0xff] }
  0xa8   : > { %1474 = vmatpush1.msra.mxu0 %v561_v39  ;;  %1577 = vmatpush1.msra.mxu1 %v820_v41  ;;  %v520_v39 = vld [vmem:[%s6634_s1 + $0x788] sm:$0xff]  ;;  %v779_v41 = vld [vmem:[%s6634_s1 + $0xfa0] sm:$0xff] }
  0xa9   : > { %1322 = vmatmul.mubr.f32.gmra.mxu0 %v4338_v42  ;;  %1475 = vmatprep.subr.mxu0 %v555_v45  ;;  %v4428_v45 = vld [vmem:[%s3717_s8 + $0x178] sm:$0xff] }
  0xaa   : > { %1578 = vmatprep.subr.mxu1 %v814_v47  ;;  %1476 = vmatpush1.msra.mxu0 %v554_v50  ;;  %v519_v47 = vld [vmem:[%s6634_s1 + $0x780] sm:$0xff]  ;;  %v778_v50 = vld [vmem:[%s6634_s1 + $0xf98] sm:$0xff] }
  0xab   : > { %1579 = vmatpush1.msra.mxu1 %v813_v51  ;;  %1477 = vmatprep.subr.mxu0 %v548_v53  ;;  %v4437_v51 = vld [vmem:[%s3717_s8 + $0x170] sm:$0xff] }
  0xac   : > { %1580 = vmatprep.subr.mxu1 %v807_v55  ;;  %2933 = vmatprep.mubr.msk.f32.mxu0 %vm960_vm1, %v4362_v58  ;;  %v513_v53 = vld [vmem:[%s6634_s1 + $0x750] sm:$0xff]  ;;  %v772_v55 = vld [vmem:[%s6634_s1 + $0xf68] sm:$0xff] }
  0xad   : > { %1478 = vmatpush1.msra.mxu0 %v547_v59  ;;  %1581 = vmatpush1.msra.mxu1 %v806_v2  ;;  %v512_v59 = vld [vmem:[%s6634_s1 + $0x748] sm:$0xff]  ;;  %v771_v2 = vld [vmem:[%s6634_s1 + $0xf60] sm:$0xff] }
  0xae   : > { %1328 = vmatmul.mubr.f32.gmra.mxu0 %v4371_v5  ;;  %1479 = vmatprep.subr.mxu0 %v541_v9  ;;  %v506_v9 = vld [vmem:[%s6634_s1 + $0x718] sm:$0xff] }
  0xaf   : > { %1582 = vmatprep.subr.mxu1 %v800_v11  ;;  %1480 = vmatpush1.msra.mxu0 %v540_v14  ;;  %v765_v11 = vld [vmem:[%s6634_s1 + $0xf30] sm:$0xff] }
  0xb0   : > { %1583 = vmatpush1.msra.mxu1 %v799_v15  ;;  %1481 = vmatprep.subr.mxu0 %v534_v18  ;;  %v505_v14 = vld [vmem:[%s6634_s1 + $0x710] sm:$0xff]  ;;  %v764_v15 = vld [vmem:[%s6634_s1 + $0xf28] sm:$0xff]  ;;  %v723_v18 = vld [vmem:[%s6634_s1 + $0xde0] sm:$0xff] }
  0xb1   : > { %1584 = vmatprep.subr.mxu1 %v793_v20  ;;  %2934 = vmatprep.mubr.msk.f32.mxu0 %vm960_vm1, %v4395_v24  ;;  %v758_v20 = vld [vmem:[%s6634_s1 + $0xef8] sm:$0xff] }
  0xb2   : > { %1482 = vmatpush1.msra.mxu0 %v533_v26  ;;  %1585 = vmatpush1.msra.mxu1 %v792_v29  ;;  %v722_v26 = vld [vmem:[%s6634_s1 + $0xdd8] sm:$0xff]  ;;  %v757_v29 = vld [vmem:[%s6634_s1 + $0xef0] sm:$0xff] }
  0xb3   : > { %1334 = vmatmul.mubr.f32.gmra.mxu0 %v4404_v60  ;;  %1483 = vmatprep.subr.mxu0 %v527_v32  ;;  %v716_v32 = vld [vmem:[%s6634_s1 + $0xda8] sm:$0xff] }
  0xb4   : > { %1586 = vmatprep.subr.mxu1 %v786_v35  ;;  %1484 = vmatpush1.msra.mxu0 %v526_v36  ;;  %v751_v35 = vld [vmem:[%s6634_s1 + $0xec0] sm:$0xff] }
  0xb5   : > { %1587 = vmatpush1.msra.mxu1 %v785_v63  ;;  %1485 = vmatprep.subr.mxu0 %v520_v39  ;;  %v715_v36 = vld [vmem:[%s6634_s1 + $0xda0] sm:$0xff]  ;;  %v750_v63 = vld [vmem:[%s6634_s1 + $0xeb8] sm:$0xff]  ;;  %v709_v39 = vld [vmem:[%s6634_s1 + $0xd70] sm:$0xff] }
  0xb6   : > { %1588 = vmatprep.subr.mxu1 %v779_v41  ;;  %2935 = vmatprep.mubr.msk.f32.mxu0 %vm960_vm1, %v4428_v45  ;;  %v744_v41 = vld [vmem:[%s6634_s1 + $0xe88] sm:$0xff] }
  0xb7   : > { %1486 = vmatpush1.msra.mxu0 %v519_v47  ;;  %1589 = vmatpush1.msra.mxu1 %v778_v50  ;;  %v708_v47 = vld [vmem:[%s6634_s1 + $0xd68] sm:$0xff]  ;;  %v743_v50 = vld [vmem:[%s6634_s1 + $0xe80] sm:$0xff] }
  0xb8   : > { %1340 = vmatmul.mubr.f32.gmra.mxu0 %v4437_v51  ;;  %1487 = vmatprep.subr.mxu0 %v513_v53  ;;  %v702_v53 = vld [vmem:[%s6634_s1 + $0xd38] sm:$0xff] }
  0xb9   : > { %1590 = vmatprep.subr.mxu1 %v772_v55  ;;  %1488 = vmatpush1.msra.mxu0 %v512_v59  ;;  %v737_v55 = vld [vmem:[%s6634_s1 + $0xe50] sm:$0xff] }
  0xba   : > { %1591 = vmatpush1.msra.mxu1 %v771_v2  ;;  %1489 = vmatprep.subr.mxu0 %v506_v9  ;;  %v701_v59 = vld [vmem:[%s6634_s1 + $0xd30] sm:$0xff]  ;;  %v736_v2 = vld [vmem:[%s6634_s1 + $0xe48] sm:$0xff]  ;;  %v695_v9 = vld [vmem:[%s6634_s1 + $0xd00] sm:$0xff] }
  0xbb   : > { %1592 = vmatprep.subr.mxu1 %v765_v11  ;;  %1490 = vmatpush1.msra.mxu0 %v505_v14  ;;  %v694_v11 = vld [vmem:[%s6634_s1 + $0xcf8] sm:$0xff]  ;;  %v729_v14 = vld [vmem:[%s6634_s1 + $0xe10] sm:$0xff] }
  0xbc   : > { %1593 = vmatpush1.msra.mxu1 %v764_v15  ;;  %1491 = vmatprep.subr.mxu0 %v723_v18  ;;  %v919_v15 = vld [vmem:[%s6634_s1 + $0x1400] sm:$0x1] }
  0xbd   : > { %1594 = vmatprep.subr.mxu1 %v758_v20  ;;  %1492 = vmatpush2.msra.mxu0 %v722_v26  ;;  %v687_v18 = vld [vmem:[%s6634_s1 + $0xcc0] sm:$0xff]  ;;  %v918_v20 = vld [vmem:[%s6634_s1 + $0x13f8] sm:$0x1]  ;;  %v681_v26 = vld [vmem:[%s6634_s1 + $0xc90] sm:$0xff] }
  0xbe   : > { %1595 = vmatpush1.msra.mxu1 %v757_v29  ;;  %1493 = vmatprep.subr.mxu0 %v716_v32  ;;  %v680_v29 = vld [vmem:[%s6634_s1 + $0xc88] sm:$0xff]  ;;  %v911_v32 = vld [vmem:[%s6634_s1 + $0x13c0] sm:$0xff] }
  0xbf   : > { %1596 = vmatprep.subr.mxu1 %v751_v35  ;;  %1494 = vmatpush2.msra.mxu0 %v715_v36  ;;  %v905_v35 = vld [vmem:[%s6634_s1 + $0x1390] sm:$0xff] }
  0xc0   : > { %1597 = vmatpush1.msra.mxu1 %v750_v63  ;;  %1495 = vmatprep.subr.mxu0 %v709_v39  ;;  %v673_v36 = vld [vmem:[%s6634_s1 + $0xc50] sm:$0xff]  ;;  %v904_v63 = vld [vmem:[%s6634_s1 + $0x1388] sm:$0xff]  ;;  %v667_v39 = vld [vmem:[%s6634_s1 + $0xc20] sm:$0xff] }
  0xc1   : > { %1598 = vmatprep.subr.mxu1 %v744_v41  ;;  %1416 = vmatprep.mubr.f32.mxu1 %v3907_v54  ;;  %v730_v54 = vld [vmem:[%s6634_s1 + $0xe18] sm:$0xff] }
  0xc2   : > { %1496 = vmatpush2.msra.mxu0 %v708_v47  ;;  %1599 = vmatpush1.msra.mxu1 %v743_v50  ;;  %v666_v41 = vld [vmem:[%s6634_s1 + $0xc18] sm:$0xff]  ;;  %v897_v47 = vld [vmem:[%s6634_s1 + $0x1350] sm:$0xff]  ;;  %v891_v50 = vld [vmem:[%s6634_s1 + $0x1320] sm:$0xff] }
  0xc3   : > { %1417 = vmatmul.mubr.f32.gmra.mxu1 %v3916_v57  ;;  %1497 = vmatprep.subr.mxu0 %v702_v53  ;;  %v688_v57 = vld [vmem:[%s6634_s1 + $0xcc8] sm:$0xff]  ;;  %v659_v53 = vld [vmem:[%s6634_s1 + $0xbe0] sm:$0xff] }
  0xc4   : > { %1600 = vmatprep.subr.mxu1 %v737_v55  ;;  %1498 = vmatpush2.msra.mxu0 %v701_v59  ;;  %v890_v55 = vld [vmem:[%s6634_s1 + $0x1318] sm:$0xff]  ;;  %v653_v59 = vld [vmem:[%s6634_s1 + $0xbb0] sm:$0xff] }
  0xc5   : > { %1601 = vmatpush1.msra.mxu1 %v736_v2  ;;  %1499 = vmatprep.subr.mxu0 %v695_v9  ;;  %v652_v2 = vld [vmem:[%s6634_s1 + $0xba8] sm:$0xff]  ;;  %v883_v9 = vld [vmem:[%s6634_s1 + $0x12e0] sm:$0xff] }
  0xc6   : > { %1602 = vmatprep.subr.mxu1 %v730_v54  ;;  %1422 = vmatprep.mubr.f32.mxu1 %v3946_v4  ;;  %v912_v4 = vld [vmem:[%s6634_s1 + $0x13c8] sm:$0xff]  ;;  %v877_v54 = vld [vmem:[%s6634_s1 + $0x12b0] sm:$0xff] }
  0xc7   : > { %1500 = vmatpush2.msra.mxu0 %v694_v11  ;;  %1603 = vmatpush1.msra.mxu1 %v729_v14  ;;  %v645_v11 = vld [vmem:[%s6634_s1 + $0xb70] sm:$0xff]  ;;  %v876_v14 = vld [vmem:[%s6634_s1 + $0x12a8] sm:$0xff] }
  0xc8   : > { %1423 = vmatmul.mubr.f32.gmra.mxu1 %v3956_v7  ;;  %1501 = vmatprep.subr.mxu0 %v688_v57  ;;  %v674_v7 = vld [vmem:[%s6634_s1 + $0xc58] sm:$0xff]  ;;  %v639_v57 = vld [vmem:[%s6634_s1 + $0xb40] sm:$0xff] }
  0xc9   : > { %2936 = vmatprep.subr.msk.mxu1 %vm985_vm0, %v919_v15  ;;  %1502 = vmatpush2.msra.mxu0 %v687_v18  ;;  %v638_v15 = vld [vmem:[%s6634_s1 + $0xb38] sm:$0xff]  ;;  %v869_v18 = vld [vmem:[%s6634_s1 + $0x1270] sm:$0xff] }
  0xca   : > { %2937 = vmatpush2.msk.msra.mxu1 %vm985_vm0, %v918_v20  ;;  %1503 = vmatprep.subr.mxu0 %v681_v26  ;;  %v863_v20 = vld [vmem:[%s6634_s1 + $0x1240] sm:$0xff] }
  0xcb   : > { %1614 = vmatprep.subr.mxu1 %v912_v4  ;;  %1428 = vmatprep.mubr.f32.mxu1 %v3986_v16  ;;  %v898_v16 = vld [vmem:[%s6634_s1 + $0x1358] sm:$0xff]  ;;  %v631_v26 = vld [vmem:[%s6634_s1 + $0xb00] sm:$0xff] }
  0xcc   : > { %1504 = vmatpush2.msra.mxu0 %v680_v29  ;;  %1615 = vmatpush2.msra.mxu1 %v911_v32  ;;  %v862_v4 = vld [vmem:[%s6634_s1 + $0x1238] sm:$0xff]  ;;  %v625_v29 = vld [vmem:[%s6634_s1 + $0xad0] sm:$0xff]  ;;  %v624_v32 = vld [vmem:[%s6634_s1 + $0xac8] sm:$0xff] }
  0xcd   : > { %1429 = vmatmul.mubr.f32.gmra.mxu1 %v3998_v19  ;;  %1505 = vmatprep.subr.mxu0 %v674_v7  ;;  %v660_v19 = vld [vmem:[%s6634_s1 + $0xbe8] sm:$0xff]  ;;  %v855_v7 = vld [vmem:[%s6634_s1 + $0x1200] sm:$0xff] }
  0xce   : > { %1616 = vmatprep.subr.mxu1 %v905_v35  ;;  %1506 = vmatpush2.msra.mxu0 %v673_v36  ;;  %v849_v35 = vld [vmem:[%s6634_s1 + $0x11d0] sm:$0xff] }
  0xcf   : > { %1617 = vmatpush2.msra.mxu1 %v904_v63  ;;  %1507 = vmatprep.subr.mxu0 %v667_v39  ;;  %v617_v36 = vld [vmem:[%s6634_s1 + $0xa90] sm:$0xff]  ;;  %v848_v63 = vld [vmem:[%s6634_s1 + $0x11c8] sm:$0xff] }
  0xd0   : > { %1618 = vmatprep.subr.mxu1 %v898_v16  ;;  %1434 = vmatprep.mubr.f32.mxu1 %v4028_v28  ;;  %v884_v28 = vld [vmem:[%s6634_s1 + $0x12e8] sm:$0xff]  ;;  %v389_v39 = vld [vmem:[%s6634_s1 + $0x370] sm:$0xff] }
  0xd1   : > { %1508 = vmatpush2.msra.mxu0 %v666_v41  ;;  %1619 = vmatpush2.msra.mxu1 %v897_v47  ;;  %v841_v16 = vld [vmem:[%s6634_s1 + $0x1190] sm:$0xff]  ;;  %v4684_v41 = vld [vmem:[%s3717_s8 + $0x18] sm:$0xff] }
  0xd2   : > { %1435 = vmatmul.mubr.f32.gmra.mxu1 %v4038_v31  ;;  %1509 = vmatprep.subr.mxu0 %v660_v19  ;;  %v646_v31 = vld [vmem:[%s6634_s1 + $0xb78] sm:$0xff]  ;;  %v4691_v47 = vld [vmem:[%s3717_s8 + $0x10] sm:$0xff] }
  0xd3   : > { %1620 = vmatprep.subr.mxu1 %v891_v50  ;;  %1510 = vmatpush2.msra.mxu0 %v659_v53  ;;  %v382_v19 = vld [vmem:[%s6634_s1 + $0x338] sm:$0xff]  ;;  %v613_v50 = vld [vmem:[%s6634_s1 + $0xa70] sm:$0xff] }
  0xd4   : > { %1621 = vmatpush2.msra.mxu1 %v890_v55  ;;  %1511 = vmatprep.subr.mxu0 %v653_v59  ;;  %v381_v53 = vld [vmem:[%s6634_s1 + $0x330] sm:$0xff]  ;;  %v612_v55 = vld [vmem:[%s6634_s1 + $0xa68] sm:$0xff]  ;;  %v375_v59 = vld [vmem:[%s6634_s1 + $0x300] sm:$0xff] }
  0xd5   : > { %1622 = vmatprep.subr.mxu1 %v884_v28  ;;  %1440 = vmatprep.mubr.f32.mxu1 %v4068_v40  ;;  %v870_v40 = vld [vmem:[%s6634_s1 + $0x1278] sm:$0xff] }
  0xd6   : > { %1512 = vmatpush2.msra.mxu0 %v652_v2  ;;  %1623 = vmatpush2.msra.mxu1 %v883_v9  ;;  %v374_v28 = vld [vmem:[%s6634_s1 + $0x2f8] sm:$0xff]  ;;  %v599_v2 = vld [vmem:[%s6634_s1 + $0xa00] sm:$0xff] }
  0xd7   : > { %1441 = vmatmul.mubr.f32.gmra.mxu1 %v4078_v43  ;;  %1513 = vmatprep.subr.mxu0 %v646_v31  ;;  %v632_v43 = vld [vmem:[%s6634_s1 + $0xb08] sm:$0xff]  ;;  %v367_v9 = vld [vmem:[%s6634_s1 + $0x2c0] sm:$0xff] }
  0xd8   : > { %1624 = vmatprep.subr.mxu1 %v877_v54  ;;  %1514 = vmatpush2.msra.mxu0 %v645_v11  ;;  %v592_v31 = vld [vmem:[%s6634_s1 + $0x9c8] sm:$0xff]  ;;  %v585_v11 = vld [vmem:[%s6634_s1 + $0x990] sm:$0xff] }
  0xd9   : > { %1625 = vmatpush2.msra.mxu1 %v876_v14  ;;  %1515 = vmatprep.subr.mxu0 %v639_v57  ;;  %v360_v54 = vld [vmem:[%s6634_s1 + $0x288] sm:$0xff]  ;;  %v353_v14 = vld [vmem:[%s6634_s1 + $0x250] sm:$0xff]  ;;  %v578_v57 = vld [vmem:[%s6634_s1 + $0x958] sm:$0xff] }
  0xda   : > { %1626 = vmatprep.subr.mxu1 %v870_v40  ;;  %1446 = vmatprep.mubr.f32.mxu1 %v4108_v52  ;;  %v856_v52 = vld [vmem:[%s6634_s1 + $0x1208] sm:$0xff]  ;;  %v346_v40 = vld [vmem:[%s6634_s1 + $0x218] sm:$0xff] }
  0xdb   : > { %1516 = vmatpush2.msra.mxu0 %v638_v15  ;;  %1627 = vmatpush2.msra.mxu1 %v869_v18  ;;  %v571_v15 = vld [vmem:[%s6634_s1 + $0x920] sm:$0xff] }
  0xdc   : > { %1447 = vmatmul.mubr.f32.gmra.mxu1 %v4118_v56  ;;  %1517 = vmatprep.subr.mxu0 %v632_v43  ;;  %v618_v56 = vld [vmem:[%s6634_s1 + $0xa98] sm:$0xff]  ;;  %v339_v18 = vld [vmem:[%s6634_s1 + $0x1e0] sm:$0xff]  ;;  %v564_v43 = vld [vmem:[%s6634_s1 + $0x8e8] sm:$0xff] }
  0xdd   : > { %1628 = vmatprep.subr.mxu1 %v863_v20  ;;  %1518 = vmatpush2.msra.mxu0 %v631_v26  ;;  %v332_v20 = vld [vmem:[%s6634_s1 + $0x1a8] sm:$0xff]  ;;  %v557_v26 = vld [vmem:[%s6634_s1 + $0x8b0] sm:$0xff] }
  0xde   : > { %1629 = vmatpush2.msra.mxu1 %v862_v4  ;;  %1519 = vmatprep.subr.mxu0 %v625_v29  ;;  %v925_v4 = vlaneseq  ;;  %v556_v29 = vld [vmem:[%s6634_s1 + $0x8a8] sm:$0xff] }
  0xdf   : > { %1630 = vmatprep.subr.mxu1 %v856_v52  ;;  %1452 = vmatprep.mubr.f32.mxu1 %v4148_v8  ;;  %v842_v8 = vld [vmem:[%s6634_s1 + $0x1198] sm:$0xff] }
  0xe0   : > { %1520 = vmatpush2.msra.mxu0 %v624_v32  ;;  %1631 = vmatpush2.msra.mxu1 %v855_v7  ;;  %v550_v52 = vld [vmem:[%s6634_s1 + $0x878] sm:$0xff]  ;;  %v4838_v7 = vshrl.u32 %v925_v4, 7  ;;  %v689_v4 = vld [vmem:[%s6634_s1 + $0xcd0] sm:$0xff] }
  0xe1   : > { %1453 = vmatmul.mubr.f32.gmra.mxu1 %v4158_v12  ;;  %1521 = vmatprep.subr.mxu0 %v618_v56  ;;  %v388_v12 = vld [vmem:[%s6634_s1 + $0x368] sm:$0xff]  ;;  %v318_v32 = vld [vmem:[%s6634_s1 + $0x138] sm:$0xff]  ;;  %v543_v56 = vld [vmem:[%s6634_s1 + $0x840] sm:$0xff] }
  0xe2   : > { %1632 = vmatprep.subr.mxu1 %v849_v35  ;;  %1522 = vmatpush2.msra.mxu0 %v617_v36  ;;  %v311_v35 = vld [vmem:[%s6634_s1 + $0x100] sm:$0xff]  ;;  %v927_v36 = vsub.s32 0, %v4838_v7 }
  0xe3   : > { %1523 = vmatprep.mubr.f32.mxu0 %v4684_v41  ;;  %1633 = vmatpush2.msra.mxu1 %v848_v63  ;;  %v536_v63 = vld [vmem:[%s6634_s1 + $0x808] sm:$0xff] }
  0xe4   : > { %1524 = vmatmul.mubr.f32.vlgmr.msra.gmra.mxu0 %v4691_v47  ;;  %1634 = vmatprep.subr.mxu1 %v842_v8  ;;  %v923_v8 = vld [vmem:[%s6635_s2] sm:$0x7f] }
  0xe5   : > { %1685 = vmatprep.subr.mxu0 %v389_v39  ;;  %1635 = vmatpush2.msra.mxu1 %v841_v16  ;;  %v535_v39 = vld [vmem:[%s6634_s1 + $0x800] sm:$0xff]  ;;  %v529_v16 = vld [vmem:[%s6634_s1 + $0x7d0] sm:$0xff] }
  0xe6   : > { %2938 = vmatprep.mubr.msk.f32.mxu1 %vm960_vm1, %v4198_v30  ;;  %1686 = vmatpush1.msra.mxu0 %v388_v12  ;;  %v606_v30 = vld [vmem:[%s6634_s1 + $0xa38] sm:$0xff]  ;;  %v4882_v12 = vrot.slane %v923_v8, %v927_v36  ;;  %v668_v36 = vld [vmem:[%s6634_s1 + $0xc28] sm:$0xff] }
  0xe7   : > { %1637 = vmatmul.mubr.f32.vlgmr.msra.gmra.mxu1 %v4204_v33  ;;  %1687 = vmatprep.subr.mxu0 %v382_v19  ;;  %v605_v33 = vld [vmem:[%s6634_s1 + $0xa30] sm:$0xff]  ;;  %v528_v19 = vld [vmem:[%s6634_s1 + $0x7c8] sm:$0xff]  ;;  %v662_v8 = vld [vmem:[%s6634_s1 + $0xbf8] sm:$0xff] }
  0xe8   : > { %1798 = vmatprep.subr.mxu1 %v613_v50  ;;  %1529 = vmatprep.mubr.f32.mxu0 %v3926_v61  ;;  %v368_v61 = vld [vmem:[%s6634_s1 + $0x2c8] sm:$0xff]  ;;  %v522_v50 = vld [vmem:[%s6634_s1 + $0x798] sm:$0xff] }
  0xe9   : > { %1688 = vmatpush1.msra.mxu0 %v381_v53  ;;  %1799 = vmatpush1.msra.mxu1 %v612_v55  ;;  %v290_v55 = vld [vmem:[%s6634_s1 + $0x58] sm:$0xff] }
  0xea   : > { %1530 = vmatmul.mubr.f32.gmra.mxu0 %v3936_v1  ;;  %1689 = vmatprep.subr.mxu0 %v375_v59  ;;  %v598_v1 = vld [vmem:[%s6634_s1 + $0x9f8] sm:$0xff] }
  0xeb   : > { %1800 = vmatprep.subr.mxu1 %v606_v30  ;;  %2939 = vmatprep.mubr.msk.f32.mxu1 %vm960_vm1, %v4228_v44  ;;  %v361_v44 = vld [vmem:[%s6634_s1 + $0x290] sm:$0xff]  ;;  %v515_v30 = vld [vmem:[%s6634_s1 + $0x760] sm:$0xff] }
  0xec   : > { %1690 = vmatpush1.msra.mxu0 %v374_v28  ;;  %1801 = vmatpush1.msra.mxu1 %v605_v33  ;;  %v283_v28 = vld [vmem:[%s6634_s1 + $0x20] sm:$0xff] }
  0xed   : > { %1643 = vmatmul.mubr.f32.gmra.mxu1 %v4237_v48  ;;  %1691 = vmatprep.subr.mxu0 %v368_v61  ;;  %v591_v48 = vld [vmem:[%s6634_s1 + $0x9c0] sm:$0xff]  ;;  %v501_v61 = vld [vmem:[%s6634_s1 + $0x6f0] sm:$0xff] }
  0xee   : > { %1802 = vmatprep.subr.mxu1 %v599_v2  ;;  %1535 = vmatprep.mubr.f32.mxu0 %v3966_v10  ;;  %v354_v10 = vld [vmem:[%s6634_s1 + $0x258] sm:$0xff]  ;;  %v508_v2 = vld [vmem:[%s6634_s1 + $0x728] sm:$0xff] }
  0xef   : > { %1692 = vmatpush1.msra.mxu0 %v367_v9  ;;  %1803 = vmatpush1.msra.mxu1 %v598_v1  ;;  %v500_v9 = vld [vmem:[%s6634_s1 + $0x6e8] sm:$0xff]  ;;  %v507_v1 = vld [vmem:[%s6634_s1 + $0x720] sm:$0xff] }
  0xf0   : > { %1536 = vmatmul.mubr.f32.gmra.mxu0 %v3976_v13  ;;  %1693 = vmatprep.subr.mxu0 %v361_v44  ;;  %v584_v13 = vld [vmem:[%s6634_s1 + $0x988] sm:$0xff]  ;;  %v494_v44 = vld [vmem:[%s6634_s1 + $0x6b8] sm:$0xff] }
  0xf1   : > { %1804 = vmatprep.subr.mxu1 %v592_v31  ;;  %2940 = vmatprep.mubr.msk.f32.mxu1 %vm960_vm1, %v4261_v0  ;;  %v347_v0 = vld [vmem:[%s6634_s1 + $0x220] sm:$0xff]  ;;  %v493_v31 = vld [vmem:[%s6634_s1 + $0x6b0] sm:$0xff] }
  0xf2   : > { %1694 = vmatpush1.msra.mxu0 %v360_v54  ;;  %1805 = vmatpush1.msra.mxu1 %v591_v48  ;;  %v724_v54 = vld [vmem:[%s6634_s1 + $0xde8] sm:$0xff]  ;;  %v487_v48 = vld [vmem:[%s6634_s1 + $0x680] sm:$0xff] }
  0xf3   : > { %1649 = vmatmul.mubr.f32.gmra.mxu1 %v4270_v6  ;;  %1695 = vmatprep.subr.mxu0 %v354_v10  ;;  %v577_v6 = vld [vmem:[%s6634_s1 + $0x950] sm:$0xff]  ;;  %v718_v10 = vld [vmem:[%s6634_s1 + $0xdb8] sm:$0xff] }
  0xf4   : > { %1806 = vmatprep.subr.mxu1 %v585_v11  ;;  %1541 = vmatprep.mubr.f32.mxu0 %v4008_v22  ;;  %v340_v22 = vld [vmem:[%s6634_s1 + $0x1e8] sm:$0xff]  ;;  %v486_v11 = vld [vmem:[%s6634_s1 + $0x678] sm:$0xff] }
  0xf5   : > { %1696 = vmatpush1.msra.mxu0 %v353_v14  ;;  %1807 = vmatpush1.msra.mxu1 %v584_v13  ;;  %v717_v14 = vld [vmem:[%s6634_s1 + $0xdb0] sm:$0xff]  ;;  %v480_v13 = vld [vmem:[%s6634_s1 + $0x648] sm:$0xff] }
  0xf6   : > { %1542 = vmatmul.mubr.f32.gmra.mxu0 %v4018_v25  ;;  %1697 = vmatprep.subr.mxu0 %v347_v0  ;;  %v570_v25 = vld [vmem:[%s6634_s1 + $0x918] sm:$0xff]  ;;  %v711_v0 = vld [vmem:[%s6634_s1 + $0xd80] sm:$0xff] }
  0xf7   : > { %1808 = vmatprep.subr.mxu1 %v578_v57  ;;  %2941 = vmatprep.mubr.msk.f32.mxu1 %vm960_vm1, %v4294_v23  ;;  %v333_v23 = vld [vmem:[%s6634_s1 + $0x1b0] sm:$0xff]  ;;  %v479_v57 = vld [vmem:[%s6634_s1 + $0x640] sm:$0xff] }
  0xf8   : > { %1698 = vmatpush1.msra.mxu0 %v346_v40  ;;  %1809 = vmatpush1.msra.mxu1 %v577_v6  ;;  %v710_v40 = vld [vmem:[%s6634_s1 + $0xd78] sm:$0xff]  ;;  %v473_v6 = vld [vmem:[%s6634_s1 + $0x610] sm:$0xff] }
  0xf9   : > { %1655 = vmatmul.mubr.f32.gmra.mxu1 %v4304_v27  ;;  %1699 = vmatprep.subr.mxu0 %v340_v22  ;;  %v563_v27 = vld [vmem:[%s6634_s1 + $0x8e0] sm:$0xff]  ;;  %v704_v22 = vld [vmem:[%s6634_s1 + $0xd48] sm:$0xff] }
  0xfa   : > { %1810 = vmatprep.subr.mxu1 %v571_v15  ;;  %1547 = vmatprep.mubr.f32.mxu0 %v4048_v34  ;;  %v326_v34 = vld [vmem:[%s6634_s1 + $0x178] sm:$0xff]  ;;  %v472_v15 = vld [vmem:[%s6634_s1 + $0x608] sm:$0xff] }
  0xfb   : > { %1700 = vmatpush1.msra.mxu0 %v339_v18  ;;  %1811 = vmatpush1.msra.mxu1 %v570_v25  ;;  %v703_v18 = vld [vmem:[%s6634_s1 + $0xd40] sm:$0xff]  ;;  %v466_v25 = vld [vmem:[%s6634_s1 + $0x5d8] sm:$0xff] }
  0xfc   : > { %1548 = vmatmul.mubr.f32.gmra.mxu0 %v4058_v37  ;;  %1701 = vmatprep.subr.mxu0 %v333_v23  ;;  %v325_v37 = vld [vmem:[%s6634_s1 + $0x170] sm:$0xff] }
  0xfd   : > { %1812 = vmatprep.subr.mxu1 %v564_v43  ;;  %2942 = vmatprep.mubr.msk.f32.mxu1 %vm960_vm1, %v4329_v38  ;;  %v319_v38 = vld [vmem:[%s6634_s1 + $0x140] sm:$0xff]  ;;  %v697_v23 = vld [vmem:[%s6634_s1 + $0xd10] sm:$0xff] }
  0xfe   : > { %1702 = vmatpush1.msra.mxu0 %v332_v20  ;;  %1813 = vmatpush1.msra.mxu1 %v563_v27  ;;  %v465_v43 = vld [vmem:[%s6634_s1 + $0x5d0] sm:$0xff]  ;;  %v696_v20 = vld [vmem:[%s6634_s1 + $0xd08] sm:$0xff]  ;;  %v459_v27 = vld [vmem:[%s6634_s1 + $0x5a0] sm:$0xff] }
  0xff   : > { %1661 = vmatmul.mubr.f32.gmra.mxu1 %v4338_v42  ;;  %1703 = vmatprep.subr.mxu0 %v326_v34  ;;  %v549_v42 = vld [vmem:[%s6634_s1 + $0x870] sm:$0xff]  ;;  %v690_v34 = vld [vmem:[%s6634_s1 + $0xcd8] sm:$0xff] }
 0x100   : > { %1814 = vmatprep.subr.mxu1 %v557_v26  ;;  %1553 = vmatprep.mubr.f32.mxu0 %v4088_v46  ;;  %v312_v46 = vld [vmem:[%s6634_s1 + $0x108] sm:$0xff]  ;;  %v458_v26 = vld [vmem:[%s6634_s1 + $0x598] sm:$0xff] }
 0x101   : > { %1704 = vmatpush1.msra.mxu0 %v325_v37  ;;  %1815 = vmatpush1.msra.mxu1 %v556_v29  ;;  %v452_v37 = vld [vmem:[%s6634_s1 + $0x568] sm:$0xff]  ;;  %v683_v29 = vld [vmem:[%s6634_s1 + $0xca0] sm:$0xff] }
 0x102   : > { %1554 = vmatmul.mubr.f32.gmra.mxu0 %v4098_v49  ;;  %1705 = vmatprep.subr.mxu0 %v319_v38  ;;  %v542_v49 = vld [vmem:[%s6634_s1 + $0x838] sm:$0xff]  ;;  %v451_v38 = vld [vmem:[%s6634_s1 + $0x560] sm:$0xff] }
 0x103   : > { %1816 = vmatprep.subr.mxu1 %v550_v52  ;;  %2943 = vmatprep.mubr.msk.f32.mxu1 %vm960_vm1, %v4362_v58  ;;  %v305_v58 = vld [vmem:[%s6634_s1 + $0xd0] sm:$0xff]  ;;  %v682_v52 = vld [vmem:[%s6634_s1 + $0xc98] sm:$0xff] }
 0x104   : > { %1706 = vmatpush1.msra.mxu0 %v318_v32  ;;  %1817 = vmatpush1.msra.mxu1 %v549_v42  ;;  %v445_v32 = vld [vmem:[%s6634_s1 + $0x530] sm:$0xff]  ;;  %v676_v42 = vld [vmem:[%s6634_s1 + $0xc68] sm:$0xff] }
 0x105   : > { %1667 = vmatmul.mubr.f32.gmra.mxu1 %v4371_v5  ;;  %1707 = vmatprep.subr.mxu0 %v312_v46  ;;  %v304_v5 = vld [vmem:[%s6634_s1 + $0xc8] sm:$0xff] }
 0x106   : > { %1818 = vmatprep.subr.mxu1 %v543_v56  ;;  %1559 = vmatprep.mubr.f32.mxu0 %v4128_v62  ;;  %v298_v62 = vld [vmem:[%s6634_s1 + $0x98] sm:$0xff]  ;;  %v444_v46 = vld [vmem:[%s6634_s1 + $0x528] sm:$0xff]  ;;  %v675_v56 = vld [vmem:[%s6634_s1 + $0xc60] sm:$0xff] }
 0x107   : > { %1708 = vmatpush1.msra.mxu0 %v311_v35  ;;  %1819 = vmatpush1.msra.mxu1 %v542_v49  ;;  %v438_v35 = vld [vmem:[%s6634_s1 + $0x4f8] sm:$0xff]  ;;  %v669_v49 = vld [vmem:[%s6634_s1 + $0xc30] sm:$0xff] }
 0x108   : > { %1560 = vmatmul.mubr.f32.gmra.mxu0 %v4138_v3  ;;  %1709 = vmatprep.subr.mxu0 %v305_v58  ;;  %v297_v3 = vld [vmem:[%s6634_s1 + $0x90] sm:$0xff] }
 0x109   : > { %1820 = vmatprep.subr.mxu1 %v536_v63  ;;  %2944 = vmatprep.mubr.msk.f32.mxu1 %vm960_vm1, %v4395_v24  ;;  %v291_v24 = vld [vmem:[%s6634_s1 + $0x60] sm:$0xff]  ;;  %v437_v58 = vld [vmem:[%s6634_s1 + $0x4f0] sm:$0xff] }
 0x10a   : > { %1710 = vmatpush1.msra.mxu0 %v304_v5  ;;  %1821 = vmatpush1.msra.mxu1 %v535_v39  ;;  %v431_v63 = vld [vmem:[%s6634_s1 + $0x4c0] sm:$0xff]  ;;  %v430_v5 = vld [vmem:[%s6634_s1 + $0x4b8] sm:$0xff]  ;;  %v661_v39 = vld [vmem:[%s6634_s1 + $0xbf0] sm:$0xff] }
 0x10b   : > { %1673 = vmatmul.mubr.f32.gmra.mxu1 %v4404_v60  ;;  %1711 = vmatprep.subr.mxu0 %v298_v62  ;;  %v521_v60 = vld [vmem:[%s6634_s1 + $0x790] sm:$0xff]  ;;  %v424_v62 = vld [vmem:[%s6634_s1 + $0x488] sm:$0xff] }
 0x10c   : > { %1822 = vmatprep.subr.mxu1 %v529_v16  ;;  %1565 = vmatprep.mubr.f32.mxu0 %v4168_v17  ;;  %v1073_v53 = vpop.f32.mrf.mxu0  ;;  %v284_v17 = vld [vmem:[%s6634_s1 + $0x28] sm:$0xff]  ;;  %v655_v16 = vld [vmem:[%s6634_s1 + $0xbc0] sm:$0xff] }
 0x10d   : > { %1712 = vmatpush1.msra.mxu0 %v297_v3  ;;  %1823 = vmatpush1.msra.mxu1 %v528_v19  ;;  %v1074_v59 = vadd.f32 %v1073_v53, %v4882_v12  ;;  %v423_v3 = vld [vmem:[%s6634_s1 + $0x480] sm:$0xff]  ;;  %v648_v53 = vld [vmem:[%s6634_s1 + $0xb88] sm:$0xff] }
 0x10e   : > { %1566 = vmatmul.mubr.f32.gmra.mxu0 %v4178_v21  ;;  %1713 = vmatprep.subr.mxu0 %v291_v24  ;;  %v514_v21 = vld [vmem:[%s6634_s1 + $0x758] sm:$0xff]  ;;  %v5064_v19 = vpop.f32.mrf.mxu0 }
 0x10f   : > { %1824 = vmatprep.subr.mxu1 %v522_v50  ;;  %2945 = vmatprep.mubr.msk.f32.mxu1 %vm960_vm1, %v4428_v45  ;;  %v1186_v33 = vpop.f32.mrf.mxu1  ;;  %v654_v24 = vld [vmem:[%s6634_s1 + $0xbb8] sm:$0xff]  ;;  %v417_v50 = vld [vmem:[%s6634_s1 + $0x450] sm:$0xff] }
 0x110   : > { %1714 = vmatpush1.msra.mxu0 %v290_v55  ;;  %1825 = vmatpush1.msra.mxu1 %v521_v60  ;;  %v4923_v45 = vadd.f32 %v1186_v33, %v1074_v59  ;;  %v416_v55 = vld [vmem:[%s6634_s1 + $0x448] sm:$0xff]  ;;  %v647_v59 = vld [vmem:[%s6634_s1 + $0xb80] sm:$0xff]  ;;  %v641_v33 = vld [vmem:[%s6634_s1 + $0xb50] sm:$0xff] }
 0x111   : > { %1679 = vmatmul.mubr.f32.gmra.mxu1 %v4437_v51  ;;  %1715 = vmatprep.subr.mxu0 %v284_v17  ;;  %v725_v51 = vld [vmem:[%s6634_s1 + $0xdf0] sm:$0xff]  ;;  %v410_v17 = vld [vmem:[%s6634_s1 + $0x418] sm:$0xff] }
 0x112   : > { %1826 = vmatprep.subr.mxu1 %v515_v30  ;;  %1716 = vmatpush1.msra.mxu0 %v283_v28  ;;  %v5084_v30 = vpop.f32.mrf.mxu1 }
 0x113   : > { %1827 = vmatpush1.msra.mxu1 %v514_v21  ;;  %1717 = vmatprep.subr.mxu0 %v501_v61  ;;  %v409_v21 = vld [vmem:[%s6634_s1 + $0x410] sm:$0xff]  ;;  %v640_v61 = vld [vmem:[%s6634_s1 + $0xb48] sm:$0xff] }
 0x114   : > { %1828 = vmatprep.subr.mxu1 %v508_v2  ;;  %1718 = vmatpush2.msra.mxu0 %v500_v9  ;;  %v403_v2 = vld [vmem:[%s6634_s1 + $0x3e0] sm:$0xff] }
 0x115   : > { %1829 = vmatpush1.msra.mxu1 %v507_v1  ;;  %1719 = vmatprep.subr.mxu0 %v494_v44  ;;  %v634_v1 = vld [vmem:[%s6634_s1 + $0xb18] sm:$0xff] }
 0x116   : > { %1830 = vmatprep.subr.mxu1 %v725_v51  ;;  %1720 = vmatpush2.msra.mxu0 %v493_v31  ;;  %v402_v44 = vld [vmem:[%s6634_s1 + $0x3d8] sm:$0xff]  ;;  %v633_v31 = vld [vmem:[%s6634_s1 + $0xb10] sm:$0xff] }
 0x117   : > { %1831 = vmatpush2.msra.mxu1 %v724_v54  ;;  %1721 = vmatprep.subr.mxu0 %v487_v48  ;;  %v396_v54 = vld [vmem:[%s6634_s1 + $0x3a8] sm:$0xff]  ;;  %v627_v48 = vld [vmem:[%s6634_s1 + $0xae0] sm:$0xff] }
 0x118   : > { %1832 = vmatprep.subr.mxu1 %v718_v10  ;;  %1722 = vmatpush2.msra.mxu0 %v486_v11  ;;  %v395_v10 = vld [vmem:[%s6634_s1 + $0x3a0] sm:$0xff]  ;;  %v626_v11 = vld [vmem:[%s6634_s1 + $0xad8] sm:$0xff] }
 0x119   : > { %1833 = vmatpush2.msra.mxu1 %v717_v14  ;;  %1723 = vmatprep.subr.mxu0 %v480_v13  ;;  %v620_v14 = vld [vmem:[%s6634_s1 + $0xaa8] sm:$0xff]  ;;  %v837_v13 = vld [vmem:[%s6634_s1 + $0x1170] sm:$0xff] }
 0x11a   : > { %1834 = vmatprep.subr.mxu1 %v711_v0  ;;  %1724 = vmatpush2.msra.mxu0 %v479_v57  ;;  %v619_v0 = vld [vmem:[%s6634_s1 + $0xaa0] sm:$0xff] }
 0x11b   : > { %1835 = vmatpush2.msra.mxu1 %v710_v40  ;;  %1725 = vmatprep.subr.mxu0 %v473_v6  ;;  %v5134_v40 = vld [vmem:[%s3717_s8 + $0x8] sm:$0xff] }
 0x11c   : > { %1836 = vmatprep.subr.mxu1 %v704_v22  ;;  %1726 = vmatpush2.msra.mxu0 %v472_v15  ;;  %v836_v6 = vld [vmem:[%s6634_s1 + $0x1168] sm:$0xff]  ;;  %v5141_v22 = vld [vmem:[%s3717_s8] sm:$0xff]  ;;  %v830_v15 = vld [vmem:[%s6634_s1 + $0x1138] sm:$0xff] }
 0x11d   : > { %1837 = vmatpush2.msra.mxu1 %v703_v18  ;;  %1727 = vmatprep.subr.mxu0 %v466_v25  ;;  %v829_v18 = vld [vmem:[%s6634_s1 + $0x1130] sm:$0xff]  ;;  %v502_v25 = vld [vmem:[%s6634_s1 + $0x6f8] sm:$0xff] }
 0x11e   : > { %1838 = vmatprep.subr.mxu1 %v697_v23  ;;  %1728 = vmatpush2.msra.mxu0 %v465_v43  ;;  %v823_v23 = vld [vmem:[%s6634_s1 + $0x1100] sm:$0xff]  ;;  %v390_v43 = vld [vmem:[%s6634_s1 + $0x378] sm:$0xff] }
 0x11f   : > { %1839 = vmatpush2.msra.mxu1 %v696_v20  ;;  %1729 = vmatprep.subr.mxu0 %v459_v27  ;;  %v822_v27 = vld [vmem:[%s6634_s1 + $0x10f8] sm:$0xff] }
 0x120   : > { %1840 = vmatprep.subr.mxu1 %v690_v34  ;;  %1730 = vmatpush2.msra.mxu0 %v458_v26  ;;  %v816_v34 = vld [vmem:[%s6634_s1 + $0x10c8] sm:$0xff]  ;;  %v383_v26 = vld [vmem:[%s6634_s1 + $0x340] sm:$0xff] }
 0x121   : > { %1841 = vmatpush2.msra.mxu1 %v689_v4  ;;  %1731 = vmatprep.subr.mxu0 %v452_v37  ;;  %v809_v4 = vld [vmem:[%s6634_s1 + $0x1090] sm:$0xff] }
 0x122   : > { %1842 = vmatprep.subr.mxu1 %v683_v29  ;;  %1732 = vmatpush2.msra.mxu0 %v451_v38  ;;  %v5184_v29 = vld [vmem:[%s3717_s8 + $0x48] sm:$0xff] }
 0x123   : > { %1843 = vmatpush2.msra.mxu1 %v682_v52  ;;  %1733 = vmatprep.subr.mxu0 %v445_v32  ;;  %v488_v38 = vld [vmem:[%s6634_s1 + $0x688] sm:$0xff] }
 0x124   : > { %1844 = vmatprep.subr.mxu1 %v676_v42  ;;  %1734 = vmatpush2.msra.mxu0 %v444_v46  ;;  %v808_v52 = vld [vmem:[%s6634_s1 + $0x1088] sm:$0xff]  ;;  %v802_v42 = vld [vmem:[%s6634_s1 + $0x1058] sm:$0xff]  ;;  %v5200_v46 = vld [vmem:[%s3717_s8 + $0x40] sm:$0xff] }
 0x125   : > { %1845 = vmatpush2.msra.mxu1 %v675_v56  ;;  %1735 = vmatprep.subr.mxu0 %v438_v35  ;;  %v376_v32 = vld [vmem:[%s6634_s1 + $0x308] sm:$0xff]  ;;  %v481_v56 = vld [vmem:[%s6634_s1 + $0x650] sm:$0xff] }
 0x126   : > { %1846 = vmatprep.subr.mxu1 %v669_v49  ;;  %1736 = vmatpush2.msra.mxu0 %v437_v58  ;;  %v801_v35 = vld [vmem:[%s6634_s1 + $0x1050] sm:$0xff] }
 0x127   : > { %1847 = vmatpush2.msra.mxu1 %v668_v36  ;;  %1737 = vmatprep.subr.mxu0 %v431_v63  ;;  %v369_v49 = vld [vmem:[%s6634_s1 + $0x2d0] sm:$0xff]  ;;  %v795_v36 = vld [vmem:[%s6634_s1 + $0x1020] sm:$0xff]  ;;  %v5218_v63 = vld [vmem:[%s3717_s8 + $0x78] sm:$0xff] }
 0x128   : > { %1848 = vmatprep.subr.mxu1 %v662_v8  ;;  %1738 = vmatpush2.msra.mxu0 %v430_v5  ;;  %v474_v8 = vld [vmem:[%s6634_s1 + $0x618] sm:$0xff] }
 0x129   : > { %1849 = vmatpush2.msra.mxu1 %v661_v39  ;;  %1739 = vmatprep.subr.mxu0 %v424_v62  ;;  %v1079_v60 = vpop.f32.mrf.mxu0  ;;  %v794_v5 = vld [vmem:[%s6634_s1 + $0x1018] sm:$0xff]  ;;  %v788_v62 = vld [vmem:[%s6634_s1 + $0xfe8] sm:$0xff] }
 0x12a   : > { %1850 = vmatprep.subr.mxu1 %v655_v16  ;;  %1740 = vmatpush2.msra.mxu0 %v423_v3  ;;  %v1080_v28 = vadd.f32 %v1079_v60, %v4882_v12  ;;  %v362_v39 = vld [vmem:[%s6634_s1 + $0x298] sm:$0xff]  ;;  %v5234_v16 = vld [vmem:[%s3717_s8 + $0x70] sm:$0xff]  ;;  %v467_v3 = vld [vmem:[%s6634_s1 + $0x5e0] sm:$0xff] }
 0x12b   : > { %1851 = vmatpush2.msra.mxu1 %v654_v24  ;;  %1741 = vmatprep.subr.mxu0 %v417_v50  ;;  %v5131_v57 = vpop.f32.mrf.mxu0  ;;  %v787_v50 = vld [vmem:[%s6634_s1 + $0xfe0] sm:$0xff]  ;;  %v5252_v60 = vld [vmem:[%s3717_s8 + $0xa8] sm:$0xff] }
 0x12c   : > { %1852 = vmatprep.subr.mxu1 %v648_v53  ;;  %1742 = vmatpush2.msra.mxu0 %v416_v55  ;;  %v1192_v9 = vpop.f32.mrf.mxu1  ;;  %v355_v53 = vld [vmem:[%s6634_s1 + $0x260] sm:$0xff]  ;;  %v781_v55 = vld [vmem:[%s6634_s1 + $0xfb0] sm:$0xff] }
 0x12d   : > { %1853 = vmatpush2.msra.mxu1 %v647_v59  ;;  %1743 = vmatprep.subr.mxu0 %v410_v17  ;;  %v5105_v51 = vadd.f32 %v1192_v9, %v1080_v28  ;;  %v460_v59 = vld [vmem:[%s6634_s1 + $0x5a8] sm:$0xff]  ;;  %v773_v9 = vld [vmem:[%s6634_s1 + $0xf70] sm:$0xff] }
 0x12e   : > { %1854 = vmatprep.subr.mxu1 %v641_v33  ;;  %1744 = vmatpush2.msra.mxu0 %v409_v21  ;;  %v780_v17 = vld [vmem:[%s6634_s1 + $0xfa8] sm:$0xff]  ;;  %v774_v33 = vld [vmem:[%s6634_s1 + $0xf78] sm:$0xff] }
 0x12f   : > { %6659 = vst [vmem:[#allocation2_spill] sm:$0xff] %v5105_v51  ;;  %1855 = vmatpush2.msra.mxu1 %v640_v61  ;;  %1745 = vmatprep.subr.mxu0 %v403_v2  ;;  %v5160_v20 = vpop.f32.mrf.mxu0  ;;  %v348_v28 = vld [vmem:[%s6634_s1 + $0x228] sm:$0xff]  ;;  %v5270_v61 = vld [vmem:[%s3717_s8 + $0xa0] sm:$0xff]  ;;  %v453_v2 = vld [vmem:[%s6634_s1 + $0x570] sm:$0xff] }
 0x130   : > { %1856 = vmatprep.subr.mxu1 %v634_v1  ;;  %1746 = vmatpush2.msra.mxu0 %v402_v44  ;;  %v341_v1 = vld [vmem:[%s6634_s1 + $0x1f0] sm:$0xff]  ;;  %v767_v44 = vld [vmem:[%s6634_s1 + $0xf40] sm:$0xff] }
 0x131   : > { %1857 = vmatpush2.msra.mxu1 %v633_v31  ;;  %1747 = vmatprep.subr.mxu0 %v396_v54  ;;  %v5181_v37 = vpop.f32.mrf.mxu0  ;;  %v5285_v31 = vpop.f32.mrf.mxu1  ;;  %v5288_v54 = vld [vmem:[%s3717_s8 + $0xd8] sm:$0xff]  ;;  %v663_v51 = vld [vmem:[%s6634_s1 + $0xc00] sm:$0xff] }
 0x132   : > { %1858 = vmatprep.subr.mxu1 %v627_v48  ;;  %1748 = vmatpush2.msra.mxu0 %v395_v10  ;;  %v446_v48 = vld [vmem:[%s6634_s1 + $0x538] sm:$0xff] }
 0x133   : > { %1749 = vmatprep.mubr.f32.mxu0 %v5134_v40  ;;  %1859 = vmatpush2.msra.mxu1 %v626_v11  ;;  %v766_v10 = vld [vmem:[%s6634_s1 + $0xf38] sm:$0xff] }
 0x134   : > { %1750 = vmatmul.mubr.f32.vlgmr.msra.gmra.mxu0 %v5141_v22  ;;  %1860 = vmatprep.subr.mxu1 %v620_v14  ;;  %v334_v14 = vld [vmem:[%s6634_s1 + $0x1b8] sm:$0xff] }
 0x135   : > { %1911 = vmatprep.subr.mxu0 %v837_v13  ;;  %1861 = vmatpush2.msra.mxu1 %v619_v0  ;;  %v5212_v58 = vpop.f32.mrf.mxu0  ;;  %v760_v13 = vld [vmem:[%s6634_s1 + $0xf08] sm:$0xff]  ;;  %v5306_v0 = vld [vmem:[%s3717_s8 + $0xd0] sm:$0xff] }
 0x136   : > { %1862 = vmatprep.mubr.f32.mxu1 %v4684_v41  ;;  %1912 = vmatpush1.msra.mxu0 %v836_v6  ;;  %v495_v41 = vld [vmem:[%s6634_s1 + $0x6c0] sm:$0xff] }
 0x137   : > { %1863 = vmatmul.mubr.f32.vlgmr.msra.gmra.mxu1 %v4691_v47  ;;  %1913 = vmatprep.subr.mxu0 %v830_v15  ;;  %v815_v47 = vld [vmem:[%s6634_s1 + $0x10c0] sm:$0xff]  ;;  %v5240_v24 = vpop.f32.mrf.mxu0 }
 0x138   : > { %1914 = vmatpush1.msra.mxu0 %v829_v18  ;;  %2970 = vmatprep.subr.mxu1 %v502_v25  ;;  %v439_v6 = vld [vmem:[%s6634_s1 + $0x500] sm:$0xff]  ;;  %v5318_v25 = vpop.f32.mrf.mxu1 }
 0x139   : > { %1915 = vmatprep.subr.mxu0 %v823_v23  ;;  %2971 = vmatpush3.msra.mxu1 %v390_v43  ;;  %v759_v15 = vld [vmem:[%s6634_s1 + $0xf00] sm:$0xff]  ;;  %v753_v23 = vld [vmem:[%s6634_s1 + $0xed0] sm:$0xff] }
 0x13a   : > { %1916 = vmatpush1.msra.mxu0 %v822_v27  ;;  %2972 = vmatprep.subr.mxu1 %v495_v41  ;;  %v327_v18 = vld [vmem:[%s6634_s1 + $0x180] sm:$0xff]  ;;  %v5326_v27 = vld [vmem:[%s3717_s8 + $0x108] sm:$0xff] }
 0x13b   : > { %1917 = vmatprep.subr.mxu0 %v816_v34  ;;  %1868 = vmatprep.mubr.f32.mxu1 %v5184_v29  ;;  %v5267_v21 = vpop.f32.mrf.mxu0  ;;  %v432_v41 = vld [vmem:[%s6634_s1 + $0x4c8] sm:$0xff] }
 0x13c   : > { %1918 = vmatpush1.msra.mxu0 %v815_v47  ;;  %2973 = vmatpush3.msra.mxu1 %v383_v26  ;;  %v752_v34 = vld [vmem:[%s6634_s1 + $0xec8] sm:$0xff]  ;;  %v5339_v26 = vld [vmem:[%s3717_s8 + $0x100] sm:$0xff] }
 0x13d   : > { %1869 = vmatmul.mubr.f32.gmra.mxu1 %v5200_v46  ;;  %1919 = vmatprep.subr.mxu0 %v809_v4  ;;  %v5297_v11 = vpop.f32.mrf.mxu0  ;;  %v320_v47 = vld [vmem:[%s6634_s1 + $0x148] sm:$0xff]  ;;  %v746_v4 = vld [vmem:[%s6634_s1 + $0xe98] sm:$0xff] }
 0x13e   : > { %2974 = vmatprep.subr.mxu1 %v488_v38  ;;  %1920 = vmatpush1.msra.mxu0 %v808_v52  ;;  %v425_v38 = vld [vmem:[%s6634_s1 + $0x490] sm:$0xff]  ;;  %v5348_v52 = vpop.f32.mrf.mxu1 }
 0x13f   : > { %2975 = vmatpush3.msra.mxu1 %v376_v32  ;;  %1921 = vmatprep.subr.mxu0 %v802_v42  ;;  %v5353_v42 = vld [vmem:[%s3717_s8 + $0x38] sm:$0xff] }
 0x140   : > { %2976 = vmatprep.subr.mxu1 %v481_v56  ;;  %1874 = vmatprep.mubr.f32.mxu1 %v5218_v63  ;;  %v745_v56 = vld [vmem:[%s6634_s1 + $0xe90] sm:$0xff] }
 0x141   : > { %1922 = vmatpush1.msra.mxu0 %v801_v35  ;;  %2977 = vmatpush3.msra.mxu1 %v369_v49  ;;  %v5323_v43 = vpop.f32.mrf.mxu0  ;;  %v313_v35 = vld [vmem:[%s6634_s1 + $0x110] sm:$0xff]  ;;  %v739_v49 = vld [vmem:[%s6634_s1 + $0xe60] sm:$0xff] }
 0x142   : > { %1875 = vmatmul.mubr.f32.gmra.mxu1 %v5234_v16  ;;  %1923 = vmatprep.subr.mxu0 %v795_v36  ;;  %v5366_v36 = vld [vmem:[%s3717_s8 + $0x30] sm:$0xff] }
 0x143   : > { %2978 = vmatprep.subr.mxu1 %v474_v8  ;;  %1924 = vmatpush1.msra.mxu0 %v794_v5  ;;  %v5350_v32 = vpop.f32.mrf.mxu0  ;;  %v5370_v8 = vld [vmem:[%s3717_s8 + $0x138] sm:$0xff] }
 0x144   : > { %2979 = vmatpush3.msra.mxu1 %v362_v39  ;;  %1925 = vmatprep.subr.mxu0 %v788_v62  ;;  %v418_v5 = vld [vmem:[%s6634_s1 + $0x458] sm:$0xff]  ;;  %v5379_v62 = vpop.f32.mrf.mxu1 }
 0x145   : > { %2980 = vmatprep.subr.mxu1 %v467_v3  ;;  %1880 = vmatprep.mubr.f32.mxu1 %v5252_v60  ;;  %v738_v39 = vld [vmem:[%s6634_s1 + $0xe58] sm:$0xff] }
 0x146   : > { %1926 = vmatpush1.msra.mxu0 %v787_v50  ;;  %2981 = vmatpush3.msra.mxu1 %v355_v53  ;;  %v306_v3 = vld [vmem:[%s6634_s1 + $0xd8] sm:$0xff]  ;;  %v5387_v53 = vld [vmem:[%s3717_s8 + $0x130] sm:$0xff] }
 0x147   : > { %1881 = vmatmul.mubr.f32.gmra.mxu1 %v5270_v61  ;;  %1927 = vmatprep.subr.mxu0 %v781_v55  ;;  %v5384_v50 = vpop.f32.mrf.mxu0  ;;  %6660 = vst [vmem:[#allocation3_spill] sm:$0xff] %v5387_v53  ;;  %v732_v55 = vld [vmem:[%s6634_s1 + $0xe28] sm:$0xff] }
 0x148   : > { %2982 = vmatprep.subr.mxu1 %v460_v59  ;;  %1928 = vmatpush1.msra.mxu0 %v780_v17  ;;  %v411_v59 = vld [vmem:[%s6634_s1 + $0x420] sm:$0xff]  ;;  %v5397_v17 = vld [vmem:[%s3717_s8 + $0x68] sm:$0xff] }
 0x149   : > { %2983 = vmatpush3.msra.mxu1 %v348_v28  ;;  %1929 = vmatprep.subr.mxu0 %v774_v33  ;;  %v731_v28 = vld [vmem:[%s6634_s1 + $0xe20] sm:$0xff] }
 0x14a   : > { %2984 = vmatprep.subr.mxu1 %v453_v2  ;;  %1886 = vmatprep.mubr.f32.mxu1 %v5288_v54  ;;  %v299_v33 = vld [vmem:[%s6634_s1 + $0xa0] sm:$0xff]  ;;  %v5406_v2 = vpop.f32.mrf.mxu1 }
 0x14b   : > { %1930 = vmatpush1.msra.mxu0 %v773_v9  ;;  %2985 = vmatpush3.msra.mxu1 %v341_v1  ;;  %v921_v9 = vld [vmem:[%s6634_s1 + $0x1410] sm:$0x1]  ;;  %v5411_v1 = vpop.f32.mrf.mxu0 }
 0x14c   : > { %1887 = vmatmul.mubr.f32.gmra.mxu1 %v5306_v0  ;;  %1931 = vmatprep.subr.mxu0 %v767_v44  ;;  %v5414_v44 = vld [vmem:[%s3717_s8 + $0x60] sm:$0xff] }
 0x14d   : > { %2986 = vmatprep.subr.mxu1 %v446_v48  ;;  %1932 = vmatpush1.msra.mxu0 %v766_v10  ;;  %v5418_v48 = vld [vmem:[%s3717_s8 + $0x168] sm:$0xff] }
 0x14e   : > { %2987 = vmatpush3.msra.mxu1 %v334_v14  ;;  %1933 = vmatprep.subr.mxu0 %v760_v13  ;;  %6661 = vst [vmem:[#allocation4_spill] sm:$0xff] %v5418_v48  ;;  %v404_v10 = vld [vmem:[%s6634_s1 + $0x3e8] sm:$0xff] }
 0x14f   : > { %2988 = vmatprep.subr.mxu1 %v439_v6  ;;  %1892 = vmatprep.mubr.f32.mxu1 %v5326_v27  ;;  %v920_v14 = vld [vmem:[%s6634_s1 + $0x1408] sm:$0x1]  ;;  %v5431_v6 = vld [vmem:[%s3717_s8 + $0x160] sm:$0xff] }
 0x150   : > { %1934 = vmatpush1.msra.mxu0 %v759_v15  ;;  %2989 = vmatpush3.msra.mxu1 %v327_v18  ;;  %v292_v13 = vld [vmem:[%s6634_s1 + $0x68] sm:$0xff]  ;;  %6662 = vst [vmem:[#allocation5_spill] sm:$0xff] %v5431_v6  ;;  %v914_v15 = vld [vmem:[%s6634_s1 + $0x13d8] sm:$0xff]  ;;  %v397_v18 = vld [vmem:[%s6634_s1 + $0x3b0] sm:$0xff] }
 0x151   : > { %1893 = vmatmul.mubr.f32.gmra.mxu1 %v5339_v26  ;;  %1935 = vmatprep.subr.mxu0 %v753_v23  ;;  %v5441_v23 = vpop.f32.mrf.mxu1 }
 0x152   : > { %2990 = vmatprep.subr.mxu1 %v432_v41  ;;  %1936 = vmatpush1.msra.mxu0 %v752_v34  ;;  %v285_v41 = vld [vmem:[%s6634_s1 + $0x30] sm:$0xff]  ;;  %v5447_v34 = vpop.f32.mrf.mxu0 }
 0x153   : > { %2991 = vmatpush3.msra.mxu1 %v320_v47  ;;  %1755 = vmatprep.mubr.f32.mxu0 %v5353_v42  ;;  %v5450_v47 = vld [vmem:[%s3717_s8 + $0x98] sm:$0xff] }
 0x154   : > { %1937 = vmatprep.subr.mxu0 %v746_v4  ;;  %2992 = vmatprep.subr.mxu1 %v425_v38  ;;  %v913_v4 = vld [vmem:[%s6634_s1 + $0x13d0] sm:$0xff]  ;;  %v907_v38 = vld [vmem:[%s6634_s1 + $0x13a0] sm:$0xff] }
 0x155   : > { %1756 = vmatmul.mubr.f32.gmra.mxu0 %v5366_v36  ;;  %1898 = vmatprep.mubr.f32.mxu1 %v5370_v8 }
 0x156   : > { %1938 = vmatpush1.msra.mxu0 %v745_v56  ;;  %2993 = vmatpush3.msra.mxu1 %v313_v35  ;;  %v5460_v56 = vld [vmem:[%s3717_s8 + $0x90] sm:$0xff]  ;;  %v726_v35 = vld [vmem:[%s6634_s1 + $0xdf8] sm:$0xff] }
 0x157   : > { %1899 = vmatmul.mubr.f32.gmra.mxu1 %v5387_v53  ;;  %1939 = vmatprep.subr.mxu0 %v739_v49  ;;  %v906_v49 = vld [vmem:[%s6634_s1 + $0x1398] sm:$0xff]  ;;  %v5658_v53 = vld [vmem:[%s3717_s8 + $0x28] sm:$0xff] }
 0x158   : > { %2994 = vmatprep.subr.mxu1 %v418_v5  ;;  %1940 = vmatpush1.msra.mxu0 %v738_v39  ;;  %v5469_v5 = vpop.f32.mrf.mxu1  ;;  %v614_v39 = vld [vmem:[%s6634_s1 + $0xa78] sm:$0xff]  ;;  %6665 = vst [vmem:[#allocation8_spill] sm:$0xff] %v5658_v53 }
 0x159   : > { %2995 = vmatpush3.msra.mxu1 %v306_v3  ;;  %1761 = vmatprep.mubr.f32.mxu0 %v5397_v17  ;;  %v5475_v3 = vpop.f32.mrf.mxu0 }
 0x15a   : > { %1941 = vmatprep.subr.mxu0 %v732_v55  ;;  %2996 = vmatprep.subr.mxu1 %v411_v59  ;;  %v900_v55 = vld [vmem:[%s6634_s1 + $0x1368] sm:$0xff]  ;;  %v719_v59 = vld [vmem:[%s6634_s1 + $0xdc0] sm:$0xff] }
 0x15b   : > { %1762 = vmatmul.mubr.f32.gmra.mxu0 %v5414_v44  ;;  %1904 = vmatprep.mubr.f32.mxu1 %v5418_v48 }
 0x15c   : > { %1942 = vmatpush1.msra.mxu0 %v731_v28  ;;  %2997 = vmatpush3.msra.mxu1 %v299_v33  ;;  %v899_v28 = vld [vmem:[%s6634_s1 + $0x1360] sm:$0xff]  ;;  %v5494_v33 = vpop.f32.mrf.mxu1 }
 0x15d   : > { %1905 = vmatmul.mubr.f32.gmra.mxu1 %v5431_v6  ;;  %2946 = vmatprep.subr.msk.mxu0 %vm985_vm0, %v921_v9  ;;  %v893_v9 = vld [vmem:[%s6634_s1 + $0x1330] sm:$0xff]  ;;  %v850_v6 = vld [vmem:[%s6634_s1 + $0x11d8] sm:$0xff] }
 0x15e   : > { %2998 = vmatprep.subr.mxu1 %v404_v10  ;;  %2947 = vmatpush2.msk.msra.mxu0 %vm985_vm0, %v920_v14  ;;  %v5499_v10 = vpop.f32.mrf.mxu0  ;;  %v5502_v14 = vld [vmem:[%s3717_s8 + $0xc0] sm:$0xff] }
 0x15f   : > { %2999 = vmatpush3.msra.mxu1 %v292_v13  ;;  %1767 = vmatprep.mubr.f32.mxu0 %v5450_v47  ;;  %v712_v13 = vld [vmem:[%s6634_s1 + $0xd88] sm:$0xff] }
 0x160   : > { %1953 = vmatprep.subr.mxu0 %v914_v15  ;;  %3000 = vmatprep.subr.mxu1 %v397_v18  ;;  %v892_v15 = vld [vmem:[%s6634_s1 + $0x1328] sm:$0xff] }
 0x161   : > { %1768 = vmatmul.mubr.f32.gmra.mxu0 %v5460_v56  ;;  %3001 = vmatpush3.msra.mxu1 %v285_v41  ;;  %v600_v18 = vld [vmem:[%s6634_s1 + $0xa08] sm:$0xff]  ;;  %v705_v41 = vld [vmem:[%s6634_s1 + $0xd50] sm:$0xff] }
 0x162   : > { %1954 = vmatpush2.msra.mxu0 %v913_v4  ;;  %2088 = vmatprep.mubr.f32.mxu1 %v5134_v40  ;;  %v5485_v40 = vld [vmem:[%s3717_s8 + $0xc8] sm:$0xff]  ;;  %v5522_v4 = vpop.f32.mrf.mxu1 }
 0x163   : > { %1955 = vmatprep.subr.mxu0 %v907_v38  ;;  %2089 = vmatmul.mubr.f32.vlgmr.msra.gmra.mxu1 %v5141_v22  ;;  %v607_v22 = vld [vmem:[%s6634_s1 + $0xa40] sm:$0xff]  ;;  %v5524_v38 = vpop.f32.mrf.mxu0 }
 0x164   : > { %3026 = vmatprep.subr.mxu1 %v726_v35  ;;  %1956 = vmatpush2.msra.mxu0 %v906_v49  ;;  %v5527_v35 = vld [vmem:[%s3717_s8 + $0xf8] sm:$0xff]  ;;  %v593_v49 = vld [vmem:[%s6634_s1 + $0x9d0] sm:$0xff] }
 0x165   : > { %3027 = vmatpush3.msra.mxu1 %v614_v39  ;;  %1773 = vmatprep.mubr.f32.mxu0 %v5485_v40  ;;  %v879_v39 = vld [vmem:[%s6634_s1 + $0x12c0] sm:$0xff] }
 0x166   : > { %1957 = vmatprep.subr.mxu0 %v900_v55  ;;  %3028 = vmatprep.subr.mxu1 %v719_v59  ;;  %v5540_v55 = vld [vmem:[%s3717_s8 + $0xf0] sm:$0xff]  ;;  %v698_v59 = vld [vmem:[%s6634_s1 + $0xd18] sm:$0xff] }
 0x167   : > { %1774 = vmatmul.mubr.f32.gmra.mxu0 %v5502_v14  ;;  %2093 = vmatprep.mubr.f32.mxu1 %v5353_v42  ;;  %v886_v42 = vld [vmem:[%s6634_s1 + $0x12f8] sm:$0xff] }
 0x168   : > { %1958 = vmatpush2.msra.mxu0 %v899_v28  ;;  %3029 = vmatpush3.msra.mxu1 %v607_v22  ;;  %v878_v28 = vld [vmem:[%s6634_s1 + $0x12b8] sm:$0xff]  ;;  %v5550_v22 = vpop.f32.mrf.mxu1 }
 0x169   : > { %1959 = vmatprep.subr.mxu0 %v893_v9  ;;  %2094 = vmatmul.mubr.f32.gmra.mxu1 %v5366_v36  ;;  %v885_v36 = vld [vmem:[%s6634_s1 + $0x12f0] sm:$0xff]  ;;  %v586_v9 = vld [vmem:[%s6634_s1 + $0x998] sm:$0xff] }
 0x16a   : > { %3030 = vmatprep.subr.mxu1 %v712_v13  ;;  %1960 = vmatpush2.msra.mxu0 %v892_v15  ;;  %v5555_v13 = vpop.f32.mrf.mxu0  ;;  %v691_v15 = vld [vmem:[%s6634_s1 + $0xce0] sm:$0xff] }
 0x16b   : > { %3031 = vmatpush3.msra.mxu1 %v600_v18  ;;  %1779 = vmatprep.mubr.f32.mxu0 %v5527_v35  ;;  %6663 = vst [vmem:[#allocation6_spill] sm:$0xff] %v5555_v13  ;;  %v5565_v18 = vld [vmem:[%s3717_s8 + $0x128] sm:$0xff] }
 0x16c   : > { %1961 = vmatprep.subr.mxu0 %v886_v42  ;;  %3032 = vmatprep.subr.mxu1 %v705_v41  ;;  %v871_v42 = vld [vmem:[%s6634_s1 + $0x1280] sm:$0xff]  ;;  %v5574_v41 = vpop.f32.mrf.mxu1 }
 0x16d   : > { %1780 = vmatmul.mubr.f32.gmra.mxu0 %v5540_v55  ;;  %2098 = vmatprep.mubr.f32.mxu1 %v5397_v17  ;;  %v872_v17 = vld [vmem:[%s6634_s1 + $0x1288] sm:$0xff] }
 0x16e   : > { %1962 = vmatpush2.msra.mxu0 %v885_v36  ;;  %3033 = vmatpush3.msra.mxu1 %v593_v49  ;;  %v865_v36 = vld [vmem:[%s6634_s1 + $0x1250] sm:$0xff]  ;;  %v5579_v49 = vpop.f32.mrf.mxu0 }
 0x16f   : > { %1963 = vmatprep.subr.mxu0 %v879_v39  ;;  %2099 = vmatmul.mubr.f32.gmra.mxu1 %v5414_v44  ;;  %v579_v44 = vld [vmem:[%s6634_s1 + $0x960] sm:$0xff] }
 0x170   : > { %3034 = vmatprep.subr.mxu1 %v698_v59  ;;  %1964 = vmatpush2.msra.mxu0 %v878_v28  ;;  %v5582_v39 = vld [vmem:[%s3717_s8 + $0x120] sm:$0xff]  ;;  %v684_v59 = vld [vmem:[%s6634_s1 + $0xca8] sm:$0xff] }
 0x171   : > { %3035 = vmatpush3.msra.mxu1 %v586_v9  ;;  %1785 = vmatprep.mubr.f32.mxu0 %v5565_v18  ;;  %v864_v28 = vld [vmem:[%s6634_s1 + $0x1248] sm:$0xff] }
 0x172   : > { %1965 = vmatprep.subr.mxu0 %v872_v17  ;;  %3036 = vmatprep.subr.mxu1 %v691_v15  ;;  %v572_v9 = vld [vmem:[%s6634_s1 + $0x928] sm:$0xff]  ;;  %v677_v17 = vld [vmem:[%s6634_s1 + $0xc70] sm:$0xff]  ;;  %v5602_v15 = vpop.f32.mrf.mxu1 }
 0x173   : > { %1786 = vmatmul.mubr.f32.gmra.mxu0 %v5582_v39  ;;  %2103 = vmatprep.mubr.f32.mxu1 %v5450_v47  ;;  %v858_v47 = vld [vmem:[%s6634_s1 + $0x1218] sm:$0xff] }
 0x174   : > { %1966 = vmatpush2.msra.mxu0 %v871_v42  ;;  %3037 = vmatpush3.msra.mxu1 %v579_v44  ;;  %v5604_v42 = vpop.f32.mrf.mxu0  ;;  %v5607_v44 = vld [vmem:[%s3717_s8 + $0x158] sm:$0xff] }
 0x175   : > { %1967 = vmatprep.subr.mxu0 %v865_v36  ;;  %2104 = vmatmul.mubr.f32.gmra.mxu1 %v5460_v56  ;;  %v857_v56 = vld [vmem:[%s6634_s1 + $0x1210] sm:$0xff] }
 0x176   : > { %3038 = vmatprep.subr.mxu1 %v684_v59  ;;  %1968 = vmatpush2.msra.mxu0 %v864_v28  ;;  %v565_v36 = vld [vmem:[%s6634_s1 + $0x8f0] sm:$0xff]  ;;  %v851_v59 = vld [vmem:[%s6634_s1 + $0x11e0] sm:$0xff]  ;;  %v5638_v13 = vpop.f32.mrf.mxu0 }
 0x177   : > { %3039 = vmatpush3.msra.mxu1 %v572_v9  ;;  %1791 = vmatprep.mubr.f32.mxu0 %v5607_v44  ;;  %v5620_v28 = vld [vmem:[%s3717_s8 + $0x150] sm:$0xff]  ;;  %v670_v9 = vld [vmem:[%s6634_s1 + $0xc38] sm:$0xff] }
 0x178   : > { %1969 = vmatprep.subr.mxu0 %v858_v47  ;;  %3040 = vmatprep.subr.mxu1 %v677_v17  ;;  %v5630_v47 = vpop.f32.mrf.mxu1  ;;  %v558_v17 = vld [vmem:[%s6634_s1 + $0x8b8] sm:$0xff]  ;;  %v5655_v48 = vpop.f32.mrf.mxu0 }
 0x179   : > { %1792 = vmatmul.mubr.f32.gmra.mxu0 %v5620_v28  ;;  %2108 = vmatprep.mubr.f32.mxu1 %v5485_v40  ;;  %v844_v40 = vld [vmem:[%s6634_s1 + $0x11a8] sm:$0xff] }
 0x17a   : > { %1970 = vmatpush2.msra.mxu0 %v857_v56  ;;  %3041 = vmatpush3.msra.mxu1 %v565_v36  ;;  %v843_v56 = vld [vmem:[%s6634_s1 + $0x11a0] sm:$0xff]  ;;  %v5647_v36 = vpop.f32.mrf.mxu1 }
 0x17b   : > { %1971 = vmatprep.subr.mxu0 %v851_v59  ;;  %2109 = vmatmul.mubr.f32.gmra.mxu1 %v5502_v14  ;;  %6664 = vst [vmem:[#allocation7_spill] sm:$0xff] %v5647_v36  ;;  %v551_v59 = vld [vmem:[%s6634_s1 + $0x880] sm:$0xff]  ;;  %v656_v14 = vld [vmem:[%s6634_s1 + $0xbc8] sm:$0xff] }
 0x17c   : > { %3042 = vmatprep.subr.mxu1 %v670_v9  ;;  %1972 = vmatpush2.msra.mxu0 %v850_v6  ;;  %v544_v6 = vld [vmem:[%s6634_s1 + $0x848] sm:$0xff]  ;;  %v5666_v9 = vpop.f32.mrf.mxu1 }
 0x17d   : > { %3043 = vmatpush3.msra.mxu1 %v558_v17  ;;  %1973 = vmatprep.subr.mxu0 %v844_v40  ;;  %6666 = vst [vmem:[#allocation9_spill] sm:$0xff] %v5666_v9  ;;  %v838_v17 = vld [vmem:[%s6634_s1 + $0x1178] sm:$0xff]  ;;  %v6643_v40 = vmov 0.0  }
 0x17e   : > { %3044 = vmatprep.subr.mxu1 %v663_v51  ;;  %1974 = vmatpush2.msra.mxu0 %v843_v56  ;;  %v5669_v51 = vld [vmem:[%s3717_s8 + $0x20] sm:$0xff]  ;;  %v537_v56 = vld [vmem:[%s6634_s1 + $0x810] sm:$0xff] }
 0x17f   : > { %2948 = vmatprep.mubr.msk.f32.mxu0 %vm960_vm1, %v5658_v53  ;;  %2113 = vmatprep.mubr.f32.mxu1 %v5527_v35  ;;  %6667 = vst [vmem:[#allocation10_spill] sm:$0xff] %v5669_v51  ;;  %v649_v35 = vld [vmem:[%s6634_s1 + $0xb90] sm:$0xff] }
 0x180   : > { %3045 = vmatpush3.msra.mxu1 %v551_v59  ;;  %1976 = vmatmul.mubr.f32.vlgmr.msra.gmra.mxu0 %v5669_v51  ;;  %v5683_v59 = vpop.f32.mrf.mxu0  ;;  %v831_v51 = vld [vmem:[%s6634_s1 + $0x1140] sm:$0xff] }
 0x181   : > { %2114 = vmatmul.mubr.f32.gmra.mxu1 %v5540_v55  ;;  %3046 = vmatprep.subr.mxu1 %v656_v14  ;;  %v5692_v55 = vld [vmem:[%s3717_s8 + $0x58] sm:$0xff] }
 0x182   : > { %2234 = vmatprep.subr.mxu0 %v6643_v40  ;;  %3047 = vmatpush3.msra.mxu1 %v544_v6  ;;  %6669 = vst [vmem:[#allocation12_spill] sm:$0xff] %v5692_v55  ;;  %v642_v14 = vld [vmem:[%s6634_s1 + $0xb58] sm:$0xff] }
 0x183   : > { %2235 = vmatpush1.msra.mxu0 %v838_v17  ;;  %3048 = vmatprep.subr.mxu1 %v649_v35  ;;  %v5688_v36 = vpop.f32.mrf.mxu1  ;;  %v530_v6 = vld [vmem:[%s6634_s1 + $0x7d8] sm:$0xff]  ;;  %v824_v35 = vld [vmem:[%s6634_s1 + $0x1108] sm:$0xff] }
 0x184   : > { %6668 = vst [vmem:[#allocation11_spill] sm:$0xff] %v5688_v36  ;;  %2236 = vmatprep.subr.mxu0 %v6643_v40  ;;  %2949 = vmatprep.mubr.msk.f32.mxu0 %vm960_vm1, %v5692_v55  ;;  %v635_v40 = vld [vmem:[%s6634_s1 + $0xb20] sm:$0xff]  ;;  %v6672_v55 = vmov 0.0  }
 0x185   : > { %2118 = vmatprep.mubr.f32.mxu1 %v5565_v18  ;;  %3049 = vmatpush3.msra.mxu1 %v537_v56  ;;  %v5703_v17 = vpop.f32.mrf.mxu1  ;;  %v5712_v18 = vpop.f32.mrf.mxu0  ;;  %v5715_v56 = vld [vmem:[%s3717_s8 + $0x50] sm:$0xff]  ;;  %v5752_v36 = vld [vmem:[%s3717_s8 + $0x80] sm:$0xff] }
 0x186   : > { %6670 = vst [vmem:[#allocation13_spill] sm:$0xff] %v5703_v17  ;;  %2237 = vmatpush1.msra.mxu0 %v831_v51  ;;  %2119 = vmatmul.mubr.f32.gmra.mxu1 %v5582_v39  ;;  %6671 = vst [vmem:[#allocation14_spill] sm:$0xff] %v5715_v56  ;;  %v523_v39 = vld [vmem:[%s6634_s1 + $0x7a0] sm:$0xff]  ;;  %v817_v17 = vld [vmem:[%s6634_s1 + $0x10d0] sm:$0xff] }
 0x187   : > { %1982 = vmatmul.mubr.f32.gmra.mxu0 %v5715_v56  ;;  %3050 = vmatprep.subr.mxu1 %v642_v14  ;;  %v5729_v56 = vld [vmem:[%s3717_s8 + $0x88] sm:$0xff]  ;;  %6676 = vst [vmem:[#allocation18_spill] sm:$0xff] %v5752_v36 }
 0x188   : > { %2238 = vmatprep.subr.mxu0 %v6672_v55  ;;  %3051 = vmatpush3.msra.mxu1 %v530_v6  ;;  %v5722_v51 = vpop.f32.mrf.mxu1  ;;  %6674 = vst [vmem:[#allocation16_spill] sm:$0xff] %v5729_v56  ;;  %v628_v14 = vld [vmem:[%s6634_s1 + $0xae8] sm:$0xff]  ;;  %v5736_v6 = vpop.f32.mrf.mxu0 }
 0x189   : > { %6673 = vst [vmem:[#allocation15_spill] sm:$0xff] %v5722_v51  ;;  %2239 = vmatpush1.msra.mxu0 %v824_v35  ;;  %3052 = vmatprep.subr.mxu1 %v635_v40  ;;  %v516_v40 = vld [vmem:[%s6634_s1 + $0x768] sm:$0xff]  ;;  %v621_v51 = vld [vmem:[%s6634_s1 + $0xab0] sm:$0xff] }
 0x18a   : > { %2240 = vmatprep.subr.mxu0 %v6672_v55  ;;  %2950 = vmatprep.mubr.msk.f32.mxu0 %vm960_vm1, %v5729_v56  ;;  %v5738_v35 = vpop.f32.mrf.mxu1  ;;  %v810_v56 = vld [vmem:[%s6634_s1 + $0x1098] sm:$0xff] }
 0x18b   : > { %6675 = vst [vmem:[#allocation17_spill] sm:$0xff] %v5738_v35  ;;  %2123 = vmatprep.mubr.f32.mxu1 %v5607_v44  ;;  %3053 = vmatpush3.msra.mxu1 %v523_v39  ;;  %v803_v39 = vld [vmem:[%s6634_s1 + $0x1060] sm:$0xff]  ;;  %v754_v35 = vld [vmem:[%s6634_s1 + $0xed8] sm:$0xff] }
 0x18c   : > { %2241 = vmatpush1.msra.mxu0 %v817_v17  ;;  %2124 = vmatmul.mubr.f32.gmra.mxu1 %v5620_v28  ;;  %v509_v28 = vld [vmem:[%s6634_s1 + $0x730] sm:$0xff]  ;;  %v5761_v17 = vpop.f32.mrf.mxu0 }
 0x18d   : > { %1988 = vmatmul.mubr.f32.gmra.mxu0 %v5752_v36  ;;  %3054 = vmatprep.subr.mxu1 %v628_v14  ;;  %v5755_v44 = vpop.f32.mrf.mxu1  ;;  %v5770_v36 = vld [vmem:[%s3717_s8 + $0xb8] sm:$0xff] }
 0x18e   : > { %6677 = vst [vmem:[#allocation19_spill] sm:$0xff] %v5755_v44  ;;  %2242 = vmatprep.subr.mxu0 %v6672_v55  ;;  %3055 = vmatpush3.msra.mxu1 %v516_v40  ;;  %6679 = vst [vmem:[#allocation21_spill] sm:$0xff] %v5770_v36  ;;  %v3286_v40 = vld [vmem:[%s3717_s8 + $0x18] sm:$0xff]  ;;  %v3287_v44 = vld [vmem:[%s3717_s8 + $0x10] sm:$0xff] }
 0x18f   : > { %2243 = vmatpush1.msra.mxu0 %v810_v56  ;;  %3056 = vmatprep.subr.mxu1 %v621_v51  ;;  %v5766_v14 = vpop.f32.mrf.mxu1  ;;  %v2468_v56 = vld [vmem:[%s6636_s3 + $0xf8] sm:$0xff]  ;;  %v796_v51 = vld [vmem:[%s6634_s1 + $0x1028] sm:$0xff] }
 0x190   : > { %6678 = vst [vmem:[#allocation20_spill] sm:$0xff] %v5766_v14  ;;  %2244 = vmatprep.subr.mxu0 %v6672_v55  ;;  %2951 = vmatprep.mubr.msk.f32.mxu0 %vm960_vm1, %v5770_v36  ;;  %v2452_v14 = vld [vmem:[%s6636_s3 + $0x78] sm:$0xff]  ;;  %v5785_v36 = vpop.f32.mrf.mxu0 }
 0x191   : > { %3057 = vmatpush3.msra.mxu1 %v509_v28  ;;  %2193 = vmatprep.mubr.f32.mxu1 %v3286_v40  ;;  %v5790_v40 = vld [vmem:[%s3717_s8 + $0xb0] sm:$0xff] }
 0x192   : > { %2245 = vmatpush1.msra.mxu0 %v803_v39  ;;  %2194 = vmatmul.mubr.f32.vlgmr.msra.gmra.mxu1 %v3287_v44  ;;  %v5787_v28 = vpop.f32.mrf.mxu1  ;;  %6681 = vst [vmem:[#allocation23_spill] sm:$0xff] %v5790_v40  ;;  %v2467_v39 = vld [vmem:[%s6636_s3 + $0xf0] sm:$0xff] }
 0x193   : > { %6680 = vst [vmem:[#allocation22_spill] sm:$0xff] %v5787_v28  ;;  %1994 = vmatmul.mubr.f32.gmra.mxu0 %v5790_v40  ;;  %2246 = vmatprep.subr.mxu0 %v6672_v55  ;;  %v789_v44 = vld [vmem:[%s6634_s1 + $0xff0] sm:$0xff]  ;;  %v5807_v28 = vld [vmem:[%s3717_s8 + $0xe8] sm:$0xff] }
 0x194   : > { %3082 = vmatprep.subr.mxu1 %v2468_v56  ;;  %2247 = vmatpush1.msra.mxu0 %v796_v51  ;;  %v5800_v9 = vpop.f32.mrf.mxu1  ;;  %v2451_v40 = vld [vmem:[%s6636_s3 + $0x70] sm:$0xff]  ;;  %6683 = vst [vmem:[#allocation25_spill] sm:$0xff] %v5807_v28  ;;  %v5811_v56 = vpop.f32.mrf.mxu0  ;;  %v782_v51 = vld [vmem:[%s6634_s1 + $0xfb8] sm:$0xff] }
 0x195   : > { %6682 = vst [vmem:[#allocation24_spill] sm:$0xff] %v5800_v9  ;;  %3083 = vmatpush3.msra.mxu1 %v2452_v14  ;;  %2248 = vmatprep.subr.mxu0 %v6672_v55  ;;  %v2466_v14 = vld [vmem:[%s6636_s3 + $0xe8] sm:$0xff] }
 0x196   : > { %3084 = vmatprep.subr.mxu1 %v2467_v39  ;;  %2952 = vmatprep.mubr.msk.f32.mxu0 %vm960_vm1, %v5807_v28  ;;  %v5823_v39 = vld [vmem:[%s3717_s8 + $0xe0] sm:$0xff] }
 0x197   : > { %2198 = vmatprep.mubr.f32.mxu1 %v5184_v29  ;;  %2249 = vmatpush1.msra.mxu0 %v789_v44  ;;  %v5820_v9 = vpop.f32.mrf.mxu1  ;;  %6685 = vst [vmem:[#allocation27_spill] sm:$0xff] %v5823_v39  ;;  %v2450_v29 = vld [vmem:[%s6636_s3 + $0x68] sm:$0xff]  ;;  %v2465_v44 = vld [vmem:[%s6636_s3 + $0xe0] sm:$0xff] }
 0x198   : > { %6684 = vst [vmem:[#allocation26_spill] sm:$0xff] %v5820_v9  ;;  %3085 = vmatpush3.msra.mxu1 %v2451_v40  ;;  %2000 = vmatmul.mubr.f32.gmra.mxu0 %v5823_v39  ;;  %v775_v40 = vld [vmem:[%s6634_s1 + $0xf80] sm:$0xff]  ;;  %v5839_v39 = vpop.f32.mrf.mxu0  ;;  %v5846_v9 = vld [vmem:[%s3717_s8 + $0x118] sm:$0xff] }
 0x199   : > { %2199 = vmatmul.mubr.f32.gmra.mxu1 %v5200_v46  ;;  %2250 = vmatprep.subr.mxu0 %v6672_v55  ;;  %v5834_v28 = vpop.f32.mrf.mxu1  ;;  %v2449_v46 = vld [vmem:[%s6636_s3 + $0x60] sm:$0xff]  ;;  %6687 = vst [vmem:[#allocation29_spill] sm:$0xff] %v5846_v9 }
 0x19a   : > { %6686 = vst [vmem:[#allocation28_spill] sm:$0xff] %v5834_v28  ;;  %3086 = vmatprep.subr.mxu1 %v2466_v14  ;;  %2251 = vmatpush1.msra.mxu0 %v782_v51  ;;  %v2464_v51 = vld [vmem:[%s6636_s3 + $0xd8] sm:$0xff]  ;;  %v5861_v28 = vld [vmem:[%s3717_s8 + $0x110] sm:$0xff] }
 0x19b   : > { %3087 = vmatpush3.msra.mxu1 %v2450_v29  ;;  %2252 = vmatprep.subr.mxu0 %v6672_v55  ;;  %v768_v29 = vld [vmem:[%s6634_s1 + $0xf48] sm:$0xff]  ;;  %6689 = vst [vmem:[#allocation31_spill] sm:$0xff] %v5861_v28 }
 0x19c   : > { %3088 = vmatprep.subr.mxu1 %v2465_v44  ;;  %2953 = vmatprep.mubr.msk.f32.mxu0 %vm960_vm1, %v5846_v9  ;;  %v5850_v14 = vpop.f32.mrf.mxu1  ;;  %v931_v44 = vsub.s32 1, %v4838_v7 }
 0x19d   : > { %6688 = vst [vmem:[#allocation30_spill] sm:$0xff] %v5850_v14  ;;  %2203 = vmatprep.mubr.f32.mxu1 %v5218_v63  ;;  %2253 = vmatpush1.msra.mxu0 %v775_v40  ;;  %v2448_v63 = vld [vmem:[%s6636_s3 + $0x58] sm:$0xff]  ;;  %v5867_v40 = vpop.f32.mrf.mxu0 }
 0x19e   : > { %3089 = vmatpush3.msra.mxu1 %v2449_v46  ;;  %2006 = vmatmul.mubr.f32.gmra.mxu0 %v5861_v28  ;;  %v5869_v9 = vpop.f32.mrf.mxu1  ;;  %v2463_v46 = vld [vmem:[%s6636_s3 + $0xd0] sm:$0xff] }
 0x19f   : > { %6690 = vst [vmem:[#allocation32_spill] sm:$0xff] %v5869_v9  ;;  %2204 = vmatmul.mubr.f32.gmra.mxu1 %v5234_v16  ;;  %2254 = vmatprep.subr.mxu0 %v6672_v55  ;;  %v761_v28 = vld [vmem:[%s6634_s1 + $0xf10] sm:$0xff]  ;;  %v5888_v9 = vld [vmem:[%s6635_s2] sm:$0x7f] }
 0x1a0   : > { %3090 = vmatprep.subr.mxu1 %v2464_v51  ;;  %2255 = vmatpush1.msra.mxu0 %v768_v29  ;;  %v2447_v16 = vld [vmem:[%s6636_s3 + $0x50] sm:$0xff]  ;;  %v932_v51 = vrot.slane %v5888_v9, %v931_v44  ;;  %v5892_v29 = vld [vmem:[%s3717_s8 + $0x148] sm:$0xff] }
 0x1a1   : > { %3091 = vmatpush3.msra.mxu1 %v2448_v63  ;;  %2256 = vmatprep.subr.mxu0 %v6672_v55  ;;  %v5883_v14 = vpop.f32.mrf.mxu1  ;;  %6692 = vst [vmem:[#allocation34_spill] sm:$0xff] %v5892_v29  ;;  %v5896_v63 = vpop.f32.mrf.mxu0 }
 0x1a2   : > { %6691 = vst [vmem:[#allocation33_spill] sm:$0xff] %v5883_v14  ;;  %3092 = vmatprep.subr.mxu1 %v2463_v46  ;;  %2954 = vmatprep.mubr.msk.f32.mxu0 %vm960_vm1, %v5892_v29  ;;  %v2462_v14 = vld [vmem:[%s6636_s3 + $0xc8] sm:$0xff]  ;;  %v5908_v46 = vld [vmem:[%s3717_s8 + $0x140] sm:$0xff] }
 0x1a3   : > { %2208 = vmatprep.mubr.f32.mxu1 %v5252_v60  ;;  %2257 = vmatpush1.msra.mxu0 %v761_v28  ;;  %v5905_v44 = vpop.f32.mrf.mxu1  ;;  %6694 = vst [vmem:[#allocation36_spill] sm:$0xff] %v5908_v46  ;;  %v2446_v60 = vld [vmem:[%s6636_s3 + $0x48] sm:$0xff]  ;;  %v2461_v29 = vld [vmem:[%s6636_s3 + $0xc0] sm:$0xff] }
 0x1a4   : > { %6693 = vst [vmem:[#allocation35_spill] sm:$0xff] %v5905_v44  ;;  %3093 = vmatpush3.msra.mxu1 %v2447_v16  ;;  %2012 = vmatmul.mubr.f32.gmra.mxu0 %v5908_v46  ;;  %v5914_v28 = vpop.f32.mrf.mxu0  ;;  %v1076_v16 = vadd.f32 %v5064_v19, %v932_v51  ;;  %v747_v46 = vld [vmem:[%s6634_s1 + $0xea0] sm:$0xff]  ;;  %v1086_v19 = vadd.f32 %v5160_v20, %v4882_v12  ;;  %v2460_v20 = vld [vmem:[%s6636_s3 + $0xb8] sm:$0xff] }
 0x1a5   : > { %6695 = vst [vmem:[#allocation37_spill] sm:$0xff] %v5914_v28  ;;  %2209 = vmatmul.mubr.f32.gmra.mxu1 %v5270_v61  ;;  %2258 = vmatprep.subr.mxu0 %v6672_v55  ;;  %v1082_v28 = vadd.f32 %v5131_v57, %v932_v51  ;;  %v2445_v61 = vld [vmem:[%s6636_s3 + $0x40] sm:$0xff]  ;;  %v1092_v57 = vadd.f32 %v5212_v58, %v4882_v12 }
 0x1a6   : > { %3094 = vmatprep.subr.mxu1 %v2462_v14  ;;  %2259 = vmatpush1.msra.mxu0 %v754_v35  ;;  %v5925_v44 = vpop.f32.mrf.mxu0  ;;  %v1088_v35 = vadd.f32 %v5181_v37, %v932_v51  ;;  %v1112_v14 = vadd.f32 %v5411_v1, %v932_v51  ;;  %v740_v37 = vld [vmem:[%s6634_s1 + $0xe68] sm:$0xff]  ;;  %v1118_v58 = vadd.f32 %v5475_v3, %v932_v51  ;;  %v2459_v3 = vld [vmem:[%s6636_s3 + $0xb0] sm:$0xff] }
 0x1a7   : > { %6696 = vst [vmem:[#allocation38_spill] sm:$0xff] %v5925_v44  ;;  %3095 = vmatpush3.msra.mxu1 %v2446_v60  ;;  %2260 = vmatprep.subr.mxu0 %v6672_v55  ;;  %v5932_v53 = vpop.f32.mrf.mxu1  ;;  %v5939_v44 = vld [vmem:[%s3717_s8 + $0x178] sm:$0xff]  ;;  %v1094_v60 = vadd.f32 %v5240_v24, %v932_v51  ;;  %v5959_v24 = vld [vmem:[%s3717_s8 + $0x170] sm:$0xff] }
 0x1a8   : > { %6697 = vst [vmem:[#allocation39_spill] sm:$0xff] %v5932_v53  ;;  %3096 = vmatprep.subr.mxu1 %v2461_v29  ;;  %6698 = vst [vmem:[#allocation40_spill] sm:$0xff] %v5939_v44  ;;  %2955 = vmatprep.mubr.msk.f32.mxu0 %vm960_vm1, %v5939_v44  ;;  %v1189_v29 = vadd.f32 %v5084_v30, %v1076_v16  ;;  %v1100_v44 = vadd.f32 %v5297_v11, %v932_v51 }
 0x1a9   : > { %2213 = vmatprep.mubr.f32.mxu1 %v5288_v54  ;;  %2261 = vmatpush1.msra.mxu0 %v747_v46  ;;  %v5953_v1 = vpop.f32.mrf.mxu1  ;;  %v2444_v54 = vld [vmem:[%s6636_s3 + $0x38] sm:$0xff]  ;;  %v5968_v53 = vadd.f32 %v5285_v31, %v1082_v28  ;;  %v1106_v30 = vadd.f32 %v5350_v32, %v932_v51  ;;  %v1110_v11 = vadd.f32 %v5384_v50, %v4882_v12  ;;  %v733_v32 = vld [vmem:[%s6634_s1 + $0xe30] sm:$0xff] }
 0x1aa   : > { %3097 = vmatpush3.msra.mxu1 %v2445_v61  ;;  %2018 = vmatmul.mubr.f32.gmra.mxu0 %v5959_v24  ;;  %v5965_v46 = vpop.f32.mrf.mxu0  ;;  %v1199_v16 = vadd.f32 %v5318_v25, %v1086_v19  ;;  %v1201_v61 = vadd.f32 %v5348_v52, %v1088_v35  ;;  %v1225_v31 = vadd.f32 %v5574_v41, %v1112_v14 }
 0x1ab   : > { %2214 = vmatmul.mubr.f32.gmra.mxu1 %v5306_v0  ;;  %2262 = vmatprep.subr.mxu0 %v6672_v55  ;;  %v2443_v0 = vld [vmem:[%s6636_s3 + $0x30] sm:$0xff]  ;;  %v5990_v51 = vadd.f32 %v5379_v62, %v1092_v57  ;;  %v1098_v25 = vadd.f32 %v5267_v21, %v4882_v12  ;;  %v1207_v52 = vadd.f32 %v5406_v2, %v1094_v60  ;;  %v2458_v62 = vld [vmem:[%s6636_s3 + $0xa8] sm:$0xff]  ;;  %v922_v21 = vld [vmem:[%s6634_s1 + $0x1418] sm:$0x1] }
 0x1ac   : > { %3098 = vmatprep.subr.mxu1 %v2460_v20  ;;  %2263 = vmatpush1.msra.mxu0 %v740_v37  ;;  %v5987_v50 = vpop.f32.mrf.mxu0  ;;  %v1213_v28 = vadd.f32 %v5469_v5, %v1100_v44  ;;  %v1231_v19 = vadd.f32 %v5630_v47, %v1118_v58  ;;  %v1338_v2 = vadd.f32 %v5839_v39, %v1225_v31 }
 0x1ad   : > { %3099 = vmatpush3.msra.mxu1 %v2444_v54  ;;  %2264 = vmatprep.subr.mxu0 %v6672_v55  ;;  %v5996_v41 = vpop.f32.mrf.mxu1  ;;  %v1219_v35 = vadd.f32 %v5522_v4, %v1106_v30  ;;  %v1223_v14 = vadd.f32 %v5550_v22, %v1110_v11  ;;  %v1116_v5 = vadd.f32 %v5447_v34, %v4882_v12  ;;  %v2457_v34 = vld [vmem:[%s6636_s3 + $0xa0] sm:$0xff] }
 0x1ae   : > { %3100 = vmatprep.subr.mxu1 %v2459_v3  ;;  %2218 = vmatprep.mubr.f32.mxu1 %v5326_v27  ;;  %v2442_v27 = vld [vmem:[%s6636_s3 + $0x28] sm:$0xff]  ;;  %v1314_v44 = vadd.f32 %v5638_v13, %v1201_v61  ;;  %v1326_v57 = vadd.f32 %v5736_v6, %v1213_v28  ;;  %v1344_v4 = vadd.f32 %v5896_v63, %v1231_v19  ;;  %v2441_v6 = vld [vmem:[%s6636_s3 + $0x20] sm:$0xff] }
 0x1af   : > { %2265 = vmatpush1.msra.mxu0 %v733_v32  ;;  %3101 = vmatpush3.msra.mxu1 %v2443_v0  ;;  %v6015_v47 = vpop.f32.mrf.mxu1  ;;  %v1211_v39 = vadd.f32 %v5441_v23, %v1098_v25  ;;  %v1104_v60 = vadd.f32 %v5323_v43, %v4882_v12  ;;  %v1336_v13 = vadd.f32 %v5811_v56, %v1223_v14  ;;  %v2382_v12 = vmax.f32 %v1338_v2, 0.0  ;;  %v6700_v2 = vld [vmem:[#allocation4_spill] sm:$0xff]  ;;  %v6701_v14 = vld [vmem:[#allocation2_spill] sm:$0xff] }
 0x1b0   : > { %2219 = vmatmul.mubr.f32.gmra.mxu1 %v5339_v26  ;;  %2274 = vmatprep.subr.mxu0 %v6672_v55  ;;  %v6025_v22 = vpop.f32.mrf.mxu0  ;;  %v915_v26 = vld [vmem:[%s6634_s1 + $0x13e0] sm:$0xff]  ;;  %v1302_v63 = vadd.f32 %v5524_v38, %v1189_v29  ;;  %v1320_v23 = vadd.f32 %v5683_v59, %v1207_v52  ;;  %v1332_v20 = vadd.f32 %v5785_v36, %v1219_v35  ;;  %v2456_v38 = vld [vmem:[%s6636_s3 + $0x98] sm:$0xff]  ;;  %v908_v36 = vld [vmem:[%s6634_s1 + $0x13a8] sm:$0xff]  ;;  %v2354_v29 = vmax.f32 %v1314_v44, 0.0 }
 0x1b1   : > { %3102 = vmatprep.subr.mxu1 %v2458_v62  ;;  %2956 = vmatpush2.msk.msra.mxu0 %vm985_vm0, %v922_v21  ;;  %v1229_v56 = vadd.f32 %v5602_v15, %v1116_v5  ;;  %v1312_v37 = vadd.f32 %v5604_v42, %v1199_v16  ;;  %v1324_v58 = vadd.f32 %v5712_v18, %v1211_v39  ;;  %v2368_v42 = vmax.f32 %v1326_v57, 0.0  ;;  %v6699_v16 = vld [vmem:[#allocation3_spill] sm:$0xff]  ;;  %v6702_v5 = vld [vmem:[#allocation6_spill] sm:$0xff] }
 0x1b2   : > { %3103 = vmatpush3.msra.mxu1 %v2442_v27  ;;  %2276 = vmatprep.subr.mxu0 %v6672_v55  ;;  %v6042_v43 = vpop.f32.mrf.mxu0  ;;  %v1308_v15 = vadd.f32 %v5579_v49, %v5968_v53  ;;  %v2389_v18 = vmax.f32 %v1344_v4, 0.0  ;;  %v1217_v54 = vadd.f32 %v5494_v33, %v1104_v60  ;;  %v1300_v30 = vadd.f32 %v5499_v10, %v4923_v45  ;;  %v2455_v53 = vld [vmem:[%s6636_s3 + $0x90] sm:$0xff]  ;;  %v2454_v35 = vld [vmem:[%s6636_s3 + $0x88] sm:$0xff]  ;;  %v6703_v60 = vld [vmem:[#allocation5_spill] sm:$0xff] }
 0x1b3   : > { %3104 = vmatprep.subr.mxu1 %v2457_v34  ;;  %2223 = vmatprep.mubr.f32.mxu1 %v5370_v8  ;;  %v6054_v59 = vpop.f32.mrf.mxu1  ;;  %v2440_v8 = vld [vmem:[%s6636_s3 + $0x18] sm:$0xff]  ;;  %v2381_v11 = vmax.f32 %v1336_v13, 0.0  ;;  %v1342_v3 = vadd.f32 %v5867_v40, %v1229_v56  ;;  %v2340_v61 = vmax.f32 %v1302_v63, 0.0  ;;  %v2361_v31 = vmax.f32 %v1320_v23, 0.0  ;;  %v901_v45 = vld [vmem:[%s6634_s1 + $0x1370] sm:$0xff]  ;;  %v2438_v34 = vld [vmem:[%s6636_s3 + $0x8] sm:$0xff] }
 0x1b4   : > { %2277 = vmatpush2.msra.mxu0 %v915_v26  ;;  %3105 = vmatpush3.msra.mxu1 %v2441_v6  ;;  %v2375_v32 = vmax.f32 %v1332_v20, 0.0  ;;  %v2410_v33 = vmax.f32 %v2368_v42, %v2382_v12  ;;  %v2439_v10 = vld [vmem:[%s6636_s3 + $0x10] sm:$0xff]  ;;  %v2353_v0 = vmax.f32 %v1312_v37, 0.0  ;;  %v1318_v25 = vadd.f32 %v5655_v48, %v5990_v51  ;;  %v894_v48 = vld [vmem:[%s6634_s1 + $0x1338] sm:$0xff]  ;;  %v2453_v13 = vld [vmem:[%s6636_s3 + $0x80] sm:$0xff] }
 0x1b5   : > { %2224 = vmatmul.mubr.f32.gmra.mxu1 %v6699_v16  ;;  %2278 = vmatprep.subr.mxu0 %v6672_v55  ;;  %v6070_v49 = vpop.f32.mrf.mxu1  ;;  %v2367_v52 = vmax.f32 %v1324_v58, 0.0  ;;  %v1330_v28 = vadd.f32 %v5761_v17, %v1217_v54  ;;  %v2347_v19 = vmax.f32 %v1308_v15, 0.0  ;;  %v2396_v62 = vmax.f32 %v2340_v61, %v2354_v29  ;;  %v887_v26 = vld [vmem:[%s6634_s1 + $0x1300] sm:$0xff]  ;;  %v880_v42 = vld [vmem:[%s6634_s1 + $0x12c8] sm:$0xff]  ;;  %v873_v54 = vld [vmem:[%s6634_s1 + $0x1290] sm:$0xff] }
 0x1b6   : > { %3106 = vmatprep.subr.mxu1 %v2456_v38  ;;  %2279 = vmatpush2.msra.mxu0 %v908_v36  ;;  %v6078_v40 = vpop.f32.mrf.mxu0  ;;  %v2417_v21 = vmax.f32 %v2375_v32, %v2389_v18  ;;  %v2339_v17 = vmax.f32 %v1300_v30, 0.0  ;;  %v1306_v27 = vadd.f32 %v6702_v5, %v6701_v14  ;;  %v2388_v57 = vmax.f32 %v1342_v3, 0.0  ;;  %v2437_v12 = vld [vmem:[%s6636_s3] sm:$0xff]  ;;  %v2500_v30 = vld [vmem:[%s6636_s3 + $0x1f8] sm:$0xff] }
 0x1b7   : > { %3107 = vmatpush3.msra.mxu1 %v2440_v8  ;;  %2280 = vmatprep.subr.mxu0 %v6672_v55  ;;  %v2409_v44 = vmax.f32 %v2367_v52, %v2381_v11  ;;  %v2403_v39 = vmax.f32 %v2347_v19, %v2361_v31  ;;  %v2424_v6 = vmax.f32 %v2396_v62, %v2410_v33  ;;  %v2360_v23 = vmax.f32 %v1318_v25, 0.0  ;;  %v866_v61 = vld [vmem:[%s6634_s1 + $0x1258] sm:$0xff]  ;;  %v6704_v31 = vld [vmem:[#allocation8_spill] sm:$0xff]  ;;  %v859_v19 = vld [vmem:[%s6634_s1 + $0x1220] sm:$0xff] }
 0x1b8   : > { %3108 = vmatprep.subr.mxu1 %v2455_v53  ;;  %2228 = vmatprep.mubr.f32.mxu1 %v6700_v2  ;;  %v6091_v51 = vpop.f32.mrf.mxu0  ;;  %v2395_v63 = vmax.f32 %v2339_v17, %v2353_v0  ;;  %v2374_v20 = vmax.f32 %v1330_v28, 0.0  ;;  %v939_v37 = vsub.s32 3, %v4838_v7  ;;  %v2346_v36 = vmax.f32 %v1306_v27, 0.0  ;;  %v2484_v32 = vld [vmem:[%s6636_s3 + $0x178] sm:$0xff]  ;;  %v6706_v0 = vld [vmem:[#allocation24_spill] sm:$0xff]  ;;  %v2482_v17 = vld [vmem:[%s6636_s3 + $0x168] sm:$0xff] }
 0x1b9   : > { %2281 = vmatpush2.msra.mxu0 %v901_v45  ;;  %3109 = vmatpush3.msra.mxu1 %v2439_v10  ;;  %v6098_v4 = vpop.f32.mrf.mxu1  ;;  %v2431_v58 = vmax.f32 %v2403_v39, %v2417_v21  ;;  %v935_v16 = vsub.s32 2, %v4838_v7  ;;  %v6705_v45 = vld [vmem:[#allocation17_spill] sm:$0xff]  ;;  %v2499_v52 = vld [vmem:[%s6636_s3 + $0x1f0] sm:$0xff]  ;;  %v2498_v21 = vld [vmem:[%s6636_s3 + $0x1e8] sm:$0xff] }
 0x1ba   : > { %2229 = vmatmul.mubr.f32.gmra.mxu1 %v6703_v60  ;;  %2282 = vmatprep.subr.mxu0 %v6672_v55  ;;  %v2423_v15 = vmax.f32 %v2395_v63, %v2409_v44  ;;  %v2416_v29 = vmax.f32 %v2374_v20, %v2388_v57  ;;  %v2402_v18 = vmax.f32 %v2346_v36, %v2360_v23  ;;  %v2483_v62 = vld [vmem:[%s6636_s3 + $0x170] sm:$0xff]  ;;  %v6707_v5 = vld [vmem:[#allocation9_spill] sm:$0xff]  ;;  %v2497_v44 = vld [vmem:[%s6636_s3 + $0x1e0] sm:$0xff] }
 0x1bb   : > { %3110 = vmatprep.subr.mxu1 %v2454_v35  ;;  %2283 = vmatpush2.msra.mxu0 %v894_v48  ;;  %v6111_v56 = vpop.f32.mrf.mxu1  ;;  %v6130_v3 = vrot.slane %v5888_v9, %v939_v37  ;;  %v6164_v35 = vrot.slane %v5888_v9, %v935_v16  ;;  %v852_v48 = vld [vmem:[%s6634_s1 + $0x11e8] sm:$0xff]  ;;  %v6708_v39 = vld [vmem:[#allocation32_spill] sm:$0xff]  ;;  %v2496_v63 = vld [vmem:[%s6636_s3 + $0x1d8] sm:$0xff] }
 0x1bc   : > { %3111 = vmatpush3.msra.mxu1 %v2438_v34  ;;  %2284 = vmatprep.subr.mxu0 %v6672_v55  ;;  %v6115_v38 = vpop.f32.mrf.mxu0  ;;  %v2430_v53 = vmax.f32 %v2402_v18, %v2416_v29  ;;  %v845_v34 = vld [vmem:[%s6634_s1 + $0x11b0] sm:$0xff]  ;;  %v2480_v20 = vld [vmem:[%s6636_s3 + $0x158] sm:$0xff]  ;;  %v6712_v18 = vld [vmem:[#allocation10_spill] sm:$0xff] }
 0x1bd   : > { %3112 = vmatprep.subr.mxu1 %v2453_v13  ;;  %2285 = vmatpush2.msra.mxu0 %v887_v26  ;;  %v1427_v10 = vadd.f32 %v6705_v45, %v6130_v3  ;;  %v1439_v25 = vadd.f32 %v6706_v0, %v6130_v3  ;;  %v1415_v27 = vadd.f32 %v6707_v5, %v6130_v3  ;;  %v2481_v13 = vld [vmem:[%s6636_s3 + $0x160] sm:$0xff]  ;;  %v2495_v36 = vld [vmem:[%s6636_s3 + $0x1d0] sm:$0xff]  ;;  %v2478_v5 = vld [vmem:[%s6636_s3 + $0x148] sm:$0xff] }
 0x1be   : > { %3113 = vmatpush3.msra.mxu1 %v2437_v12  ;;  %2623 = vmatprep.mubr.f32.mxu1 %v2424_v6  ;;  %v1551_v8 = vpop.f32.mrf.mxu0  ;;  %v1451_v60 = vadd.f32 %v6708_v39, %v6130_v3  ;;  %v6709_v26 = vld [vmem:[#allocation38_spill] sm:$0xff]  ;;  %v6710_v12 = vld [vmem:[#allocation7_spill] sm:$0xff]  ;;  %v6716_v45 = vld [vmem:[#allocation28_spill] sm:$0xff] }
 0x1bf   : > { %2286 = vmatprep.subr.mxu0 %v6672_v55  ;;  %2624 = vmatmul.mubr.f32.vlgmr.msra.gmra.mxu1 %v2423_v15  ;;  %v6127_v11 = vpop.f32.mrf.mxu1  ;;  %v1540_v9 = vadd.f32 %v6042_v43, %v1427_v10  ;;  %v1552_v57 = vadd.f32 %v1551_v8, %v1439_v25  ;;  %v1528_v6 = vadd.f32 %v6709_v26, %v1415_v27  ;;  %v2494_v25 = vld [vmem:[%s6636_s3 + $0x1c8] sm:$0xff]  ;;  %v6720_v27 = vld [vmem:[#allocation20_spill] sm:$0xff] }
 0x1c0   : > { %2287 = vmatpush2.msra.mxu0 %v880_v42  ;;  %2628 = vmatprep.mubr.f32.mxu1 %v2431_v58  ;;  %v6202_v37 = vadd.f32 %v6710_v12, %v6164_v35  ;;  %v6711_v42 = vld [vmem:[#allocation11_spill] sm:$0xff]  ;;  %v1445_v10 = vadd.f32 %v6716_v45, %v6130_v3  ;;  %v2491_v45 = vld [vmem:[%s6636_s3 + $0x1b0] sm:$0xff] }
 0x1c1   : > { %2288 = vmatprep.subr.mxu0 %v6672_v55  ;;  %2957 = vmatprep.mubr.msk.f32.mxu0 %vm960_vm1, %v6704_v31  ;;  %v1664_v33 = vpop.f32.mrf.mxu1  ;;  %v1653_v58 = vadd.f32 %v6070_v49, %v1540_v9  ;;  %v6213_v8 = vadd.f32 %v6711_v42, %v6164_v35  ;;  %v6714_v31 = vld [vmem:[#allocation13_spill] sm:$0xff]  ;;  %v1641_v0 = vadd.f32 %v5953_v1, %v1528_v6  ;;  %v6721_v26 = vld [vmem:[#allocation19_spill] sm:$0xff] }
 0x1c2   : > { %2289 = vmatpush2.msra.mxu0 %v873_v54  ;;  %3120 = vmatprep.subr.mxu1 %v2500_v30  ;;  %v6149_v28 = vpop.f32.mrf.mxu0  ;;  %v1665_v15 = vadd.f32 %v1664_v33, %v1552_v57  ;;  %v6713_v54 = vld [vmem:[#allocation22_spill] sm:$0xff]  ;;  %v2479_v30 = vld [vmem:[%s6636_s3 + $0x150] sm:$0xff]  ;;  %v1433_v9 = vadd.f32 %v6720_v27, %v6130_v3  ;;  %v1431_v6 = vadd.f32 %v6721_v26, %v6164_v35 }
 0x1c3   : > { %2290 = vmatprep.subr.mxu0 %v6672_v55  ;;  %2629 = vmatmul.mubr.f32.gmra.mxu1 %v2430_v53  ;;  %v1437_v49 = vadd.f32 %v6713_v54, %v6164_v35  ;;  %v6715_v33 = vld [vmem:[#allocation12_spill] sm:$0xff]  ;;  %v2342_v42 = vmax.f32 %v1641_v0, 0.0 }
 0x1c4   : > { %2291 = vmatpush2.msra.mxu0 %v866_v61  ;;  %3121 = vmatpush3.msra.mxu1 %v2484_v32  ;;  %v6161_v2 = vpop.f32.mrf.mxu0  ;;  %v2516_v61 = vld [vmem:[%s6636_s3 + $0x278] sm:$0xff]  ;;  %v1421_v32 = vadd.f32 %v6714_v31, %v6130_v3  ;;  %v2370_v57 = vmax.f32 %v1665_v15, 0.0  ;;  %v6724_v15 = vld [vmem:[#allocation16_spill] sm:$0xff] }
 0x1c5   : > { %2292 = vmatprep.subr.mxu0 %v6672_v55  ;;  %3122 = vmatprep.subr.mxu1 %v2499_v52  ;;  %v6173_v14 = vpop.f32.mrf.mxu1  ;;  %v6717_v52 = vld [vmem:[#allocation15_spill] sm:$0xff]  ;;  %v1550_v12 = vadd.f32 %v6115_v38, %v1437_v49  ;;  %v2492_v38 = vld [vmem:[%s6636_s3 + $0x1b8] sm:$0xff] }
 0x1c6   : > { %2293 = vmatpush2.msra.mxu0 %v859_v19  ;;  %3123 = vmatpush3.msra.mxu1 %v2483_v62  ;;  %v1425_v19 = vadd.f32 %v6717_v52, %v6164_v35  ;;  %v6718_v62 = vld [vmem:[#allocation30_spill] sm:$0xff]  ;;  %v2475_v52 = vld [vmem:[%s6636_s3 + $0x130] sm:$0xff] }
 0x1c7   : > { %2294 = vmatprep.subr.mxu0 %v6672_v55  ;;  %3124 = vmatprep.subr.mxu1 %v2498_v21  ;;  %v6190_v43 = vpop.f32.mrf.mxu1  ;;  %v1449_v21 = vadd.f32 %v6718_v62, %v6164_v35 }
 0x1c8   : > { %2295 = vmatpush2.msra.mxu0 %v852_v48  ;;  %3125 = vmatpush3.msra.mxu1 %v2482_v17  ;;  %v1561_v23 = vpop.f32.mrf.mxu0  ;;  %v6719_v48 = vld [vmem:[#allocation35_spill] sm:$0xff] }
 0x1c9   : > { %2296 = vmatprep.subr.mxu0 %v6672_v55  ;;  %3126 = vmatprep.subr.mxu1 %v2497_v44  ;;  %v2532_v55 = vld [vmem:[%s6636_s3 + $0x2f8] sm:$0xff]  ;;  %v1457_v17 = vadd.f32 %v6719_v48, %v6130_v3  ;;  %v2356_v44 = vmax.f32 %v1653_v58, 0.0  ;;  %v6723_v3 = vld [vmem:[#allocation26_spill] sm:$0xff] }
 0x1ca   : > { %2297 = vmatpush2.msra.mxu0 %v845_v34  ;;  %3127 = vmatpush3.msra.mxu1 %v2481_v13  ;;  %v1563_v29 = vpop.f32.mrf.mxu0  ;;  %v2493_v34 = vld [vmem:[%s6636_s3 + $0x1c0] sm:$0xff]  ;;  %v2531_v13 = vld [vmem:[%s6636_s3 + $0x2f0] sm:$0xff] }
 0x1cb   : > { %2299 = vmatmul.mubr.f32.vlgmr.msra.gmra.mxu0 %v6712_v18  ;;  %3128 = vmatprep.subr.mxu1 %v2496_v63  ;;  %v1564_v16 = vadd.f32 %v1563_v29, %v1451_v60  ;;  %v6221_v53 = vpop.f32.mrf.mxu1  ;;  %v6722_v63 = vld [vmem:[#allocation14_spill] sm:$0xff]  ;;  %v6725_v29 = vld [vmem:[#allocation33_spill] sm:$0xff]  ;;  %v1558_v18 = vadd.f32 %v6161_v2, %v1445_v10  ;;  %v1546_v2 = vadd.f32 %v6091_v51, %v1433_v9 }
 0x1cc   : > { %2958 = vmatprep.mubr.msk.f32.mxu0 %vm960_vm1, %v6715_v33  ;;  %3129 = vmatpush3.msra.mxu1 %v2480_v20  ;;  %v1443_v20 = vadd.f32 %v6723_v3, %v6164_v35  ;;  %v2477_v58 = vld [vmem:[%s6636_s3 + $0x140] sm:$0xff]  ;;  %v2398_v33 = vmax.f32 %v2342_v42, %v2356_v44  ;;  %v1663_v51 = vadd.f32 %v6127_v11, %v1550_v12  ;;  %v2472_v3 = vld [vmem:[%s6636_s3 + $0x118] sm:$0xff]  ;;  %v2471_v42 = vld [vmem:[%s6636_s3 + $0x110] sm:$0xff] }
 0x1cd   : > { %3130 = vmatprep.subr.mxu1 %v2495_v36  ;;  %v1676_v1 = vpop.f32.mrf.mxu1  ;;  %3158 = vmatprep.subr.mxu0 %v2532_v55  ;;  %v2515_v36 = vld [vmem:[%s6636_s3 + $0x270] sm:$0xff]  ;;  %v1455_v55 = vadd.f32 %v6725_v29, %v6164_v35  ;;  %v1671_v48 = vadd.f32 %v6190_v43, %v1558_v18  ;;  %v1659_v43 = vadd.f32 %v6111_v56, %v1546_v2  ;;  %v2489_v9 = vld [vmem:[%s6636_s3 + $0x1a0] sm:$0xff]  ;;  %v2528_v18 = vld [vmem:[%s6636_s3 + $0x2d8] sm:$0xff] }
 0x1ce   : > { %3131 = vmatpush3.msra.mxu1 %v2479_v30  ;;  %v1567_v39 = vpop.f32.mrf.mxu0  ;;  %v1677_v60 = vadd.f32 %v1676_v1, %v1564_v16  ;;  %3159 = vmatpush3.msra.mxu0 %v2516_v61  ;;  %v1534_v30 = vadd.f32 %v5987_v50, %v1421_v32  ;;  %v2476_v16 = vld [vmem:[%s6636_s3 + $0x138] sm:$0xff]  ;;  %v1562_v61 = vadd.f32 %v1561_v23, %v1449_v21  ;;  %v2530_v50 = vld [vmem:[%s6636_s3 + $0x2e8] sm:$0xff]  ;;  %v6726_v32 = vld [vmem:[#allocation18_spill] sm:$0xff] }
 0x1cf   : > { %2304 = vmatmul.mubr.f32.gmra.mxu0 %v6722_v63  ;;  %3132 = vmatprep.subr.mxu1 %v2494_v25  ;;  %v6727_v23 = vld [vmem:[#allocation37_spill] sm:$0xff]  ;;  %v1538_v25 = vadd.f32 %v6025_v22, %v1425_v19  ;;  %v1556_v11 = vadd.f32 %v6149_v28, %v1443_v20  ;;  %v1568_v1 = vadd.f32 %v1567_v39, %v1455_v55  ;;  %v2514_v28 = vld [vmem:[%s6636_s3 + $0x268] sm:$0xff]  ;;  %v2473_v56 = vld [vmem:[%s6636_s3 + $0x120] sm:$0xff]  ;;  %v2377_v26 = vmax.f32 %v1671_v48, 0.0 }
 0x1d0   : > { %2959 = vmatprep.mubr.msk.f32.mxu0 %vm960_vm1, %v6724_v15  ;;  %3133 = vmatpush3.msra.mxu1 %v2478_v5  ;;  %v2384_v54 = vmax.f32 %v1677_v60, 0.0  ;;  %v1569_v49 = vpop.f32.mrf.mxu0  ;;  %v1526_v0 = vadd.f32 %v6727_v23, %v6202_v37  ;;  %v6728_v21 = vld [vmem:[#allocation21_spill] sm:$0xff]  ;;  %v2490_v37 = vld [vmem:[%s6636_s3 + $0x1a8] sm:$0xff]  ;;  %v1675_v19 = vadd.f32 %v6221_v53, %v1562_v61  ;;  %v1647_v27 = vadd.f32 %v6015_v47, %v1534_v30  ;;  %v2527_v23 = vld [vmem:[%s6636_s3 + $0x2d0] sm:$0xff] }
 0x1d1   : > { %3134 = vmatprep.subr.mxu1 %v2493_v34  ;;  %v1570_v31 = vadd.f32 %v1569_v49, %v1457_v17  ;;  %v1680_v35 = vpop.f32.mrf.mxu1  ;;  %3160 = vmatprep.subr.mxu0 %v2531_v13  ;;  %v2474_v5 = vld [vmem:[%s6636_s3 + $0x128] sm:$0xff]  ;;  %v1532_v44 = vadd.f32 %v5965_v46, %v6213_v8  ;;  %v1544_v47 = vadd.f32 %v6078_v40, %v1431_v6  ;;  %v2529_v34 = vld [vmem:[%s6636_s3 + $0x2e0] sm:$0xff]  ;;  %v6730_v39 = vld [vmem:[#allocation25_spill] sm:$0xff]  ;;  %v2369_v40 = vmax.f32 %v1663_v51, 0.0 }
 0x1d2   : > { %3135 = vmatpush3.msra.mxu1 %v2477_v58  ;;  %v2412_v10 = vmax.f32 %v2370_v57, %v2384_v54  ;;  %3161 = vmatpush3.msra.mxu0 %v2515_v36  ;;  %v6729_v53 = vld [vmem:[#allocation23_spill] sm:$0xff]  ;;  %v1651_v57 = vadd.f32 %v6054_v59, %v1538_v25  ;;  %v2488_v46 = vld [vmem:[%s6636_s3 + $0x198] sm:$0xff]  ;;  %v1669_v8 = vadd.f32 %v6173_v14, %v1556_v11  ;;  %v2383_v6 = vmax.f32 %v1675_v19, 0.0  ;;  %v2487_v58 = vld [vmem:[%s6636_s3 + $0x190] sm:$0xff] }
 0x1d3   : > { %2309 = vmatmul.mubr.f32.gmra.mxu0 %v6726_v32  ;;  %3136 = vmatprep.subr.mxu1 %v2492_v38  ;;  %v1682_v62 = vpop.f32.mrf.mxu1  ;;  %v6731_v60 = vld [vmem:[#allocation39_spill] sm:$0xff]  ;;  %v1681_v63 = vadd.f32 %v1680_v35, %v1568_v1  ;;  %v2349_v20 = vmax.f32 %v1647_v27, 0.0  ;;  %v2363_v12 = vmax.f32 %v1659_v43, 0.0  ;;  %v2513_v14 = vld [vmem:[%s6636_s3 + $0x260] sm:$0xff]  ;;  %v1645_v15 = vadd.f32 %v5996_v41, %v1532_v44  ;;  %v6733_v38 = vld [vmem:[#allocation29_spill] sm:$0xff] }
 0x1d4   : > { %2960 = vmatprep.mubr.msk.f32.mxu0 %vm960_vm1, %v6728_v21  ;;  %3137 = vmatpush3.msra.mxu1 %v2476_v16  ;;  %v1683_v17 = vadd.f32 %v1682_v62, %v1570_v31  ;;  %v2426_v22 = vmax.f32 %v2398_v33, %v2412_v10  ;;  %v1639_v13 = vadd.f32 %v6731_v60, %v1526_v0  ;;  %v6732_v36 = vld [vmem:[#allocation27_spill] sm:$0xff]  ;;  %v2355_v29 = vmax.f32 %v1651_v57, 0.0  ;;  %v2485_v35 = vld [vmem:[%s6636_s3 + $0x180] sm:$0xff]  ;;  %v2512_v33 = vld [vmem:[%s6636_s3 + $0x258] sm:$0xff] }
 0x1d5   : > { %3138 = vmatprep.subr.mxu1 %v2491_v45  ;;  %3162 = vmatprep.subr.mxu0 %v2530_v50  ;;  %v1657_v55 = vadd.f32 %v6098_v4, %v1544_v47  ;;  %v2486_v41 = vld [vmem:[%s6636_s3 + $0x188] sm:$0xff]  ;;  %v2376_v4 = vmax.f32 %v1669_v8, 0.0  ;;  %v2411_v30 = vmax.f32 %v2369_v40, %v2383_v6  ;;  %v2390_v16 = vmax.f32 %v1681_v63, 0.0  ;;  %v2469_v32 = vld [vmem:[%s6636_s3 + $0x100] sm:$0xff]  ;;  %v2511_v62 = vld [vmem:[%s6636_s3 + $0x250] sm:$0xff] }
 0x1d6   : > { %3139 = vmatpush3.msra.mxu1 %v2475_v52  ;;  %2698 = vmatprep.mubr.f32.mxu1 %v2426_v22  ;;  %v2391_v59 = vmax.f32 %v1683_v17, 0.0  ;;  %v2341_v49 = vmax.f32 %v1639_v13, 0.0  ;;  %v2470_v61 = vld [vmem:[%s6636_s3 + $0x108] sm:$0xff]  ;;  %v2405_v31 = vmax.f32 %v2349_v20, %v2363_v12  ;;  %v2348_v45 = vmax.f32 %v1645_v15, 0.0  ;;  %v6735_v0 = vld [vmem:[#allocation34_spill] sm:$0xff]  ;;  %v6736_v21 = vld [vmem:[#allocation36_spill] sm:$0xff] }
 0x1d7   : > { %2314 = vmatmul.mubr.f32.gmra.mxu0 %v6729_v53  ;;  %3140 = vmatprep.subr.mxu1 %v2490_v37  ;;  %v6734_v2 = vld [vmem:[#allocation31_spill] sm:$0xff]  ;;  %v2362_v50 = vmax.f32 %v1657_v55, 0.0  ;;  %v2418_v52 = vmax.f32 %v2376_v4, %v2390_v16  ;;  %v6737_v17 = vld [vmem:[#allocation40_spill] sm:$0xff]  ;;  %v2525_v19 = vld [vmem:[%s6636_s3 + $0x2c0] sm:$0xff] }
 0x1d8   : > { %2961 = vmatprep.mubr.msk.f32.mxu0 %vm960_vm1, %v6730_v39  ;;  %3141 = vmatpush3.msra.mxu1 %v2474_v5  ;;  %v2419_v54 = vmax.f32 %v2377_v26, %v2391_v59  ;;  %v2397_v10 = vmax.f32 %v2341_v49, %v2355_v29  ;;  %v2526_v37 = vld [vmem:[%s6636_s3 + $0x2c8] sm:$0xff]  ;;  %v2509_v5 = vld [vmem:[%s6636_s3 + $0x240] sm:$0xff]  ;;  %v2524_v1 = vld [vmem:[%s6636_s3 + $0x2b8] sm:$0xff] }
 0x1d9   : > { %3142 = vmatprep.subr.mxu1 %v2489_v9  ;;  %3163 = vmatpush3.msra.mxu0 %v2514_v28  ;;  %v2404_v48 = vmax.f32 %v2348_v45, %v2362_v50  ;;  %v2510_v11 = vld [vmem:[%s6636_s3 + $0x248] sm:$0xff]  ;;  %v2508_v27 = vld [vmem:[%s6636_s3 + $0x238] sm:$0xff]  ;;  %v2507_v43 = vld [vmem:[%s6636_s3 + $0x230] sm:$0xff] }
 0x1da   : > { %3143 = vmatpush3.msra.mxu1 %v2473_v56  ;;  %3164 = vmatprep.subr.mxu0 %v2529_v34  ;;  %v2433_v25 = vmax.f32 %v2405_v31, %v2419_v54  ;;  %v2425_v51 = vmax.f32 %v2397_v10, %v2411_v30  ;;  %v2522_v9 = vld [vmem:[%s6636_s3 + $0x2a8] sm:$0xff]  ;;  %v2521_v53 = vld [vmem:[%s6636_s3 + $0x2a0] sm:$0xff]  ;;  %v2520_v57 = vld [vmem:[%s6636_s3 + $0x298] sm:$0xff] }
 0x1db   : > { %2319 = vmatmul.mubr.f32.gmra.mxu0 %v6732_v36  ;;  %3144 = vmatprep.subr.mxu1 %v2488_v46  ;;  %v2432_v22 = vmax.f32 %v2404_v48, %v2418_v52  ;;  %v2506_v28 = vld [vmem:[%s6636_s3 + $0x228] sm:$0xff]  ;;  %v2505_v44 = vld [vmem:[%s6636_s3 + $0x220] sm:$0xff]  ;;  %v2504_v47 = vld [vmem:[%s6636_s3 + $0x218] sm:$0xff] }
 0x1dc   : > { %2962 = vmatprep.mubr.msk.f32.mxu0 %vm960_vm1, %v6733_v38  ;;  %3145 = vmatpush3.msra.mxu1 %v2472_v3  ;;  %v2519_v56 = vld [vmem:[%s6636_s3 + $0x290] sm:$0xff]  ;;  %v2518_v39 = vld [vmem:[%s6636_s3 + $0x288] sm:$0xff]  ;;  %v2517_v13 = vld [vmem:[%s6636_s3 + $0x280] sm:$0xff] }
 0x1dd   : > { %3146 = vmatprep.subr.mxu1 %v2487_v58  ;;  %3165 = vmatpush3.msra.mxu0 %v2513_v14  ;;  %v2503_v34 = vld [vmem:[%s6636_s3 + $0x210] sm:$0xff]  ;;  %v2502_v60 = vld [vmem:[%s6636_s3 + $0x208] sm:$0xff]  ;;  %v2501_v46 = vld [vmem:[%s6636_s3 + $0x200] sm:$0xff] }
 0x1de   : > { %3147 = vmatpush3.msra.mxu1 %v2471_v42  ;;  %3166 = vmatprep.subr.mxu0 %v2528_v18  ;;  %v2544_v38 = vld [vmem:[%s6636_s3 + $0x358] sm:$0xff]  ;;  %v2542_v4 = vld [vmem:[%s6636_s3 + $0x348] sm:$0xff]  ;;  %v2535_v52 = vld [vmem:[%s6636_s3 + $0x310] sm:$0xff] }
 0x1df   : > { %2324 = vmatmul.mubr.f32.gmra.mxu0 %v6734_v2  ;;  %3148 = vmatprep.subr.mxu1 %v2486_v41  ;;  %v2543_v41 = vld [vmem:[%s6636_s3 + $0x350] sm:$0xff]  ;;  %v2540_v31 = vld [vmem:[%s6636_s3 + $0x338] sm:$0xff]  ;;  %v2538_v10 = vld [vmem:[%s6636_s3 + $0x328] sm:$0xff] }
 0x1e0   : > { %2963 = vmatprep.mubr.msk.f32.mxu0 %vm960_vm1, %v6735_v0  ;;  %3149 = vmatpush3.msra.mxu1 %v2470_v61  ;;  %v2541_v61 = vld [vmem:[%s6636_s3 + $0x340] sm:$0xff]  ;;  %v2539_v2 = vld [vmem:[%s6636_s3 + $0x330] sm:$0xff]  ;;  %v2536_v0 = vld [vmem:[%s6636_s3 + $0x318] sm:$0xff] }
 0x1e1   : > { %3150 = vmatprep.subr.mxu1 %v2485_v35  ;;  %3167 = vmatpush3.msra.mxu0 %v2512_v33 }
 0x1e2   : > { %3151 = vmatpush3.msra.mxu1 %v2469_v32  ;;  %3168 = vmatprep.subr.mxu0 %v2527_v23  ;;  %v2537_v32 = vld [vmem:[%s6636_s3 + $0x320] sm:$0xff] }
 0x1e3   : > { %2329 = vmatmul.mubr.f32.gmra.mxu0 %v6736_v21  ;;  %2699 = vmatmul.mubr.f32.vlgmr.msra.gmra.mxu1 %v2425_v51 }
 0x1e4   : > { %2964 = vmatprep.mubr.msk.f32.mxu0 %vm960_vm1, %v6737_v17  ;;  %2703 = vmatprep.mubr.f32.mxu1 %v2433_v25 }
 0x1e5   : > { %3169 = vmatpush3.msra.mxu0 %v2511_v62  ;;  %3210 = vmatprep.subr.mxu1 %v2544_v38  ;;  %v2534_v62 = vld [vmem:[%s6636_s3 + $0x308] sm:$0xff] }
 0x1e6   : > { %3170 = vmatprep.subr.mxu0 %v2526_v37  ;;  %3211 = vmatpush3.msra.mxu1 %v2544_v38  ;;  %v2533_v37 = vld [vmem:[%s6636_s3 + $0x300] sm:$0xff]  ;;  %v943_v38 = vsub.s32 4, %v4838_v7 }
 0x1e7   : > { %2334 = vmatmul.mubr.f32.gmra.mxu0 %v5959_v24  ;;  %2704 = vmatmul.mubr.f32.gmra.mxu1 %v2432_v22  ;;  %v2523_v24 = vld [vmem:[%s6636_s3 + $0x2b0] sm:$0xff] }
 0x1e8   : > { %3171 = vmatpush3.msra.mxu0 %v2510_v11  ;;  %3212 = vmatprep.subr.mxu1 %v2543_v41 }
 0x1e9   : > { %3172 = vmatprep.subr.mxu0 %v2525_v19  ;;  %3213 = vmatpush3.msra.mxu1 %v2543_v41  ;;  %v947_v41 = vsub.s32 5, %v4838_v7 }
 0x1ea   : > { %3173 = vmatpush3.msra.mxu0 %v2509_v5  ;;  %3214 = vmatprep.subr.mxu1 %v2542_v4 }
 0x1eb   : > { %3174 = vmatprep.subr.mxu0 %v2524_v1  ;;  %3215 = vmatpush3.msra.mxu1 %v2542_v4 }
 0x1ec   : > { %3175 = vmatpush3.msra.mxu0 %v2508_v27  ;;  %3216 = vmatprep.subr.mxu1 %v2541_v61 }
 0x1ed   : > { %3176 = vmatprep.subr.mxu0 %v2523_v24  ;;  %3217 = vmatpush3.msra.mxu1 %v2541_v61 }
 0x1ee   : > { %3177 = vmatpush3.msra.mxu0 %v2507_v43  ;;  %3218 = vmatprep.subr.mxu1 %v2540_v31 }
 0x1ef   : > { %3178 = vmatprep.subr.mxu0 %v2522_v9  ;;  %3219 = vmatpush3.msra.mxu1 %v2540_v31  ;;  %v6558_v31 = vld [vmem:[%s6635_s2] sm:$0x7f] }
 0x1f0   : > { %3179 = vmatpush3.msra.mxu0 %v2506_v28  ;;  %3220 = vmatprep.subr.mxu1 %v2539_v2 }
 0x1f1   : > { %3180 = vmatprep.subr.mxu0 %v2521_v53  ;;  %3221 = vmatpush3.msra.mxu1 %v2539_v2  ;;  %v944_v2 = vrot.slane %v6558_v31, %v943_v38 }
 0x1f2   : > { %3181 = vmatpush3.msra.mxu0 %v2505_v44  ;;  %3222 = vmatprep.subr.mxu1 %v2538_v10 }
 0x1f3   : > { %3182 = vmatprep.subr.mxu0 %v2520_v57  ;;  %3223 = vmatpush3.msra.mxu1 %v2538_v10  ;;  %v948_v10 = vrot.slane %v6558_v31, %v947_v41 }
 0x1f4   : > { %3183 = vmatpush3.msra.mxu0 %v2504_v47  ;;  %v6457_v14 = vpop.f32.mrf.mxu0  ;;  %3224 = vmatprep.subr.mxu1 %v2537_v32 }
 0x1f5   : > { %3184 = vmatprep.subr.mxu0 %v2519_v56  ;;  %3225 = vmatpush3.msra.mxu1 %v2537_v32 }
 0x1f6   : > { %3185 = vmatpush3.msra.mxu0 %v2503_v34  ;;  %v6461_v15 = vpop.f32.mrf.mxu0  ;;  %3226 = vmatprep.subr.mxu1 %v2536_v0 }
 0x1f7   : > { %v6434_v26 = vpop.f32.mrf.mxu1  ;;  %3186 = vmatprep.subr.mxu0 %v2518_v39  ;;  %3227 = vmatpush3.msra.mxu1 %v2536_v0 }
 0x1f8   : > { %3187 = vmatpush3.msra.mxu0 %v2502_v60  ;;  %3228 = vmatprep.subr.mxu1 %v2535_v52 }
 0x1f9   : > { %3188 = vmatprep.subr.mxu0 %v2517_v13  ;;  %v6439_v59 = vpop.f32.mrf.mxu1  ;;  %3229 = vmatpush3.msra.mxu1 %v2535_v52 }
 0x1fa   : > { %3189 = vmatpush3.msra.mxu0 %v2501_v46  ;;  %3230 = vmatprep.subr.mxu1 %v2534_v62 }
 0x1fb   : > { %3231 = vmatpush3.msra.mxu1 %v2534_v62  ;;  %v1752_v62 = vadd.f32 %v6457_v14, %v944_v2 }
 0x1fc   : > { %3232 = vmatprep.subr.mxu1 %v2533_v37 }
 0x1fd   : > { %v6441_v40 = vpop.f32.mrf.mxu1  ;;  %3233 = vmatpush3.msra.mxu1 %v2533_v37  ;;  %v1754_v37 = vadd.f32 %v6461_v15, %v948_v10 }
 0x1ff   : > { %v6443_v8 = vpop.f32.mrf.mxu1  ;;  %v1867_v14 = vadd.f32 %v6439_v59, %v1754_v37 }
 0x202   : > { %v6445_v6 = vpop.f32.mrf.mxu1 }
 0x204   : > { %v6447_v63 = vpop.f32.mrf.mxu1 }
 0x207   : > { %v6449_v3 = vpop.f32.mrf.mxu1 }
 0x209   : > { %v6451_v20 = vpop.f32.mrf.mxu1 }
 0x20c   : > { %v6453_v12 = vpop.f32.mrf.mxu1 }
 0x20e   : > { %v6455_v58 = vpop.f32.mrf.mxu1 }
 0x211   : > { %v6459_v36 = vpop.f32.mrf.mxu1 }
 0x213   : > { %v6463_v29 = vpop.f32.mrf.mxu1 }
 0x215   : > { %v6465_v55 = vpop.f32.mrf.mxu0 }
 0x217   : > { %v6467_v42 = vpop.f32.mrf.mxu1  ;;  %v6469_v18 = vpop.f32.mrf.mxu0 }
 0x219   : > { %v6474_v54 = vpop.f32.mrf.mxu1 }
 0x21b   : > { %v6479_v49 = vpop.f32.mrf.mxu0 }
 0x21d   : > { %v6484_v30 = vpop.f32.mrf.mxu1  ;;  %v6486_v16 = vpop.f32.mrf.mxu0 }
 0x21e   : > { %v1766_v38 = vadd.f32 %v6486_v16, %v948_v10 }
 0x21f   : > { %v6494_v35 = vpop.f32.mrf.mxu1 }
 0x221   : > { %v6496_v33 = vpop.f32.mrf.mxu0 }
 0x223   : > { %v6501_v45 = vpop.f32.mrf.mxu0  ;;  %v6506_v50 = vpop.f32.mrf.mxu1 }
 0x225   : > { %v6514_v25 = vpop.f32.mrf.mxu1 }
 0x227   : > { %v1775_v23 = vpop.f32.mrf.mxu0 }
 0x229   : > { %v1777_v51 = vpop.f32.mrf.mxu0  ;;  %v6522_v21 = vpop.f32.mrf.mxu1 }
 0x22a   : > { %6738 = vst [vmem:[#allocation3_spill] sm:$0xff] %v6522_v21  ;;  %v1764_v21 = vadd.f32 %v6479_v49, %v944_v2 }
 0x22b   : > { %v6527_v22 = vpop.f32.mrf.mxu1 }
 0x22c   : > { %6739 = vst [vmem:[#allocation4_spill] sm:$0xff] %v6527_v22  ;;  %v1877_v16 = vadd.f32 %v6445_v6, %v1764_v21 }
 0x22d   : > { %v1781_v48 = vpop.f32.mrf.mxu0 }
 0x22f   : > { %v1783_v17 = vpop.f32.mrf.mxu0  ;;  %v6529_v19 = vpop.f32.mrf.mxu1 }
 0x231   : > { %v6531_v1 = vpop.f32.mrf.mxu1 }
 0x233   : > { %v1787_v11 = vpop.f32.mrf.mxu0 }
 0x235   : > { %v1789_v5 = vpop.f32.mrf.mxu0  ;;  %v6533_v24 = vpop.f32.mrf.mxu1 }
 0x236   : > { %6740 = vst [vmem:[#allocation2_spill] sm:$0xff] %v6533_v24  ;;  %v1865_v24 = vadd.f32 %v6434_v26, %v1752_v62  ;;  %v1790_v49 = vadd.f32 %v1789_v5, %v948_v10  ;;  %v1784_v26 = vadd.f32 %v1783_v17, %v948_v10 }
 0x237   : > { %v6535_v9 = vpop.f32.mrf.mxu1 }
 0x238   : > { %6741 = vst [vmem:[#allocation6_spill] sm:$0xff] %v6535_v9  ;;  %v1778_v9 = vadd.f32 %v1777_v51, %v948_v10  ;;  %v1772_v51 = vadd.f32 %v6501_v45, %v948_v10 }
 0x239   : > { %v1793_v27 = vpop.f32.mrf.mxu0 }
 0x23a   : > { %v1794_v62 = vadd.f32 %v1793_v27, %v944_v2  ;;  %v1885_v17 = vadd.f32 %v6451_v20, %v1772_v51 }
 0x23b   : > { %v1795_v43 = vpop.f32.mrf.mxu0  ;;  %v6537_v44 = vpop.f32.mrf.mxu1 }
 0x23d   : > { %v6541_v47 = vpop.f32.mrf.mxu1 }
 0x23e   : > { %6742 = vst [vmem:[#allocation5_spill] sm:$0xff] %v6541_v47 }
 0x240   : > { %v1977_v28 = vpop.f32.mrf.mxu0 }
 0x241   : > { %v6545_v34 = vpop.f32.mrf.mxu1  ;;  %v1978_v37 = vadd.f32 %v1977_v28, %v1865_v24  ;;  %v1907_v28 = vadd.f32 %v6484_v30, %v1794_v62 }
 0x242   : > { %v1979_v53 = vpop.f32.mrf.mxu0  ;;  %6743 = vst [vmem:[#allocation8_spill] sm:$0xff] %v6545_v34  ;;  %v1760_v34 = vadd.f32 %v6469_v18, %v948_v10 }
 0x243   : > { %v6547_v13 = vpop.f32.mrf.mxu1 }
 0x244   : > { %6744 = vst [vmem:[#allocation17_spill] sm:$0xff] %v6547_v13  ;;  %v1758_v13 = vadd.f32 %v6465_v55, %v944_v2  ;;  %v1873_v55 = vadd.f32 %v6443_v8, %v1760_v34  ;;  %v1891_v8 = vadd.f32 %v6455_v58, %v1778_v9 }
 0x246   : > { %v6553_v4 = vpop.f32.mrf.mxu1  ;;  %v1871_v15 = vadd.f32 %v6441_v40, %v1758_v13  ;;  %v1796_v13 = vadd.f32 %v1795_v43, %v948_v10 }
 0x247   : > { %v6539_v57 = vpop.f32.mrf.mxu0  ;;  %6745 = vst [vmem:[#allocation24_spill] sm:$0xff] %v6553_v4  ;;  %v1776_v4 = vadd.f32 %v1775_v23, %v944_v2  ;;  %v1879_v23 = vadd.f32 %v6447_v63, %v1766_v38  ;;  %v1980_v63 = vadd.f32 %v1979_v53, %v1867_v14 }
 0x248   : > { %v6562_v32 = vpop.f32.mrf.mxu1 }
 0x249   : > { %v6543_v56 = vpop.f32.mrf.mxu0  ;;  %6746 = vst [vmem:[#allocation9_spill] sm:$0xff] %v6562_v32  ;;  %v1788_v32 = vadd.f32 %v1787_v11, %v944_v2  ;;  %v1782_v11 = vadd.f32 %v1781_v48, %v944_v2  ;;  %v1889_v59 = vadd.f32 %v6453_v12, %v1776_v4  ;;  %v1903_v48 = vadd.f32 %v6474_v54, %v1790_v49 }
 0x24a   : > { %v1909_v54 = vadd.f32 %v6494_v35, %v1796_v13 }
 0x24b   : > { %v1901_v34 = vadd.f32 %v6467_v42, %v1788_v32  ;;  %v1895_v58 = vadd.f32 %v6459_v36, %v1782_v11  ;;  %v1897_v42 = vadd.f32 %v6463_v29, %v1784_v26  ;;  %v1986_v36 = vadd.f32 %v6543_v56, %v1873_v55 }
 0x24c   : > { %v6568_v22 = vpop.f32.mrf.mxu1 }
 0x24d   : > { %v1989_v39 = vpop.f32.mrf.mxu0  ;;  %6747 = vst [vmem:[#allocation32_spill] sm:$0xff] %v6568_v22  ;;  %v1770_v22 = vadd.f32 %v6496_v33, %v944_v2 }
 0x24e   : > { %v6576_v47 = vpop.f32.mrf.mxu1  ;;  %v1990_v33 = vadd.f32 %v1989_v39, %v1877_v16  ;;  %v2343_v39 = vmax.f32 %v1978_v37, 0.0  ;;  %v1984_v16 = vadd.f32 %v6539_v57, %v1871_v15 }
 0x24f   : > { %v1991_v60 = vpop.f32.mrf.mxu0  ;;  %v1883_v12 = vadd.f32 %v6449_v3, %v1770_v22  ;;  %v2344_v3 = vmax.f32 %v1980_v63, 0.0 }
 0x250   : > { %v1992_v40 = vadd.f32 %v1991_v60, %v1879_v23  ;;  %v2357_v53 = vmax.f32 %v1990_v33, 0.0 }
 0x252   : > { %v6585_v5 = vpop.f32.mrf.mxu1  ;;  %v2358_v24 = vmax.f32 %v1992_v40, 0.0  ;;  %v2399_v23 = vmax.f32 %v2343_v39, %v2357_v53  ;;  %v3010_v53 = vadd.f32 %v6531_v1, %v6529_v19  ;;  %v6753_v1 = vld [vmem:[#allocation3_spill] sm:$0xff] }
 0x253   : > { %v6549_v46 = vpop.f32.mrf.mxu0 }
 0x254   : > { %v6593_v60 = vpop.f32.mrf.mxu1  ;;  %v1996_v29 = vadd.f32 %v6549_v46, %v1883_v12 }
 0x255   : > { %v1997_v61 = vpop.f32.mrf.mxu0 }
 0x256   : > { %v1998_v22 = vadd.f32 %v1997_v61, %v1885_v17  ;;  %v2364_v56 = vmax.f32 %v1996_v29, 0.0  ;;  %v6750_v29 = vld [vmem:[#allocation6_spill] sm:$0xff] }
 0x258   : > { %v2001_v0 = vpop.f32.mrf.mxu0  ;;  %v2365_v61 = vmax.f32 %v1998_v22, 0.0  ;;  %v6748_v22 = vld [vmem:[#allocation5_spill] sm:$0xff] }
 0x259   : > { %v2002_v6 = vadd.f32 %v2001_v0, %v1889_v59  ;;  %v6599_v51 = vpop.f32.mrf.mxu1 }
 0x25a   : > { %v2003_v52 = vpop.f32.mrf.mxu0 }
 0x25b   : > { %v2004_v38 = vadd.f32 %v2003_v52, %v1891_v8  ;;  %v2371_v4 = vmax.f32 %v2002_v6, 0.0  ;;  %v2400_v52 = vmax.f32 %v2344_v3, %v2358_v24  ;;  %v3062_v8 = vpop.f32.mrf.mxu1 }
 0x25d   : > { %v2372_v20 = vmax.f32 %v2004_v38, 0.0 }
 0x25e   : > { %v2007_v41 = vpop.f32.mrf.mxu0 }
 0x25f   : > { %v2008_v10 = vadd.f32 %v2007_v41, %v1895_v58  ;;  %v2351_v41 = vmax.f32 %v1986_v36, 0.0  ;;  %v3064_v33 = vpop.f32.mrf.mxu1  ;;  %v6749_v36 = vld [vmem:[#allocation2_spill] sm:$0xff] }
 0x260   : > { %v2009_v18 = vpop.f32.mrf.mxu0 }
 0x261   : > { %v2010_v30 = vadd.f32 %v2009_v18, %v1897_v42  ;;  %v2378_v55 = vmax.f32 %v2008_v10, 0.0  ;;  %v2350_v18 = vmax.f32 %v1984_v16, 0.0  ;;  %v2407_v57 = vmax.f32 %v2351_v41, %v2365_v61 }
 0x262   : > { %v3013_v10 = vadd.f32 %v6750_v29, %v6749_v36 }
 0x263   : > { %v2379_v62 = vmax.f32 %v2010_v30, 0.0  ;;  %v2406_v13 = vmax.f32 %v2350_v18, %v2364_v56 }
 0x264   : > { %v2013_v21 = vpop.f32.mrf.mxu0 }
 0x265   : > { %v2014_v45 = vadd.f32 %v2013_v21, %v1901_v34  ;;  %v3065_v21 = vpop.f32.mrf.mxu1 }
 0x266   : > { %v2015_v27 = vpop.f32.mrf.mxu0 }
 0x267   : > { %v2385_v43 = vmax.f32 %v2014_v45, 0.0  ;;  %v2016_v9 = vadd.f32 %v2015_v27, %v1903_v48  ;;  %v3067_v63 = vpop.f32.mrf.mxu1 }
 0x269   : > { %v2386_v2 = vmax.f32 %v2016_v9, 0.0  ;;  %v2413_v32 = vmax.f32 %v2371_v4, %v2385_v43  ;;  %v3068_v38 = vpop.f32.mrf.mxu1  ;;  %v951_v43 = vsub.s32 6, %v4838_v7 }
 0x26a   : > { %v2019_v0 = vpop.f32.mrf.mxu0  ;;  %v3069_v41 = vadd.f32 %v3068_v38, %v3067_v63 }
 0x26b   : > { %v2414_v14 = vmax.f32 %v2372_v20, %v2386_v2  ;;  %v2020_v49 = vadd.f32 %v2019_v0, %v1907_v28  ;;  %v2427_v46 = vmax.f32 %v2399_v23, %v2413_v32  ;;  %v3070_v45 = vpop.f32.mrf.mxu1  ;;  %v952_v4 = vrot.slane %v6558_v31, %v951_v43  ;;  %v6751_v0 = vld [vmem:[#allocation24_spill] sm:$0xff]  ;;  %v6756_v23 = vld [vmem:[#allocation17_spill] sm:$0xff] }
 0x26c   : > { %v2021_v35 = vpop.f32.mrf.mxu0  ;;  %v3016_v20 = vadd.f32 %v6748_v22, %v6537_v44  ;;  %v6754_v31 = vld [vmem:[#allocation4_spill] sm:$0xff] }
 0x26d   : > { %v2392_v11 = vmax.f32 %v2020_v49, 0.0  ;;  %v2022_v26 = vadd.f32 %v2021_v35, %v1909_v54  ;;  %v2428_v59 = vmax.f32 %v2400_v52, %v2414_v14  ;;  %v3071_v48 = vpop.f32.mrf.mxu1  ;;  %v3004_v54 = vadd.f32 %v6514_v25, %v6506_v50  ;;  %v6752_v52 = vld [vmem:[#allocation9_spill] sm:$0xff]  ;;  %v6755_v44 = vld [vmem:[#allocation8_spill] sm:$0xff] }
 0x26e   : > { %v2101_v32 = vadd.f32 %v3010_v53, %v952_v4  ;;  %v3022_v30 = vadd.f32 %v6752_v52, %v6751_v0  ;;  %v3066_v14 = vadd.f32 %v3065_v21, %v3064_v33  ;;  %v3007_v49 = vadd.f32 %v6754_v31, %v6753_v1 }
 0x26f   : > { %v2393_v40 = vmax.f32 %v2022_v26, 0.0  ;;  %2773 = vmatprep.mubr.f32.mxu0 %v2428_v59  ;;  %v2420_v34 = vmax.f32 %v2378_v55, %v2392_v11  ;;  %v2091_v19 = vadd.f32 %v3004_v54, %v952_v4  ;;  %v3060_v50 = vadd.f32 %v6593_v60, %v6585_v5  ;;  %v6757_v59 = vld [vmem:[#allocation32_spill] sm:$0xff] }
 0x270   : > { %2774 = vmatmul.mubr.f32.vlgmr.msra.gmra.mxu0 %v2427_v46  ;;  %v3073_v17 = vpop.f32.mrf.mxu1  ;;  %v2111_v16 = vadd.f32 %v3016_v20, %v952_v4  ;;  %v3019_v35 = vadd.f32 %v6756_v23, %v6755_v44  ;;  %v3072_v61 = vadd.f32 %v3071_v48, %v3070_v45  ;;  %v2106_v26 = vadd.f32 %v3013_v10, %v952_v4 }
 0x271   : > { %v2421_v15 = vmax.f32 %v2379_v62, %v2393_v40  ;;  %v2434_v6 = vmax.f32 %v2406_v13, %v2420_v34  ;;  %v3025_v56 = vadd.f32 %v6576_v47, %v6757_v59  ;;  %v2121_v46 = vadd.f32 %v3022_v30, %v952_v4 }
 0x272   : > { %v3074_v27 = vpop.f32.mrf.mxu1  ;;  %v2206_v40 = vadd.f32 %v3066_v14, %v2101_v32  ;;  %v2096_v18 = vadd.f32 %v3007_v49, %v952_v4  ;;  %v3063_v34 = vadd.f32 %v3062_v8, %v6599_v51  ;;  %v2196_v5 = vadd.f32 %v3060_v50, %v2091_v19 }
 0x273   : > { %v2435_v37 = vmax.f32 %v2407_v57, %v2421_v15  ;;  %v2116_v57 = vadd.f32 %v3019_v35, %v952_v4  ;;  %v3075_v15 = vadd.f32 %v3074_v27, %v3073_v17  ;;  %v2216_v33 = vadd.f32 %v3072_v61, %v2111_v16  ;;  %v2965_v61 = vld [vmem:[%s6637_s4] ss:$0 sm:$0xff] }
 0x274   : > { %v2211_v47 = vadd.f32 %v3069_v41, %v2106_v26  ;;  %v2201_v63 = vadd.f32 %v3063_v34, %v2096_v18 }
 0x275   : > { %2778 = vmatprep.mubr.f32.mxu0 %v2435_v37  ;;  %v3076_v28 = vpop.f32.mrf.mxu1 }
 0x276   : > { %2779 = vmatmul.mubr.f32.gmra.mxu0 %v2434_v6  ;;  %v2126_v6 = vadd.f32 %v3025_v56, %v952_v4 }
 0x277   : > { %v3077_v2 = vpop.f32.mrf.mxu1 }
 0x278   : > { %v3078_v62 = vadd.f32 %v3077_v2, %v3076_v28 }
 0x27a   : > { %v3079_v11 = vpop.f32.mrf.mxu1 }
 0x27c   : > { %v3080_v13 = vpop.f32.mrf.mxu1 }
 0x27d   : > { %v3081_v21 = vadd.f32 %v3080_v13, %v3079_v11 }
 0x27f   : > { %v2231_v54 = vadd.f32 %v3081_v21, %v2126_v6 }
 0x28b   : > { %v2300_v12 = vpop.f32.mrf.mxu0 }
 0x28c   : > { %v2301_v45 = vadd.f32 %v2300_v12, %v2196_v5 }
 0x28d   : > { %v2302_v58 = vpop.f32.mrf.mxu0 }
 0x28e   : > { %v2345_v8 = vmax.f32 %v2301_v45, 0.0 }
 0x28f   : > { %v2305_v42 = vpop.f32.mrf.mxu0 }
 0x290   : > { %v2306_v17 = vadd.f32 %v2305_v42, %v2201_v63  ;;  %v3114_v42 = vpop.f32.mrf.mxu1 }
 0x291   : > { %v2307_v24 = vpop.f32.mrf.mxu0 }
 0x292   : > { %v2226_v24 = vadd.f32 %v3078_v62, %v2121_v46  ;;  %v2352_v10 = vmax.f32 %v2306_v17, 0.0  ;;  %v3115_v14 = vpop.f32.mrf.mxu1 }
 0x293   : > { %v2310_v9 = vpop.f32.mrf.mxu0  ;;  %v3116_v23 = vadd.f32 %v3115_v14, %v3114_v42 }
 0x294   : > { %v2311_v37 = vadd.f32 %v2310_v9, %v2206_v40  ;;  %v3117_v19 = vpop.f32.mrf.mxu1 }
 0x295   : > { %v2312_v39 = vpop.f32.mrf.mxu0 }
 0x296   : > { %v2359_v43 = vmax.f32 %v2311_v37, 0.0  ;;  %v2221_v39 = vadd.f32 %v3075_v15, %v2116_v57  ;;  %v3118_v1 = vpop.f32.mrf.mxu1 }
 0x297   : > { %v2315_v3 = vpop.f32.mrf.mxu0  ;;  %v3119_v11 = vadd.f32 %v3118_v1, %v3117_v19 }
 0x298   : > { %v2316_v28 = vadd.f32 %v2315_v3, %v2211_v47  ;;  %v2401_v20 = vmax.f32 %v2345_v8, %v2359_v43 }
 0x299   : > { %v2317_v7 = vpop.f32.mrf.mxu0  ;;  %v2631_v41 = vadd.f32 %v3119_v11, %v2965_v61 }
 0x29a   : > { %v2366_v12 = vmax.f32 %v2316_v28, 0.0 }
 0x29b   : > { %v2320_v25 = vpop.f32.mrf.mxu0 }
 0x29c   : > { %v2321_v58 = vadd.f32 %v2320_v25, %v2216_v33  ;;  %v2408_v0 = vmax.f32 %v2352_v10, %v2366_v12 }
 0x29d   : > { %v2322_v55 = vpop.f32.mrf.mxu0 }
 0x29e   : > { %v2373_v27 = vmax.f32 %v2321_v58, 0.0  ;;  %v2626_v55 = vadd.f32 %v3116_v23, %v2965_v61 }
 0x29f   : > { %v2325_v60 = vpop.f32.mrf.mxu0 }
 0x2a0   : > { %v2326_v9 = vadd.f32 %v2325_v60, %v2221_v39 }
 0x2a1   : > { %v2327_v48 = vpop.f32.mrf.mxu0 }
 0x2a2   : > { %v2380_v7 = vmax.f32 %v2326_v9, 0.0 }
 0x2a3   : > { %v2330_v38 = vpop.f32.mrf.mxu0  ;;  %v3152_v31 = vpop.f32.mrf.mxu1 }
 0x2a4   : > { %v2331_v51 = vadd.f32 %v2330_v38, %v2226_v24 }
 0x2a5   : > { %v2332_v53 = vpop.f32.mrf.mxu0  ;;  %v3153_v50 = vpop.f32.mrf.mxu1 }
 0x2a6   : > { %v2387_v22 = vmax.f32 %v2331_v51, 0.0  ;;  %v3154_v26 = vadd.f32 %v3153_v50, %v3152_v31 }
 0x2a7   : > { %v2335_v4 = vpop.f32.mrf.mxu0  ;;  %v3155_v16 = vpop.f32.mrf.mxu1 }
 0x2a8   : > { %v2415_v2 = vmax.f32 %v2373_v27, %v2387_v22  ;;  %v2336_v36 = vadd.f32 %v2335_v4, %v2231_v54  ;;  %v2701_v40 = vadd.f32 %v3154_v26, %v2626_v55 }
 0x2a9   : > { %v2337_v29 = vpop.f32.mrf.mxu0  ;;  %v3156_v35 = vpop.f32.mrf.mxu1 }
 0x2aa   : > { %v2429_v3 = vmax.f32 %v2401_v20, %v2415_v2  ;;  %v2394_v32 = vmax.f32 %v2336_v36, 0.0  ;;  %v3157_v56 = vadd.f32 %v3156_v35, %v3155_v16 }
 0x2ac   : > { %v2422_v52 = vmax.f32 %v2380_v7, %v2394_v32  ;;  %3234 = vmatprep.mubr.msk.f32.mxu1 %vm2552_vm2, %v2429_v3  ;;  %v2706_v18 = vadd.f32 %v3157_v56, %v2631_v41 }
 0x2ae   : > { %v2436_v30 = vmax.f32 %v2408_v0, %v2422_v52 }
 0x2b0   : > { %3235 = vmatmul.mubr.msk.f32.vlgmr.msra.gmra.mxu1 %vm2552_vm2, %v2436_v30 }
 0x330   : > { %v3190_v49 = vpop.f32.mrf.mxu0 }
 0x332   : > { %v3191_v25 = vpop.f32.mrf.mxu0 }
 0x333   : > { %v3192_v46 = vadd.f32 %v3191_v25, %v3190_v49 }
 0x335   : > { %v2776_v5 = vadd.f32 %v3192_v46, %v2701_v40 }
 0x336   : > { %v3193_v44 = vpop.f32.mrf.mxu0 }
 0x338   : > { %v3194_v59 = vpop.f32.mrf.mxu0 }
 0x339   : > { %v3195_v62 = vadd.f32 %v3194_v59, %v3193_v44 }
 0x33b   : > { %v2781_v60 = vadd.f32 %v3195_v62, %v2706_v18 }
 0x370   : > { %v3236_v34 = vpop.f32.mrf.mxu1 }
 0x371   : > { %v2856_v13 = vadd.f32 %v3236_v34, %v2781_v60 }
 0x372   : > { %v2850_v57 = vpop.f32.mrf.mxu1 }
 0x373   : > { %v2851_v15 = vadd.f32 %v2850_v57, %v2776_v5  ;;  %2860 = vst [vmem:[%s229_s24 + $0x8] sm:$0xff] %v2856_v13 }
 0x375   : > { %2859 = vst [vmem:[%s229_s24] sm:$0xff] %v2851_v15 }
 0x376 PF: > { %s15_s18 = sadd.s32 1, %s3305_s18  }
 0x377   : > { %p12_p5 = scmp.ge.s32.totalorder %s15_s18, 4  }
 0x379   :  { %14 = sbr.rel (!%p12_p5) target bundleno = 1 (0x1), region = 70 }

</bundles_post_ra>
